<compile_context>
chip_gen: v5e
topology: v5e:2x2
jax: 0.10.0
libtpu: 0.0.40
codegen_flags: <defaults>
</compile_context>

<pallas_src>
import jax
import jax.numpy as jnp
from jax.experimental import pallas as pl
from jax.experimental.pallas import tpu as pltpu

# ----------------------------- configuration --------------------------------
B = 2                 # batch
IMG = 16              # image spatial size (NCHW: (B, 3, IMG, IMG))
PATCH = 8             # ViT patch size -> 4 patches
NUM_PATCHES = (IMG // PATCH) ** 2
S_ENC = NUM_PATCHES + 1            # CLS + patches
PATCH_DIM = 3 * PATCH * PATCH
E = 32                # encoder hidden size (embedding_dim)
VIT_HEADS = 4
VIT_LAYERS = 2
VIT_MLP = 64
H = 32                # GPT-2 hidden size (n_embd)
GPT_HEADS = 4
GPT_LAYERS = 2
GPT_MLP = 128
VOCAB = 64
MAX_POS = 32
TGT_LEN = 7           # target caption length
SEQ = 1 + TGT_LEN     # BOS + targets = decoder sequence length
BOS = VOCAB - 1       # synthetic bos == eos (GPT-2 ties them)

RE = B * S_ENC        # encoder rows with batch folded into sublanes
RD = B * SEQ          # decoder rows with batch folded into sublanes
SLAB_LANES = 128      # lane-dense weight slab width
LOGIT_PAD = 128       # lane-dense LM-head / output width (>= VOCAB)


# ----------------------------- in-kernel helpers ------------------------------
def _layernorm(x, g, b, eps):
    mu = jnp.mean(x, axis=-1, keepdims=True)
    xc = x - mu
    var = jnp.mean(xc * xc, axis=-1, keepdims=True)
    return xc * jax.lax.rsqrt(var + eps) * g + b


def _gelu_tanh(y):
    c = jnp.float32(0.7978845608028654)  # sqrt(2/pi)
    return 0.5 * y * (1.0 + jnp.tanh(c * (y + 0.044715 * y * y * y)))


def _softmax_rows(s):
    m = jnp.max(s, axis=-1, keepdims=True)
    p = jnp.exp(s - m)
    return p / jnp.sum(p, axis=-1, keepdims=True)   # exact (training path)


def _mhsa(x, qkv_w, qkv_b, wo, bo, n_heads, bias):
    """Fused-QKV multi-head self-attention on a 2D (R, D) row slab.

    Head outputs are lane-concatenated and hit a single (R,D)@(D,D) output
    projection (one matmul instead of n_heads tiny accumulating matmuls).
    `bias` is an additive (R, R) mask (block-diagonal over folded batch,
    optionally causal).
    """
    R, D = x.shape
    dh = D // n_heads
    scale = 1.0 / (dh ** 0.5)
    qkv = jnp.dot(x, qkv_w, preferred_element_type=jnp.float32) + qkv_b   # (R, 3D)
    heads = []
    for h in range(n_heads):
        q = qkv[:, h * dh:(h + 1) * dh]
        k = qkv[:, D + h * dh:D + (h + 1) * dh]
        v = qkv[:, 2 * D + h * dh:2 * D + (h + 1) * dh]
        # contract on last axes of both -> no explicit k.T materialization
        s = jax.lax.dot_general(q, k, (((1,), (1,)), ((), ())),
                                preferred_element_type=jnp.float32) * scale
        s = s + bias
        p = _softmax_rows(s)
        heads.append(jnp.dot(p, v, preferred_element_type=jnp.float32))   # (R, dh)
    o = jnp.concatenate(heads, axis=-1)                                   # (R, D)
    return jnp.dot(o, wo, preferred_element_type=jnp.float32) + bo


# ----------------------------- fused forward kernel ---------------------------
def _make_kernel(layout):
    """Single kernel: encoder -> pool -> projection -> cross-const -> GPT-2 -> logits."""

    def kernel(patches_ref, onehot_ref, slab_ref, out_ref):
        def W(name):
            off, n, m = layout[name]
            return slab_ref[off:off + n, 0:m]     # static slice into the weight slab

        enc_bias = W("enc_bias")                  # (RE, RE) block-diagonal over batch
        dec_bias = W("dec_bias")                  # (RD, RD) block-diag + causal

        # ---------------- encoder: ViT blocks on (B*S_ENC, E) rows ----------------
        x = jnp.dot(patches_ref[...], W("patch_w"),
                    preferred_element_type=jnp.float32)
        x = x + jnp.concatenate([W("embed_add")] * B, axis=0)   # cls/patch bias + pos
        for l in range(VIT_LAYERS):
            h = _layernorm(x, W(f"e{l}_ln1_g"), W(f"e{l}_ln1_b"), 1e-12)
            x = x + _mhsa(h, W(f"e{l}_qkv_w"), W(f"e{l}_qkv_b"),
                          W(f"e{l}_wo"), W(f"e{l}_bo"), VIT_HEADS, enc_bias)
            h = _layernorm(x, W(f"e{l}_ln2_g"), W(f"e{l}_ln2_b"), 1e-12)
            m = _gelu_tanh(jnp.dot(h, W(f"e{l}_fc1_w"),
                                   preferred_element_type=jnp.float32)
                           + W(f"e{l}_fc1_b"))
            x = x + jnp.dot(m, W(f"e{l}_fc2_w"),
                            preferred_element_type=jnp.float32) + W(f"e{l}_fc2_b")
        x = _layernorm(x, W("e_lnf_g"), W("e_lnf_b"), 1e-12)     # last_hidden_state

        # mean-pool per batch item (.mean(dim=1)), then image projection -> (B, H)
        pooled = jnp.concatenate(
            [jnp.mean(x[b * S_ENC:(b + 1) * S_ENC, :], axis=0, keepdims=True)
             for b in range(B)], axis=0)                                   # (B, E)
        proj = jnp.dot(pooled, W("img_proj_w"),
                       preferred_element_type=jnp.float32) + W("img_proj_b")  # (B, H)

        # ------------ cross-attention collapses to a per-batch constant ------------
        # Single KV position -> softmax over the length-1 axis is exactly 1, so each
        # cross-attn head output is just its value vector: the whole per-layer
        # "parallel" self-attention (query path) is mathematically dead.
        cross = jnp.zeros((B, H), jnp.float32)
        for l in range(GPT_LAYERS):
            v = jnp.dot(proj, W(f"c{l}_wv"),
                        preferred_element_type=jnp.float32) + W(f"c{l}_bv")
            cross = cross + jnp.dot(v, W(f"c{l}_wo"),
                                    preferred_element_type=jnp.float32) + W(f"c{l}_bo")

        # ---------------- decoder: GPT-2 forward on (B*SEQ, H) rows ----------------
        # token embedding gather as one-hot matmul against wte (in VMEM)
        inp = jnp.dot(onehot_ref[...], W("wte"),
                      preferred_element_type=jnp.float32)                  # (RD, H)
        h = (inp
             + jnp.concatenate([jnp.broadcast_to(cross[b:b + 1, :], (SEQ, H))
                                for b in range(B)], axis=0)
             + jnp.concatenate([W("wpe")] * B, axis=0))
        for l in range(GPT_LAYERS):
            a_in = _layernorm(h, W(f"g{l}_ln1_g"), W(f"g{l}_ln1_b"), 1e-5)
            h = h + _mhsa(a_in, W(f"g{l}_qkv_w"), W(f"g{l}_qkv_b"),
                          W(f"g{l}_wo"), W(f"g{l}_bo"), GPT_HEADS, dec_bias)
            m_in = _layernorm(h, W(f"g{l}_ln2_g"), W(f"g{l}_ln2_b"), 1e-5)
            m = _gelu_tanh(jnp.dot(m_in, W(f"g{l}_fc1_w"),
                                   preferred_element_type=jnp.float32)
                           + W(f"g{l}_fc1_b"))
            h = h + jnp.dot(m, W(f"g{l}_fc2_w"),
                            preferred_element_type=jnp.float32) + W(f"g{l}_fc2_b")
        h = _layernorm(h, W("d_lnf_g"), W("d_lnf_b"), 1e-5)
        # tied LM head, lane-dense: wte pre-transposed & zero-padded to 128 lanes
        out_ref[...] = jnp.dot(h, W("wte_t"), preferred_element_type=jnp.float32)

    return kernel


# ----------------------------- weight slab packing ----------------------------
def build_slab(params):
    """Pack all weights/biases (+ attention biases) into one (rows, 128) f32 slab.

    Runs ONCE at setup (outside the jitted forward).  Every item starts at an
    8-row-aligned offset so in-kernel static slices are tile-aligned.
    """
    enc = params["encoder"]
    dec = params["decoder"]
    items = []

    def add(name, arr):
        arr = jnp.asarray(arr, jnp.float32)
        if arr.ndim == 1:
            arr = arr.reshape(1, -1)
        items.append((name, arr))

    # ----- encoder -----
    add("patch_w", enc["patch_w"])
    embed_add = jnp.concatenate(
        [enc["cls"].reshape(1, E) + enc["pos"][0, 0:1],
         enc["pos"][0, 1:] + enc["patch_b"][None, :]], axis=0)             # (S_ENC, E)
    add("embed_add", embed_add)
    for l, lp in enumerate(enc["layers"]):
        add(f"e{l}_qkv_w", jnp.concatenate([lp["wq"], lp["wk"], lp["wv"]], axis=1))
        add(f"e{l}_qkv_b", jnp.concatenate([lp["bq"], lp["bk"], lp["bv"]], axis=0))
        add(f"e{l}_wo", lp["wo"]); add(f"e{l}_bo", lp["bo"])
        add(f"e{l}_ln1_g", lp["ln1_g"]); add(f"e{l}_ln1_b", lp["ln1_b"])
        add(f"e{l}_ln2_g", lp["ln2_g"]); add(f"e{l}_ln2_b", lp["ln2_b"])
        add(f"e{l}_fc1_w", lp["fc1_w"]); add(f"e{l}_fc1_b", lp["fc1_b"])
        add(f"e{l}_fc2_w", lp["fc2_w"]); add(f"e{l}_fc2_b", lp["fc2_b"])
    add("e_lnf_g", enc["ln_f_g"]); add("e_lnf_b", enc["ln_f_b"])
    add("img_proj_w", dec["img_proj_w"]); add("img_proj_b", dec["img_proj_b"])

    # ----- decoder -----
    add("wte", dec["wte"])
    wte_t = jnp.zeros((H, LOGIT_PAD), jnp.float32).at[:, :VOCAB].set(dec["wte"].T)
    add("wte_t", wte_t)
    add("wpe", dec["wpe"][:SEQ])
    for l, lp in enumerate(dec["gpt_layers"]):
        add(f"g{l}_qkv_w", jnp.concatenate([lp["wq"], lp["wk"], lp["wv"]], axis=1))
        add(f"g{l}_qkv_b", jnp.concatenate([lp["bq"], lp["bk"], lp["bv"]], axis=0))
        add(f"g{l}_wo", lp["wo"]); add(f"g{l}_bo", lp["bo"])
        add(f"g{l}_ln1_g", lp["ln1_g"]); add(f"g{l}_ln1_b", lp["ln1_b"])
        add(f"g{l}_ln2_g", lp["ln2_g"]); add(f"g{l}_ln2_b", lp["ln2_b"])
        add(f"g{l}_fc1_w", lp["fc1_w"]); add(f"g{l}_fc1_b", lp["fc1_b"])
        add(f"g{l}_fc2_w", lp["fc2_w"]); add(f"g{l}_fc2_b", lp["fc2_b"])
    for l, lp in enumerate(dec["cross_layers"]):
        # q/k projections are mathematically dead (single-KV softmax == 1): skip them.
        add(f"c{l}_wv", lp["wv"]); add(f"c{l}_bv", lp["bv"])
        add(f"c{l}_wo", lp["wo"]); add(f"c{l}_bo", lp["bo"])
    add("d_lnf_g", dec["ln_f_g"]); add("d_lnf_b", dec["ln_f_b"])

    # ----- attention biases for the folded-batch row layout (precomputed once) -----
    r = jnp.arange(RE)[:, None]; c = jnp.arange(RE)[None, :]
    enc_bias = jnp.where((r // S_ENC) == (c // S_ENC), 0.0, -1e9).astype(jnp.float32)
    add("enc_bias", enc_bias)
    r = jnp.arange(RD)[:, None]; c = jnp.arange(RD)[None, :]
    dec_bias = jnp.where(((r // SEQ) == (c // SEQ)) & ((c % SEQ) <= (r % SEQ)),
                         0.0, -1e9).astype(jnp.float32)
    add("dec_bias", dec_bias)

    # lay out: each item at an 8-row aligned offset, lanes zero-padded to 128
    layout = {}
    row = 0
    for name, arr in items:
        n, m = arr.shape
        assert m <= SLAB_LANES, (name, arr.shape)
        layout[name] = (row, n, m)
        row += -(-n // 8) * 8
    slab = jnp.zeros((max(row, 8), SLAB_LANES), jnp.float32)
    for name, arr in items:
        off, n, m = layout[name]
        slab = slab.at[off:off + n, :m].set(arr)
    return slab, layout


# ----------------------------- JAX wrapper ------------------------------------
def make_forward(layout, slab_rows):
    kernel = _make_kernel(layout)

    @jax.jit
    def forward(slab, image, target_tokens):
        # ----- glue: patchify (conv stride=patch == unfold + linear), fold batch -----
        x = image.reshape(B, 3, IMG // PATCH, PATCH, IMG // PATCH, PATCH)
        patches = x.transpose(0, 2, 4, 1, 3, 5).reshape(B, NUM_PATCHES, PATCH_DIM)
        # prepend an all-zero row so the CLS position flows through the same matmul
        patches = jnp.concatenate(
            [jnp.zeros((B, 1, PATCH_DIM), jnp.float32), patches], axis=1)
        patches = patches.reshape(RE, PATCH_DIM)

        # ----- glue: BOS prepend + one-hot (embedding gather happens in-kernel) -----
        start = jnp.full((B, 1), BOS, jnp.int32)
        input_tokens = jnp.concatenate([start, target_tokens.astype(jnp.int32)], axis=1)
        onehot = jax.nn.one_hot(input_tokens.reshape(RD), VOCAB, dtype=jnp.float32)
        # TODO(synk): the module's attention_mask = (tokens != pad_token_id=0); no
        # synthetic token is 0, so the mask is all ones -> additive 0 in GPT-2.

        logits = pl.pallas_call(
            kernel,
            out_shape=jax.ShapeDtypeStruct((RD, LOGIT_PAD), jnp.float32),
            grid=(1,),
            in_specs=[
                pl.BlockSpec((RE, PATCH_DIM), lambda i: (0, 0)),
                pl.BlockSpec((RD, VOCAB), lambda i: (0, 0)),
                pl.BlockSpec((slab_rows, SLAB_LANES), lambda i: (0, 0)),
            ],
            out_specs=pl.BlockSpec((RD, LOGIT_PAD), lambda i: (0, 0)),
            compiler_params=pltpu.CompilerParams(
                dimension_semantics=("arbitrary",)),
        )(patches, onehot, slab)
        # lane-dense (RD, 128) result -> (B, SEQ, VOCAB); module returns [:, :-1, :]
        return logits.reshape(B, SEQ, LOGIT_PAD)[:, :-1, :VOCAB]

    return forward


# ----------------------------- deterministic params --------------------------
def init_params(key):
    ks = iter(jax.random.split(key, 512))

    def nrm(*shape):
        return 0.02 * jax.random.normal(next(ks), shape, jnp.float32)

    def ones(*shape):
        return jnp.ones(shape, jnp.float32)

    def zeros(*shape):
        return jnp.zeros(shape, jnp.float32)

    def attn_block(d):
        return dict(wq=nrm(d, d), bq=zeros(d), wk=nrm(d, d), bk=zeros(d),
                    wv=nrm(d, d), bv=zeros(d), wo=nrm(d, d), bo=zeros(d))

    enc_layers = []
    for _ in range(VIT_LAYERS):
        lp = attn_block(E)
        lp.update(ln1_g=ones(E), ln1_b=zeros(E), ln2_g=ones(E), ln2_b=zeros(E),
                  fc1_w=nrm(E, VIT_MLP), fc1_b=zeros(VIT_MLP),
                  fc2_w=nrm(VIT_MLP, E), fc2_b=zeros(E))
        enc_layers.append(lp)
    encoder = dict(patch_w=nrm(PATCH_DIM, E), patch_b=zeros(E),
                   cls=nrm(1, 1, E), pos=nrm(1, NUM_PATCHES + 1, E),
                   layers=enc_layers, ln_f_g=ones(E), ln_f_b=zeros(E))

    gpt_layers = []
    for _ in range(GPT_LAYERS):
        lp = attn_block(H)
        lp.update(ln1_g=ones(H), ln1_b=zeros(H), ln2_g=ones(H), ln2_b=zeros(H),
                  fc1_w=nrm(H, GPT_MLP), fc1_b=zeros(GPT_MLP),
                  fc2_w=nrm(GPT_MLP, H), fc2_b=zeros(H))
        gpt_layers.append(lp)
    cross_layers = [attn_block(H) for _ in range(GPT_LAYERS)]
    decoder = dict(img_proj_w=nrm(E, H), img_proj_b=zeros(H),
                   wte=nrm(VOCAB, H), wpe=nrm(MAX_POS, H),
                   gpt_layers=gpt_layers, cross_layers=cross_layers,
                   ln_f_g=ones(H), ln_f_b=zeros(H),
                   img_pos_emb=nrm(1, 1, H))  # declared in torch __init__ but unused in forward
    return dict(encoder=encoder, decoder=decoder)


# ----------------------------- main ------------------------------------------
if __name__ == "__main__":
    key = jax.random.PRNGKey(0)
    pkey, ikey, tkey = jax.random.split(key, 3)

    params = init_params(pkey)
    slab, layout = build_slab(params)            # one-time packing, off the hot path
    slab = jax.block_until_ready(slab)

    image = jax.random.normal(ikey, (B, 3, IMG, IMG), jnp.float32)           # NCHW
    target_tokens = jax.random.randint(tkey, (B, TGT_LEN), 1, VOCAB - 1)

    forward = make_forward(layout, slab.shape[0])
    logits = forward(slab, image, target_tokens)
    jax.block_until_ready(logits)

    assert logits.shape == (B, TGT_LEN, VOCAB), logits.shape
    assert logits.dtype == jnp.float32
    assert bool(jnp.all(jnp.isfinite(logits)))
    print("KERNEL_OK")
</pallas_src>

<mosaic_0001>
module attributes {stable_mosaic.version = 11 : i64} {
  func.func @kernel(%arg0: i32, %arg1: memref<10x192xf32, #tpu.memory_space<vmem>>, %arg2: memref<16x64xf32, #tpu.memory_space<vmem>>, %arg3: memref<1592x128xf32, #tpu.memory_space<vmem>>, %arg4: memref<16x128xf32, #tpu.memory_space<vmem>>) attributes {dimension_semantics = [#tpu.dimension_semantics<arbitrary>], iteration_bounds = array<i64: 1>, scalar_prefetch = 0 : i64, scratch_operands = 0 : i64, tpu.core_type = #tpu.core_type<tc>, window_params = [{pipeline_mode = #tpu.pipeline_mode<synchronous>, transform_indices = @transform_0, window_bounds = array<i64: 10, 192>}, {pipeline_mode = #tpu.pipeline_mode<synchronous>, transform_indices = @transform_1, window_bounds = array<i64: 16, 64>}, {pipeline_mode = #tpu.pipeline_mode<synchronous>, transform_indices = @transform_2, window_bounds = array<i64: 1592, 128>}, {pipeline_mode = #tpu.pipeline_mode<synchronous>, transform_indices = @transform_3, window_bounds = array<i64: 16, 128>}]} {
    %c1560 = arith.constant 1560 : index
    %c0 = arith.constant 0 : index
    %0 = vector.load %arg3[%c1560, %c0] : memref<1592x128xf32, #tpu.memory_space<vmem>>, vector<10x10xf32>
    %c1576 = arith.constant 1576 : index
    %c0_0 = arith.constant 0 : index
    %1 = vector.load %arg3[%c1576, %c0_0] : memref<1592x128xf32, #tpu.memory_space<vmem>>, vector<16x16xf32>
    %c0_1 = arith.constant 0 : index
    %c0_2 = arith.constant 0 : index
    %2 = vector.load %arg1[%c0_1, %c0_2] : memref<10x192xf32, #tpu.memory_space<vmem>>, vector<10x192xf32>
    %c0_3 = arith.constant 0 : index
    %c0_4 = arith.constant 0 : index
    %3 = vector.load %arg3[%c0_3, %c0_4] : memref<1592x128xf32, #tpu.memory_space<vmem>>, vector<192x32xf32>
    %cst = arith.constant dense<0.000000e+00> : vector<10x32xf32>
    %4 = tpu.matmul %2, %3, %cst {dimension_numbers = #tpu.dot_dimension_numbers<[1], [0], [0], [1], [0, 0, 1, 1], [], []>} : vector<10x192xf32>, vector<192x32xf32>, vector<10x32xf32> -> vector<10x32xf32>
    %c192 = arith.constant 192 : index
    %c0_5 = arith.constant 0 : index
    %5 = vector.load %arg3[%c192, %c0_5] : memref<1592x128xf32, #tpu.memory_space<vmem>>, vector<5x32xf32>
    %6 = tpu.concatenate %5, %5 in 0 : vector<5x32xf32>, vector<5x32xf32> -> vector<10x32xf32>
    %7 = arith.addf %4, %6 : vector<10x32xf32>
    %c280 = arith.constant 280 : index
    %c0_6 = arith.constant 0 : index
    %8 = vector.load %arg3[%c280, %c0_6] : memref<1592x128xf32, #tpu.memory_space<vmem>>, vector<1x32xf32>
    %c288 = arith.constant 288 : index
    %c0_7 = arith.constant 0 : index
    %9 = vector.load %arg3[%c288, %c0_7] : memref<1592x128xf32, #tpu.memory_space<vmem>>, vector<1x32xf32>
    %cst_8 = arith.constant dense<0.000000e+00> : vector<10xf32>
    %10 = vector.multi_reduction <add>, %7, %cst_8 [1] : vector<10x32xf32> to vector<10xf32>
    %11 = vector.shape_cast %10 : vector<10xf32> to vector<10x1xf32>
    %cst_9 = arith.constant 3.200000e+01 : f32
    %12 = vector.broadcast %cst_9 : f32 to vector<10x1xf32>
    %13 = arith.divf %11, %12 : vector<10x1xf32>
    %14 = vector.broadcast %13 : vector<10x1xf32> to vector<10x32xf32>
    %15 = arith.subf %7, %14 : vector<10x32xf32>
    %16 = arith.mulf %15, %15 : vector<10x32xf32>
    %cst_10 = arith.constant dense<0.000000e+00> : vector<10xf32>
    %17 = vector.multi_reduction <add>, %16, %cst_10 [1] : vector<10x32xf32> to vector<10xf32>
    %18 = vector.shape_cast %17 : vector<10xf32> to vector<10x1xf32>
    %cst_11 = arith.constant 3.200000e+01 : f32
    %19 = vector.broadcast %cst_11 : f32 to vector<10x1xf32>
    %20 = arith.divf %18, %19 : vector<10x1xf32>
    %cst_12 = arith.constant 9.99999996E-13 : f32
    %21 = vector.broadcast %cst_12 : f32 to vector<10x1xf32>
    %22 = arith.addf %20, %21 : vector<10x1xf32>
    %23 = math.rsqrt %22 : vector<10x1xf32>
    %24 = vector.broadcast %23 : vector<10x1xf32> to vector<10x32xf32>
    %25 = arith.mulf %15, %24 : vector<10x32xf32>
    %26 = vector.broadcast %8 : vector<1x32xf32> to vector<10x32xf32>
    %27 = arith.mulf %25, %26 : vector<10x32xf32>
    %28 = vector.broadcast %9 : vector<1x32xf32> to vector<10x32xf32>
    %29 = arith.addf %27, %28 : vector<10x32xf32>
    %c200 = arith.constant 200 : index
    %c0_13 = arith.constant 0 : index
    %30 = vector.load %arg3[%c200, %c0_13] : memref<1592x128xf32, #tpu.memory_space<vmem>>, vector<32x96xf32>
    %c232 = arith.constant 232 : index
    %c0_14 = arith.constant 0 : index
    %31 = vector.load %arg3[%c232, %c0_14] : memref<1592x128xf32, #tpu.memory_space<vmem>>, vector<1x96xf32>
    %c240 = arith.constant 240 : index
    %c0_15 = arith.constant 0 : index
    %32 = vector.load %arg3[%c240, %c0_15] : memref<1592x128xf32, #tpu.memory_space<vmem>>, vector<32x32xf32>
    %c272 = arith.constant 272 : index
    %c0_16 = arith.constant 0 : index
    %33 = vector.load %arg3[%c272, %c0_16] : memref<1592x128xf32, #tpu.memory_space<vmem>>, vector<1x32xf32>
    %cst_17 = arith.constant dense<0.000000e+00> : vector<10x96xf32>
    %34 = tpu.matmul %29, %30, %cst_17 {dimension_numbers = #tpu.dot_dimension_numbers<[1], [0], [0], [1], [0, 0, 1, 1], [], []>} : vector<10x32xf32>, vector<32x96xf32>, vector<10x96xf32> -> vector<10x96xf32>
    %35 = vector.broadcast %31 : vector<1x96xf32> to vector<10x96xf32>
    %36 = arith.addf %34, %35 : vector<10x96xf32>
    %37 = vector.extract_strided_slice %36 {offsets = [0, 0], sizes = [10, 8], strides = [1, 1]} : vector<10x96xf32> to vector<10x8xf32>
    %38 = vector.extract_strided_slice %36 {offsets = [0, 32], sizes = [10, 8], strides = [1, 1]} : vector<10x96xf32> to vector<10x8xf32>
    %39 = vector.extract_strided_slice %36 {offsets = [0, 64], sizes = [10, 8], strides = [1, 1]} : vector<10x96xf32> to vector<10x8xf32>
    %cst_18 = arith.constant dense<0.000000e+00> : vector<10x10xf32>
    %40 = tpu.matmul %37, %38, %cst_18 {dimension_numbers = #tpu.dot_dimension_numbers<[1], [1], [0], [0], [0, 0, 1, 0], [], []>} : vector<10x8xf32>, vector<10x8xf32>, vector<10x10xf32> -> vector<10x10xf32>
    %cst_19 = arith.constant 0.353553385 : f32
    %41 = vector.broadcast %cst_19 : f32 to vector<10x10xf32>
    %42 = arith.mulf %40, %41 : vector<10x10xf32>
    %43 = arith.addf %42, %0 : vector<10x10xf32>
    %cst_20 = arith.constant dense<0xFF800000> : vector<10xf32>
    %44 = vector.multi_reduction <maximumf>, %43, %cst_20 [1] : vector<10x10xf32> to vector<10xf32>
    %45 = vector.shape_cast %44 : vector<10xf32> to vector<10x1xf32>
    %46 = vector.broadcast %45 : vector<10x1xf32> to vector<10x10xf32>
    %47 = arith.subf %43, %46 : vector<10x10xf32>
    %48 = math.exp %47 : vector<10x10xf32>
    %cst_21 = arith.constant dense<0.000000e+00> : vector<10xf32>
    %49 = vector.multi_reduction <add>, %48, %cst_21 [1] : vector<10x10xf32> to vector<10xf32>
    %50 = vector.shape_cast %49 : vector<10xf32> to vector<10x1xf32>
    %51 = vector.broadcast %50 : vector<10x1xf32> to vector<10x10xf32>
    %52 = arith.divf %48, %51 : vector<10x10xf32>
    %cst_22 = arith.constant dense<0.000000e+00> : vector<10x8xf32>
    %53 = tpu.matmul %52, %39, %cst_22 {dimension_numbers = #tpu.dot_dimension_numbers<[1], [0], [0], [1], [0, 0, 1, 1], [], []>} : vector<10x10xf32>, vector<10x8xf32>, vector<10x8xf32> -> vector<10x8xf32>
    %54 = vector.extract_strided_slice %36 {offsets = [0, 8], sizes = [10, 8], strides = [1, 1]} : vector<10x96xf32> to vector<10x8xf32>
    %55 = vector.extract_strided_slice %36 {offsets = [0, 40], sizes = [10, 8], strides = [1, 1]} : vector<10x96xf32> to vector<10x8xf32>
    %56 = vector.extract_strided_slice %36 {offsets = [0, 72], sizes = [10, 8], strides = [1, 1]} : vector<10x96xf32> to vector<10x8xf32>
    %cst_23 = arith.constant dense<0.000000e+00> : vector<10x10xf32>
    %57 = tpu.matmul %54, %55, %cst_23 {dimension_numbers = #tpu.dot_dimension_numbers<[1], [1], [0], [0], [0, 0, 1, 0], [], []>} : vector<10x8xf32>, vector<10x8xf32>, vector<10x10xf32> -> vector<10x10xf32>
    %cst_24 = arith.constant 0.353553385 : f32
    %58 = vector.broadcast %cst_24 : f32 to vector<10x10xf32>
    %59 = arith.mulf %57, %58 : vector<10x10xf32>
    %60 = arith.addf %59, %0 : vector<10x10xf32>
    %cst_25 = arith.constant dense<0xFF800000> : vector<10xf32>
    %61 = vector.multi_reduction <maximumf>, %60, %cst_25 [1] : vector<10x10xf32> to vector<10xf32>
    %62 = vector.shape_cast %61 : vector<10xf32> to vector<10x1xf32>
    %63 = vector.broadcast %62 : vector<10x1xf32> to vector<10x10xf32>
    %64 = arith.subf %60, %63 : vector<10x10xf32>
    %65 = math.exp %64 : vector<10x10xf32>
    %cst_26 = arith.constant dense<0.000000e+00> : vector<10xf32>
    %66 = vector.multi_reduction <add>, %65, %cst_26 [1] : vector<10x10xf32> to vector<10xf32>
    %67 = vector.shape_cast %66 : vector<10xf32> to vector<10x1xf32>
    %68 = vector.broadcast %67 : vector<10x1xf32> to vector<10x10xf32>
    %69 = arith.divf %65, %68 : vector<10x10xf32>
    %cst_27 = arith.constant dense<0.000000e+00> : vector<10x8xf32>
    %70 = tpu.matmul %69, %56, %cst_27 {dimension_numbers = #tpu.dot_dimension_numbers<[1], [0], [0], [1], [0, 0, 1, 1], [], []>} : vector<10x10xf32>, vector<10x8xf32>, vector<10x8xf32> -> vector<10x8xf32>
    %71 = vector.extract_strided_slice %36 {offsets = [0, 16], sizes = [10, 8], strides = [1, 1]} : vector<10x96xf32> to vector<10x8xf32>
    %72 = vector.extract_strided_slice %36 {offsets = [0, 48], sizes = [10, 8], strides = [1, 1]} : vector<10x96xf32> to vector<10x8xf32>
    %73 = vector.extract_strided_slice %36 {offsets = [0, 80], sizes = [10, 8], strides = [1, 1]} : vector<10x96xf32> to vector<10x8xf32>
    %cst_28 = arith.constant dense<0.000000e+00> : vector<10x10xf32>
    %74 = tpu.matmul %71, %72, %cst_28 {dimension_numbers = #tpu.dot_dimension_numbers<[1], [1], [0], [0], [0, 0, 1, 0], [], []>} : vector<10x8xf32>, vector<10x8xf32>, vector<10x10xf32> -> vector<10x10xf32>
    %cst_29 = arith.constant 0.353553385 : f32
    %75 = vector.broadcast %cst_29 : f32 to vector<10x10xf32>
    %76 = arith.mulf %74, %75 : vector<10x10xf32>
    %77 = arith.addf %76, %0 : vector<10x10xf32>
    %cst_30 = arith.constant dense<0xFF800000> : vector<10xf32>
    %78 = vector.multi_reduction <maximumf>, %77, %cst_30 [1] : vector<10x10xf32> to vector<10xf32>
    %79 = vector.shape_cast %78 : vector<10xf32> to vector<10x1xf32>
    %80 = vector.broadcast %79 : vector<10x1xf32> to vector<10x10xf32>
    %81 = arith.subf %77, %80 : vector<10x10xf32>
    %82 = math.exp %81 : vector<10x10xf32>
    %cst_31 = arith.constant dense<0.000000e+00> : vector<10xf32>
    %83 = vector.multi_reduction <add>, %82, %cst_31 [1] : vector<10x10xf32> to vector<10xf32>
    %84 = vector.shape_cast %83 : vector<10xf32> to vector<10x1xf32>
    %85 = vector.broadcast %84 : vector<10x1xf32> to vector<10x10xf32>
    %86 = arith.divf %82, %85 : vector<10x10xf32>
    %cst_32 = arith.constant dense<0.000000e+00> : vector<10x8xf32>
    %87 = tpu.matmul %86, %73, %cst_32 {dimension_numbers = #tpu.dot_dimension_numbers<[1], [0], [0], [1], [0, 0, 1, 1], [], []>} : vector<10x10xf32>, vector<10x8xf32>, vector<10x8xf32> -> vector<10x8xf32>
    %88 = vector.extract_strided_slice %36 {offsets = [0, 24], sizes = [10, 8], strides = [1, 1]} : vector<10x96xf32> to vector<10x8xf32>
    %89 = vector.extract_strided_slice %36 {offsets = [0, 56], sizes = [10, 8], strides = [1, 1]} : vector<10x96xf32> to vector<10x8xf32>
    %90 = vector.extract_strided_slice %36 {offsets = [0, 88], sizes = [10, 8], strides = [1, 1]} : vector<10x96xf32> to vector<10x8xf32>
    %cst_33 = arith.constant dense<0.000000e+00> : vector<10x10xf32>
    %91 = tpu.matmul %88, %89, %cst_33 {dimension_numbers = #tpu.dot_dimension_numbers<[1], [1], [0], [0], [0, 0, 1, 0], [], []>} : vector<10x8xf32>, vector<10x8xf32>, vector<10x10xf32> -> vector<10x10xf32>
    %cst_34 = arith.constant 0.353553385 : f32
    %92 = vector.broadcast %cst_34 : f32 to vector<10x10xf32>
    %93 = arith.mulf %91, %92 : vector<10x10xf32>
    %94 = arith.addf %93, %0 : vector<10x10xf32>
    %cst_35 = arith.constant dense<0xFF800000> : vector<10xf32>
    %95 = vector.multi_reduction <maximumf>, %94, %cst_35 [1] : vector<10x10xf32> to vector<10xf32>
    %96 = vector.shape_cast %95 : vector<10xf32> to vector<10x1xf32>
    %97 = vector.broadcast %96 : vector<10x1xf32> to vector<10x10xf32>
    %98 = arith.subf %94, %97 : vector<10x10xf32>
    %99 = math.exp %98 : vector<10x10xf32>
    %cst_36 = arith.constant dense<0.000000e+00> : vector<10xf32>
    %100 = vector.multi_reduction <add>, %99, %cst_36 [1] : vector<10x10xf32> to vector<10xf32>
    %101 = vector.shape_cast %100 : vector<10xf32> to vector<10x1xf32>
    %102 = vector.broadcast %101 : vector<10x1xf32> to vector<10x10xf32>
    %103 = arith.divf %99, %102 : vector<10x10xf32>
    %cst_37 = arith.constant dense<0.000000e+00> : vector<10x8xf32>
    %104 = tpu.matmul %103, %90, %cst_37 {dimension_numbers = #tpu.dot_dimension_numbers<[1], [0], [0], [1], [0, 0, 1, 1], [], []>} : vector<10x10xf32>, vector<10x8xf32>, vector<10x8xf32> -> vector<10x8xf32>
    %105 = tpu.concatenate %53, %70, %87, %104 in 1 : vector<10x8xf32>, vector<10x8xf32>, vector<10x8xf32>, vector<10x8xf32> -> vector<10x32xf32>
    %cst_38 = arith.constant dense<0.000000e+00> : vector<10x32xf32>
    %106 = tpu.matmul %105, %32, %cst_38 {dimension_numbers = #tpu.dot_dimension_numbers<[1], [0], [0], [1], [0, 0, 1, 1], [], []>} : vector<10x32xf32>, vector<32x32xf32>, vector<10x32xf32> -> vector<10x32xf32>
    %107 = vector.broadcast %33 : vector<1x32xf32> to vector<10x32xf32>
    %108 = arith.addf %106, %107 : vector<10x32xf32>
    %109 = arith.addf %7, %108 : vector<10x32xf32>
    %c296 = arith.constant 296 : index
    %c0_39 = arith.constant 0 : index
    %110 = vector.load %arg3[%c296, %c0_39] : memref<1592x128xf32, #tpu.memory_space<vmem>>, vector<1x32xf32>
    %c304 = arith.constant 304 : index
    %c0_40 = arith.constant 0 : index
    %111 = vector.load %arg3[%c304, %c0_40] : memref<1592x128xf32, #tpu.memory_space<vmem>>, vector<1x32xf32>
    %cst_41 = arith.constant dense<0.000000e+00> : vector<10xf32>
    %112 = vector.multi_reduction <add>, %109, %cst_41 [1] : vector<10x32xf32> to vector<10xf32>
    %113 = vector.shape_cast %112 : vector<10xf32> to vector<10x1xf32>
    %cst_42 = arith.constant 3.200000e+01 : f32
    %114 = vector.broadcast %cst_42 : f32 to vector<10x1xf32>
    %115 = arith.divf %113, %114 : vector<10x1xf32>
    %116 = vector.broadcast %115 : vector<10x1xf32> to vector<10x32xf32>
    %117 = arith.subf %109, %116 : vector<10x32xf32>
    %118 = arith.mulf %117, %117 : vector<10x32xf32>
    %cst_43 = arith.constant dense<0.000000e+00> : vector<10xf32>
    %119 = vector.multi_reduction <add>, %118, %cst_43 [1] : vector<10x32xf32> to vector<10xf32>
    %120 = vector.shape_cast %119 : vector<10xf32> to vector<10x1xf32>
    %cst_44 = arith.constant 3.200000e+01 : f32
    %121 = vector.broadcast %cst_44 : f32 to vector<10x1xf32>
    %122 = arith.divf %120, %121 : vector<10x1xf32>
    %cst_45 = arith.constant 9.99999996E-13 : f32
    %123 = vector.broadcast %cst_45 : f32 to vector<10x1xf32>
    %124 = arith.addf %122, %123 : vector<10x1xf32>
    %125 = math.rsqrt %124 : vector<10x1xf32>
    %126 = vector.broadcast %125 : vector<10x1xf32> to vector<10x32xf32>
    %127 = arith.mulf %117, %126 : vector<10x32xf32>
    %128 = vector.broadcast %110 : vector<1x32xf32> to vector<10x32xf32>
    %129 = arith.mulf %127, %128 : vector<10x32xf32>
    %130 = vector.broadcast %111 : vector<1x32xf32> to vector<10x32xf32>
    %131 = arith.addf %129, %130 : vector<10x32xf32>
    %c312 = arith.constant 312 : index
    %c0_46 = arith.constant 0 : index
    %132 = vector.load %arg3[%c312, %c0_46] : memref<1592x128xf32, #tpu.memory_space<vmem>>, vector<32x64xf32>
    %cst_47 = arith.constant dense<0.000000e+00> : vector<10x64xf32>
    %133 = tpu.matmul %131, %132, %cst_47 {dimension_numbers = #tpu.dot_dimension_numbers<[1], [0], [0], [1], [0, 0, 1, 1], [], []>} : vector<10x32xf32>, vector<32x64xf32>, vector<10x64xf32> -> vector<10x64xf32>
    %c344 = arith.constant 344 : index
    %c0_48 = arith.constant 0 : index
    %134 = vector.load %arg3[%c344, %c0_48] : memref<1592x128xf32, #tpu.memory_space<vmem>>, vector<1x64xf32>
    %135 = vector.broadcast %134 : vector<1x64xf32> to vector<10x64xf32>
    %136 = arith.addf %133, %135 : vector<10x64xf32>
    %cst_49 = arith.constant 5.000000e-01 : f32
    %137 = vector.broadcast %cst_49 : f32 to vector<10x64xf32>
    %138 = arith.mulf %137, %136 : vector<10x64xf32>
    %cst_50 = arith.constant 4.471500e-02 : f32
    %139 = vector.broadcast %cst_50 : f32 to vector<10x64xf32>
    %140 = arith.mulf %139, %136 : vector<10x64xf32>
    %141 = arith.mulf %140, %136 : vector<10x64xf32>
    %142 = arith.mulf %141, %136 : vector<10x64xf32>
    %143 = arith.addf %136, %142 : vector<10x64xf32>
    %cst_51 = arith.constant 0.797884583 : f32
    %144 = vector.broadcast %cst_51 : f32 to vector<10x64xf32>
    %145 = arith.mulf %144, %143 : vector<10x64xf32>
    %146 = math.tanh %145 : vector<10x64xf32>
    %cst_52 = arith.constant 1.000000e+00 : f32
    %147 = vector.broadcast %cst_52 : f32 to vector<10x64xf32>
    %148 = arith.addf %147, %146 : vector<10x64xf32>
    %149 = arith.mulf %138, %148 : vector<10x64xf32>
    %c352 = arith.constant 352 : index
    %c0_53 = arith.constant 0 : index
    %150 = vector.load %arg3[%c352, %c0_53] : memref<1592x128xf32, #tpu.memory_space<vmem>>, vector<64x32xf32>
    %cst_54 = arith.constant dense<0.000000e+00> : vector<10x32xf32>
    %151 = tpu.matmul %149, %150, %cst_54 {dimension_numbers = #tpu.dot_dimension_numbers<[1], [0], [0], [1], [0, 0, 1, 1], [], []>} : vector<10x64xf32>, vector<64x32xf32>, vector<10x32xf32> -> vector<10x32xf32>
    %152 = arith.addf %109, %151 : vector<10x32xf32>
    %c416 = arith.constant 416 : index
    %c0_55 = arith.constant 0 : index
    %153 = vector.load %arg3[%c416, %c0_55] : memref<1592x128xf32, #tpu.memory_space<vmem>>, vector<1x32xf32>
    %154 = vector.broadcast %153 : vector<1x32xf32> to vector<10x32xf32>
    %155 = arith.addf %152, %154 : vector<10x32xf32>
    %c504 = arith.constant 504 : index
    %c0_56 = arith.constant 0 : index
    %156 = vector.load %arg3[%c504, %c0_56] : memref<1592x128xf32, #tpu.memory_space<vmem>>, vector<1x32xf32>
    %c512 = arith.constant 512 : index
    %c0_57 = arith.constant 0 : index
    %157 = vector.load %arg3[%c512, %c0_57] : memref<1592x128xf32, #tpu.memory_space<vmem>>, vector<1x32xf32>
    %cst_58 = arith.constant dense<0.000000e+00> : vector<10xf32>
    %158 = vector.multi_reduction <add>, %155, %cst_58 [1] : vector<10x32xf32> to vector<10xf32>
    %159 = vector.shape_cast %158 : vector<10xf32> to vector<10x1xf32>
    %cst_59 = arith.constant 3.200000e+01 : f32
    %160 = vector.broadcast %cst_59 : f32 to vector<10x1xf32>
    %161 = arith.divf %159, %160 : vector<10x1xf32>
    %162 = vector.broadcast %161 : vector<10x1xf32> to vector<10x32xf32>
    %163 = arith.subf %155, %162 : vector<10x32xf32>
    %164 = arith.mulf %163, %163 : vector<10x32xf32>
    %cst_60 = arith.constant dense<0.000000e+00> : vector<10xf32>
    %165 = vector.multi_reduction <add>, %164, %cst_60 [1] : vector<10x32xf32> to vector<10xf32>
    %166 = vector.shape_cast %165 : vector<10xf32> to vector<10x1xf32>
    %cst_61 = arith.constant 3.200000e+01 : f32
    %167 = vector.broadcast %cst_61 : f32 to vector<10x1xf32>
    %168 = arith.divf %166, %167 : vector<10x1xf32>
    %cst_62 = arith.constant 9.99999996E-13 : f32
    %169 = vector.broadcast %cst_62 : f32 to vector<10x1xf32>
    %170 = arith.addf %168, %169 : vector<10x1xf32>
    %171 = math.rsqrt %170 : vector<10x1xf32>
    %172 = vector.broadcast %171 : vector<10x1xf32> to vector<10x32xf32>
    %173 = arith.mulf %163, %172 : vector<10x32xf32>
    %174 = vector.broadcast %156 : vector<1x32xf32> to vector<10x32xf32>
    %175 = arith.mulf %173, %174 : vector<10x32xf32>
    %176 = vector.broadcast %157 : vector<1x32xf32> to vector<10x32xf32>
    %177 = arith.addf %175, %176 : vector<10x32xf32>
    %c424 = arith.constant 424 : index
    %c0_63 = arith.constant 0 : index
    %178 = vector.load %arg3[%c424, %c0_63] : memref<1592x128xf32, #tpu.memory_space<vmem>>, vector<32x96xf32>
    %c456 = arith.constant 456 : index
    %c0_64 = arith.constant 0 : index
    %179 = vector.load %arg3[%c456, %c0_64] : memref<1592x128xf32, #tpu.memory_space<vmem>>, vector<1x96xf32>
    %c464 = arith.constant 464 : index
    %c0_65 = arith.constant 0 : index
    %180 = vector.load %arg3[%c464, %c0_65] : memref<1592x128xf32, #tpu.memory_space<vmem>>, vector<32x32xf32>
    %c496 = arith.constant 496 : index
    %c0_66 = arith.constant 0 : index
    %181 = vector.load %arg3[%c496, %c0_66] : memref<1592x128xf32, #tpu.memory_space<vmem>>, vector<1x32xf32>
    %cst_67 = arith.constant dense<0.000000e+00> : vector<10x96xf32>
    %182 = tpu.matmul %177, %178, %cst_67 {dimension_numbers = #tpu.dot_dimension_numbers<[1], [0], [0], [1], [0, 0, 1, 1], [], []>} : vector<10x32xf32>, vector<32x96xf32>, vector<10x96xf32> -> vector<10x96xf32>
    %183 = vector.broadcast %179 : vector<1x96xf32> to vector<10x96xf32>
    %184 = arith.addf %182, %183 : vector<10x96xf32>
    %185 = vector.extract_strided_slice %184 {offsets = [0, 0], sizes = [10, 8], strides = [1, 1]} : vector<10x96xf32> to vector<10x8xf32>
    %186 = vector.extract_strided_slice %184 {offsets = [0, 32], sizes = [10, 8], strides = [1, 1]} : vector<10x96xf32> to vector<10x8xf32>
    %187 = vector.extract_strided_slice %184 {offsets = [0, 64], sizes = [10, 8], strides = [1, 1]} : vector<10x96xf32> to vector<10x8xf32>
    %cst_68 = arith.constant dense<0.000000e+00> : vector<10x10xf32>
    %188 = tpu.matmul %185, %186, %cst_68 {dimension_numbers = #tpu.dot_dimension_numbers<[1], [1], [0], [0], [0, 0, 1, 0], [], []>} : vector<10x8xf32>, vector<10x8xf32>, vector<10x10xf32> -> vector<10x10xf32>
    %cst_69 = arith.constant 0.353553385 : f32
    %189 = vector.broadcast %cst_69 : f32 to vector<10x10xf32>
    %190 = arith.mulf %188, %189 : vector<10x10xf32>
    %191 = arith.addf %190, %0 : vector<10x10xf32>
    %cst_70 = arith.constant dense<0xFF800000> : vector<10xf32>
    %192 = vector.multi_reduction <maximumf>, %191, %cst_70 [1] : vector<10x10xf32> to vector<10xf32>
    %193 = vector.shape_cast %192 : vector<10xf32> to vector<10x1xf32>
    %194 = vector.broadcast %193 : vector<10x1xf32> to vector<10x10xf32>
    %195 = arith.subf %191, %194 : vector<10x10xf32>
    %196 = math.exp %195 : vector<10x10xf32>
    %cst_71 = arith.constant dense<0.000000e+00> : vector<10xf32>
    %197 = vector.multi_reduction <add>, %196, %cst_71 [1] : vector<10x10xf32> to vector<10xf32>
    %198 = vector.shape_cast %197 : vector<10xf32> to vector<10x1xf32>
    %199 = vector.broadcast %198 : vector<10x1xf32> to vector<10x10xf32>
    %200 = arith.divf %196, %199 : vector<10x10xf32>
    %cst_72 = arith.constant dense<0.000000e+00> : vector<10x8xf32>
    %201 = tpu.matmul %200, %187, %cst_72 {dimension_numbers = #tpu.dot_dimension_numbers<[1], [0], [0], [1], [0, 0, 1, 1], [], []>} : vector<10x10xf32>, vector<10x8xf32>, vector<10x8xf32> -> vector<10x8xf32>
    %202 = vector.extract_strided_slice %184 {offsets = [0, 8], sizes = [10, 8], strides = [1, 1]} : vector<10x96xf32> to vector<10x8xf32>
    %203 = vector.extract_strided_slice %184 {offsets = [0, 40], sizes = [10, 8], strides = [1, 1]} : vector<10x96xf32> to vector<10x8xf32>
    %204 = vector.extract_strided_slice %184 {offsets = [0, 72], sizes = [10, 8], strides = [1, 1]} : vector<10x96xf32> to vector<10x8xf32>
    %cst_73 = arith.constant dense<0.000000e+00> : vector<10x10xf32>
    %205 = tpu.matmul %202, %203, %cst_73 {dimension_numbers = #tpu.dot_dimension_numbers<[1], [1], [0], [0], [0, 0, 1, 0], [], []>} : vector<10x8xf32>, vector<10x8xf32>, vector<10x10xf32> -> vector<10x10xf32>
    %cst_74 = arith.constant 0.353553385 : f32
    %206 = vector.broadcast %cst_74 : f32 to vector<10x10xf32>
    %207 = arith.mulf %205, %206 : vector<10x10xf32>
    %208 = arith.addf %207, %0 : vector<10x10xf32>
    %cst_75 = arith.constant dense<0xFF800000> : vector<10xf32>
    %209 = vector.multi_reduction <maximumf>, %208, %cst_75 [1] : vector<10x10xf32> to vector<10xf32>
    %210 = vector.shape_cast %209 : vector<10xf32> to vector<10x1xf32>
    %211 = vector.broadcast %210 : vector<10x1xf32> to vector<10x10xf32>
    %212 = arith.subf %208, %211 : vector<10x10xf32>
    %213 = math.exp %212 : vector<10x10xf32>
    %cst_76 = arith.constant dense<0.000000e+00> : vector<10xf32>
    %214 = vector.multi_reduction <add>, %213, %cst_76 [1] : vector<10x10xf32> to vector<10xf32>
    %215 = vector.shape_cast %214 : vector<10xf32> to vector<10x1xf32>
    %216 = vector.broadcast %215 : vector<10x1xf32> to vector<10x10xf32>
    %217 = arith.divf %213, %216 : vector<10x10xf32>
    %cst_77 = arith.constant dense<0.000000e+00> : vector<10x8xf32>
    %218 = tpu.matmul %217, %204, %cst_77 {dimension_numbers = #tpu.dot_dimension_numbers<[1], [0], [0], [1], [0, 0, 1, 1], [], []>} : vector<10x10xf32>, vector<10x8xf32>, vector<10x8xf32> -> vector<10x8xf32>
    %219 = vector.extract_strided_slice %184 {offsets = [0, 16], sizes = [10, 8], strides = [1, 1]} : vector<10x96xf32> to vector<10x8xf32>
    %220 = vector.extract_strided_slice %184 {offsets = [0, 48], sizes = [10, 8], strides = [1, 1]} : vector<10x96xf32> to vector<10x8xf32>
    %221 = vector.extract_strided_slice %184 {offsets = [0, 80], sizes = [10, 8], strides = [1, 1]} : vector<10x96xf32> to vector<10x8xf32>
    %cst_78 = arith.constant dense<0.000000e+00> : vector<10x10xf32>
    %222 = tpu.matmul %219, %220, %cst_78 {dimension_numbers = #tpu.dot_dimension_numbers<[1], [1], [0], [0], [0, 0, 1, 0], [], []>} : vector<10x8xf32>, vector<10x8xf32>, vector<10x10xf32> -> vector<10x10xf32>
    %cst_79 = arith.constant 0.353553385 : f32
    %223 = vector.broadcast %cst_79 : f32 to vector<10x10xf32>
    %224 = arith.mulf %222, %223 : vector<10x10xf32>
    %225 = arith.addf %224, %0 : vector<10x10xf32>
    %cst_80 = arith.constant dense<0xFF800000> : vector<10xf32>
    %226 = vector.multi_reduction <maximumf>, %225, %cst_80 [1] : vector<10x10xf32> to vector<10xf32>
    %227 = vector.shape_cast %226 : vector<10xf32> to vector<10x1xf32>
    %228 = vector.broadcast %227 : vector<10x1xf32> to vector<10x10xf32>
    %229 = arith.subf %225, %228 : vector<10x10xf32>
    %230 = math.exp %229 : vector<10x10xf32>
    %cst_81 = arith.constant dense<0.000000e+00> : vector<10xf32>
    %231 = vector.multi_reduction <add>, %230, %cst_81 [1] : vector<10x10xf32> to vector<10xf32>
    %232 = vector.shape_cast %231 : vector<10xf32> to vector<10x1xf32>
    %233 = vector.broadcast %232 : vector<10x1xf32> to vector<10x10xf32>
    %234 = arith.divf %230, %233 : vector<10x10xf32>
    %cst_82 = arith.constant dense<0.000000e+00> : vector<10x8xf32>
    %235 = tpu.matmul %234, %221, %cst_82 {dimension_numbers = #tpu.dot_dimension_numbers<[1], [0], [0], [1], [0, 0, 1, 1], [], []>} : vector<10x10xf32>, vector<10x8xf32>, vector<10x8xf32> -> vector<10x8xf32>
    %236 = vector.extract_strided_slice %184 {offsets = [0, 24], sizes = [10, 8], strides = [1, 1]} : vector<10x96xf32> to vector<10x8xf32>
    %237 = vector.extract_strided_slice %184 {offsets = [0, 56], sizes = [10, 8], strides = [1, 1]} : vector<10x96xf32> to vector<10x8xf32>
    %238 = vector.extract_strided_slice %184 {offsets = [0, 88], sizes = [10, 8], strides = [1, 1]} : vector<10x96xf32> to vector<10x8xf32>
    %cst_83 = arith.constant dense<0.000000e+00> : vector<10x10xf32>
    %239 = tpu.matmul %236, %237, %cst_83 {dimension_numbers = #tpu.dot_dimension_numbers<[1], [1], [0], [0], [0, 0, 1, 0], [], []>} : vector<10x8xf32>, vector<10x8xf32>, vector<10x10xf32> -> vector<10x10xf32>
    %cst_84 = arith.constant 0.353553385 : f32
    %240 = vector.broadcast %cst_84 : f32 to vector<10x10xf32>
    %241 = arith.mulf %239, %240 : vector<10x10xf32>
    %242 = arith.addf %241, %0 : vector<10x10xf32>
    %cst_85 = arith.constant dense<0xFF800000> : vector<10xf32>
    %243 = vector.multi_reduction <maximumf>, %242, %cst_85 [1] : vector<10x10xf32> to vector<10xf32>
    %244 = vector.shape_cast %243 : vector<10xf32> to vector<10x1xf32>
    %245 = vector.broadcast %244 : vector<10x1xf32> to vector<10x10xf32>
    %246 = arith.subf %242, %245 : vector<10x10xf32>
    %247 = math.exp %246 : vector<10x10xf32>
    %cst_86 = arith.constant dense<0.000000e+00> : vector<10xf32>
    %248 = vector.multi_reduction <add>, %247, %cst_86 [1] : vector<10x10xf32> to vector<10xf32>
    %249 = vector.shape_cast %248 : vector<10xf32> to vector<10x1xf32>
    %250 = vector.broadcast %249 : vector<10x1xf32> to vector<10x10xf32>
    %251 = arith.divf %247, %250 : vector<10x10xf32>
    %cst_87 = arith.constant dense<0.000000e+00> : vector<10x8xf32>
    %252 = tpu.matmul %251, %238, %cst_87 {dimension_numbers = #tpu.dot_dimension_numbers<[1], [0], [0], [1], [0, 0, 1, 1], [], []>} : vector<10x10xf32>, vector<10x8xf32>, vector<10x8xf32> -> vector<10x8xf32>
    %253 = tpu.concatenate %201, %218, %235, %252 in 1 : vector<10x8xf32>, vector<10x8xf32>, vector<10x8xf32>, vector<10x8xf32> -> vector<10x32xf32>
    %cst_88 = arith.constant dense<0.000000e+00> : vector<10x32xf32>
    %254 = tpu.matmul %253, %180, %cst_88 {dimension_numbers = #tpu.dot_dimension_numbers<[1], [0], [0], [1], [0, 0, 1, 1], [], []>} : vector<10x32xf32>, vector<32x32xf32>, vector<10x32xf32> -> vector<10x32xf32>
    %255 = vector.broadcast %181 : vector<1x32xf32> to vector<10x32xf32>
    %256 = arith.addf %254, %255 : vector<10x32xf32>
    %257 = arith.addf %155, %256 : vector<10x32xf32>
    %c520 = arith.constant 520 : index
    %c0_89 = arith.constant 0 : index
    %258 = vector.load %arg3[%c520, %c0_89] : memref<1592x128xf32, #tpu.memory_space<vmem>>, vector<1x32xf32>
    %c528 = arith.constant 528 : index
    %c0_90 = arith.constant 0 : index
    %259 = vector.load %arg3[%c528, %c0_90] : memref<1592x128xf32, #tpu.memory_space<vmem>>, vector<1x32xf32>
    %cst_91 = arith.constant dense<0.000000e+00> : vector<10xf32>
    %260 = vector.multi_reduction <add>, %257, %cst_91 [1] : vector<10x32xf32> to vector<10xf32>
    %261 = vector.shape_cast %260 : vector<10xf32> to vector<10x1xf32>
    %cst_92 = arith.constant 3.200000e+01 : f32
    %262 = vector.broadcast %cst_92 : f32 to vector<10x1xf32>
    %263 = arith.divf %261, %262 : vector<10x1xf32>
    %264 = vector.broadcast %263 : vector<10x1xf32> to vector<10x32xf32>
    %265 = arith.subf %257, %264 : vector<10x32xf32>
    %266 = arith.mulf %265, %265 : vector<10x32xf32>
    %cst_93 = arith.constant dense<0.000000e+00> : vector<10xf32>
    %267 = vector.multi_reduction <add>, %266, %cst_93 [1] : vector<10x32xf32> to vector<10xf32>
    %268 = vector.shape_cast %267 : vector<10xf32> to vector<10x1xf32>
    %cst_94 = arith.constant 3.200000e+01 : f32
    %269 = vector.broadcast %cst_94 : f32 to vector<10x1xf32>
    %270 = arith.divf %268, %269 : vector<10x1xf32>
    %cst_95 = arith.constant 9.99999996E-13 : f32
    %271 = vector.broadcast %cst_95 : f32 to vector<10x1xf32>
    %272 = arith.addf %270, %271 : vector<10x1xf32>
    %273 = math.rsqrt %272 : vector<10x1xf32>
    %274 = vector.broadcast %273 : vector<10x1xf32> to vector<10x32xf32>
    %275 = arith.mulf %265, %274 : vector<10x32xf32>
    %276 = vector.broadcast %258 : vector<1x32xf32> to vector<10x32xf32>
    %277 = arith.mulf %275, %276 : vector<10x32xf32>
    %278 = vector.broadcast %259 : vector<1x32xf32> to vector<10x32xf32>
    %279 = arith.addf %277, %278 : vector<10x32xf32>
    %c536 = arith.constant 536 : index
    %c0_96 = arith.constant 0 : index
    %280 = vector.load %arg3[%c536, %c0_96] : memref<1592x128xf32, #tpu.memory_space<vmem>>, vector<32x64xf32>
    %cst_97 = arith.constant dense<0.000000e+00> : vector<10x64xf32>
    %281 = tpu.matmul %279, %280, %cst_97 {dimension_numbers = #tpu.dot_dimension_numbers<[1], [0], [0], [1], [0, 0, 1, 1], [], []>} : vector<10x32xf32>, vector<32x64xf32>, vector<10x64xf32> -> vector<10x64xf32>
    %c568 = arith.constant 568 : index
    %c0_98 = arith.constant 0 : index
    %282 = vector.load %arg3[%c568, %c0_98] : memref<1592x128xf32, #tpu.memory_space<vmem>>, vector<1x64xf32>
    %283 = vector.broadcast %282 : vector<1x64xf32> to vector<10x64xf32>
    %284 = arith.addf %281, %283 : vector<10x64xf32>
    %cst_99 = arith.constant 5.000000e-01 : f32
    %285 = vector.broadcast %cst_99 : f32 to vector<10x64xf32>
    %286 = arith.mulf %285, %284 : vector<10x64xf32>
    %cst_100 = arith.constant 4.471500e-02 : f32
    %287 = vector.broadcast %cst_100 : f32 to vector<10x64xf32>
    %288 = arith.mulf %287, %284 : vector<10x64xf32>
    %289 = arith.mulf %288, %284 : vector<10x64xf32>
    %290 = arith.mulf %289, %284 : vector<10x64xf32>
    %291 = arith.addf %284, %290 : vector<10x64xf32>
    %cst_101 = arith.constant 0.797884583 : f32
    %292 = vector.broadcast %cst_101 : f32 to vector<10x64xf32>
    %293 = arith.mulf %292, %291 : vector<10x64xf32>
    %294 = math.tanh %293 : vector<10x64xf32>
    %cst_102 = arith.constant 1.000000e+00 : f32
    %295 = vector.broadcast %cst_102 : f32 to vector<10x64xf32>
    %296 = arith.addf %295, %294 : vector<10x64xf32>
    %297 = arith.mulf %286, %296 : vector<10x64xf32>
    %c576 = arith.constant 576 : index
    %c0_103 = arith.constant 0 : index
    %298 = vector.load %arg3[%c576, %c0_103] : memref<1592x128xf32, #tpu.memory_space<vmem>>, vector<64x32xf32>
    %cst_104 = arith.constant dense<0.000000e+00> : vector<10x32xf32>
    %299 = tpu.matmul %297, %298, %cst_104 {dimension_numbers = #tpu.dot_dimension_numbers<[1], [0], [0], [1], [0, 0, 1, 1], [], []>} : vector<10x64xf32>, vector<64x32xf32>, vector<10x32xf32> -> vector<10x32xf32>
    %300 = arith.addf %257, %299 : vector<10x32xf32>
    %c640 = arith.constant 640 : index
    %c0_105 = arith.constant 0 : index
    %301 = vector.load %arg3[%c640, %c0_105] : memref<1592x128xf32, #tpu.memory_space<vmem>>, vector<1x32xf32>
    %302 = vector.broadcast %301 : vector<1x32xf32> to vector<10x32xf32>
    %303 = arith.addf %300, %302 : vector<10x32xf32>
    %c648 = arith.constant 648 : index
    %c0_106 = arith.constant 0 : index
    %304 = vector.load %arg3[%c648, %c0_106] : memref<1592x128xf32, #tpu.memory_space<vmem>>, vector<1x32xf32>
    %c656 = arith.constant 656 : index
    %c0_107 = arith.constant 0 : index
    %305 = vector.load %arg3[%c656, %c0_107] : memref<1592x128xf32, #tpu.memory_space<vmem>>, vector<1x32xf32>
    %cst_108 = arith.constant dense<0.000000e+00> : vector<10xf32>
    %306 = vector.multi_reduction <add>, %303, %cst_108 [1] : vector<10x32xf32> to vector<10xf32>
    %307 = vector.shape_cast %306 : vector<10xf32> to vector<10x1xf32>
    %cst_109 = arith.constant 3.200000e+01 : f32
    %308 = vector.broadcast %cst_109 : f32 to vector<10x1xf32>
    %309 = arith.divf %307, %308 : vector<10x1xf32>
    %310 = vector.broadcast %309 : vector<10x1xf32> to vector<10x32xf32>
    %311 = arith.subf %303, %310 : vector<10x32xf32>
    %312 = arith.mulf %311, %311 : vector<10x32xf32>
    %cst_110 = arith.constant dense<0.000000e+00> : vector<10xf32>
    %313 = vector.multi_reduction <add>, %312, %cst_110 [1] : vector<10x32xf32> to vector<10xf32>
    %314 = vector.shape_cast %313 : vector<10xf32> to vector<10x1xf32>
    %cst_111 = arith.constant 3.200000e+01 : f32
    %315 = vector.broadcast %cst_111 : f32 to vector<10x1xf32>
    %316 = arith.divf %314, %315 : vector<10x1xf32>
    %cst_112 = arith.constant 9.99999996E-13 : f32
    %317 = vector.broadcast %cst_112 : f32 to vector<10x1xf32>
    %318 = arith.addf %316, %317 : vector<10x1xf32>
    %319 = math.rsqrt %318 : vector<10x1xf32>
    %320 = vector.broadcast %319 : vector<10x1xf32> to vector<10x32xf32>
    %321 = arith.mulf %311, %320 : vector<10x32xf32>
    %322 = vector.broadcast %304 : vector<1x32xf32> to vector<10x32xf32>
    %323 = arith.mulf %321, %322 : vector<10x32xf32>
    %324 = vector.broadcast %305 : vector<1x32xf32> to vector<10x32xf32>
    %325 = arith.addf %323, %324 : vector<10x32xf32>
    %326 = vector.extract_strided_slice %325 {offsets = [0, 0], sizes = [5, 32], strides = [1, 1]} : vector<10x32xf32> to vector<5x32xf32>
    %cst_113 = arith.constant dense<0.000000e+00> : vector<32xf32>
    %327 = vector.multi_reduction <add>, %326, %cst_113 [0] : vector<5x32xf32> to vector<32xf32>
    %328 = vector.shape_cast %327 : vector<32xf32> to vector<1x32xf32>
    %cst_114 = arith.constant 5.000000e+00 : f32
    %329 = vector.broadcast %cst_114 : f32 to vector<1x32xf32>
    %330 = arith.divf %328, %329 : vector<1x32xf32>
    %331 = vector.extract_strided_slice %325 {offsets = [5, 0], sizes = [5, 32], strides = [1, 1]} : vector<10x32xf32> to vector<5x32xf32>
    %cst_115 = arith.constant dense<0.000000e+00> : vector<32xf32>
    %332 = vector.multi_reduction <add>, %331, %cst_115 [0] : vector<5x32xf32> to vector<32xf32>
    %333 = vector.shape_cast %332 : vector<32xf32> to vector<1x32xf32>
    %cst_116 = arith.constant 5.000000e+00 : f32
    %334 = vector.broadcast %cst_116 : f32 to vector<1x32xf32>
    %335 = arith.divf %333, %334 : vector<1x32xf32>
    %336 = tpu.concatenate %330, %335 in 0 : vector<1x32xf32>, vector<1x32xf32> -> vector<2x32xf32>
    %c664 = arith.constant 664 : index
    %c0_117 = arith.constant 0 : index
    %337 = vector.load %arg3[%c664, %c0_117] : memref<1592x128xf32, #tpu.memory_space<vmem>>, vector<32x32xf32>
    %cst_118 = arith.constant dense<0.000000e+00> : vector<2x32xf32>
    %338 = tpu.matmul %336, %337, %cst_118 {dimension_numbers = #tpu.dot_dimension_numbers<[1], [0], [0], [1], [0, 0, 1, 1], [], []>} : vector<2x32xf32>, vector<32x32xf32>, vector<2x32xf32> -> vector<2x32xf32>
    %c696 = arith.constant 696 : index
    %c0_119 = arith.constant 0 : index
    %339 = vector.load %arg3[%c696, %c0_119] : memref<1592x128xf32, #tpu.memory_space<vmem>>, vector<1x32xf32>
    %340 = vector.broadcast %339 : vector<1x32xf32> to vector<2x32xf32>
    %341 = arith.addf %338, %340 : vector<2x32xf32>
    %cst_120 = arith.constant 0.000000e+00 : f32
    %342 = vector.broadcast %cst_120 : f32 to vector<2x32xf32>
    %c1384 = arith.constant 1384 : index
    %c0_121 = arith.constant 0 : index
    %343 = vector.load %arg3[%c1384, %c0_121] : memref<1592x128xf32, #tpu.memory_space<vmem>>, vector<32x32xf32>
    %cst_122 = arith.constant dense<0.000000e+00> : vector<2x32xf32>
    %344 = tpu.matmul %341, %343, %cst_122 {dimension_numbers = #tpu.dot_dimension_numbers<[1], [0], [0], [1], [0, 0, 1, 1], [], []>} : vector<2x32xf32>, vector<32x32xf32>, vector<2x32xf32> -> vector<2x32xf32>
    %c1416 = arith.constant 1416 : index
    %c0_123 = arith.constant 0 : index
    %345 = vector.load %arg3[%c1416, %c0_123] : memref<1592x128xf32, #tpu.memory_space<vmem>>, vector<1x32xf32>
    %346 = vector.broadcast %345 : vector<1x32xf32> to vector<2x32xf32>
    %347 = arith.addf %344, %346 : vector<2x32xf32>
    %c1424 = arith.constant 1424 : index
    %c0_124 = arith.constant 0 : index
    %348 = vector.load %arg3[%c1424, %c0_124] : memref<1592x128xf32, #tpu.memory_space<vmem>>, vector<32x32xf32>
    %cst_125 = arith.constant dense<0.000000e+00> : vector<2x32xf32>
    %349 = tpu.matmul %347, %348, %cst_125 {dimension_numbers = #tpu.dot_dimension_numbers<[1], [0], [0], [1], [0, 0, 1, 1], [], []>} : vector<2x32xf32>, vector<32x32xf32>, vector<2x32xf32> -> vector<2x32xf32>
    %350 = arith.addf %342, %349 : vector<2x32xf32>
    %c1456 = arith.constant 1456 : index
    %c0_126 = arith.constant 0 : index
    %351 = vector.load %arg3[%c1456, %c0_126] : memref<1592x128xf32, #tpu.memory_space<vmem>>, vector<1x32xf32>
    %352 = vector.broadcast %351 : vector<1x32xf32> to vector<2x32xf32>
    %353 = arith.addf %350, %352 : vector<2x32xf32>
    %c1464 = arith.constant 1464 : index
    %c0_127 = arith.constant 0 : index
    %354 = vector.load %arg3[%c1464, %c0_127] : memref<1592x128xf32, #tpu.memory_space<vmem>>, vector<32x32xf32>
    %cst_128 = arith.constant dense<0.000000e+00> : vector<2x32xf32>
    %355 = tpu.matmul %341, %354, %cst_128 {dimension_numbers = #tpu.dot_dimension_numbers<[1], [0], [0], [1], [0, 0, 1, 1], [], []>} : vector<2x32xf32>, vector<32x32xf32>, vector<2x32xf32> -> vector<2x32xf32>
    %c1496 = arith.constant 1496 : index
    %c0_129 = arith.constant 0 : index
    %356 = vector.load %arg3[%c1496, %c0_129] : memref<1592x128xf32, #tpu.memory_space<vmem>>, vector<1x32xf32>
    %357 = vector.broadcast %356 : vector<1x32xf32> to vector<2x32xf32>
    %358 = arith.addf %355, %357 : vector<2x32xf32>
    %c1504 = arith.constant 1504 : index
    %c0_130 = arith.constant 0 : index
    %359 = vector.load %arg3[%c1504, %c0_130] : memref<1592x128xf32, #tpu.memory_space<vmem>>, vector<32x32xf32>
    %cst_131 = arith.constant dense<0.000000e+00> : vector<2x32xf32>
    %360 = tpu.matmul %358, %359, %cst_131 {dimension_numbers = #tpu.dot_dimension_numbers<[1], [0], [0], [1], [0, 0, 1, 1], [], []>} : vector<2x32xf32>, vector<32x32xf32>, vector<2x32xf32> -> vector<2x32xf32>
    %361 = arith.addf %353, %360 : vector<2x32xf32>
    %c1536 = arith.constant 1536 : index
    %c0_132 = arith.constant 0 : index
    %362 = vector.load %arg3[%c1536, %c0_132] : memref<1592x128xf32, #tpu.memory_space<vmem>>, vector<1x32xf32>
    %363 = vector.broadcast %362 : vector<1x32xf32> to vector<2x32xf32>
    %364 = arith.addf %361, %363 : vector<2x32xf32>
    %c0_133 = arith.constant 0 : index
    %c0_134 = arith.constant 0 : index
    %365 = vector.load %arg2[%c0_133, %c0_134] : memref<16x64xf32, #tpu.memory_space<vmem>>, vector<16x64xf32>
    %c704 = arith.constant 704 : index
    %c0_135 = arith.constant 0 : index
    %366 = vector.load %arg3[%c704, %c0_135] : memref<1592x128xf32, #tpu.memory_space<vmem>>, vector<64x32xf32>
    %cst_136 = arith.constant dense<0.000000e+00> : vector<16x32xf32>
    %367 = tpu.matmul %365, %366, %cst_136 {dimension_numbers = #tpu.dot_dimension_numbers<[1], [0], [0], [1], [0, 0, 1, 1], [], []>} : vector<16x64xf32>, vector<64x32xf32>, vector<16x32xf32> -> vector<16x32xf32>
    %368 = vector.extract_strided_slice %364 {offsets = [0, 0], sizes = [1, 32], strides = [1, 1]} : vector<2x32xf32> to vector<1x32xf32>
    %369 = vector.shape_cast %368 : vector<1x32xf32> to vector<1x32xf32>
    %370 = vector.broadcast %369 : vector<1x32xf32> to vector<8x32xf32>
    %371 = vector.extract_strided_slice %364 {offsets = [1, 0], sizes = [1, 32], strides = [1, 1]} : vector<2x32xf32> to vector<1x32xf32>
    %372 = vector.shape_cast %371 : vector<1x32xf32> to vector<1x32xf32>
    %373 = vector.broadcast %372 : vector<1x32xf32> to vector<8x32xf32>
    %374 = tpu.concatenate %370, %373 in 0 : vector<8x32xf32>, vector<8x32xf32> -> vector<16x32xf32>
    %375 = arith.addf %367, %374 : vector<16x32xf32>
    %c800 = arith.constant 800 : index
    %c0_137 = arith.constant 0 : index
    %376 = vector.load %arg3[%c800, %c0_137] : memref<1592x128xf32, #tpu.memory_space<vmem>>, vector<8x32xf32>
    %377 = tpu.concatenate %376, %376 in 0 : vector<8x32xf32>, vector<8x32xf32> -> vector<16x32xf32>
    %378 = arith.addf %375, %377 : vector<16x32xf32>
    %c888 = arith.constant 888 : index
    %c0_138 = arith.constant 0 : index
    %379 = vector.load %arg3[%c888, %c0_138] : memref<1592x128xf32, #tpu.memory_space<vmem>>, vector<1x32xf32>
    %c896 = arith.constant 896 : index
    %c0_139 = arith.constant 0 : index
    %380 = vector.load %arg3[%c896, %c0_139] : memref<1592x128xf32, #tpu.memory_space<vmem>>, vector<1x32xf32>
    %cst_140 = arith.constant dense<0.000000e+00> : vector<16xf32>
    %381 = vector.multi_reduction <add>, %378, %cst_140 [1] : vector<16x32xf32> to vector<16xf32>
    %382 = vector.shape_cast %381 : vector<16xf32> to vector<16x1xf32>
    %cst_141 = arith.constant 3.200000e+01 : f32
    %383 = vector.broadcast %cst_141 : f32 to vector<16x1xf32>
    %384 = arith.divf %382, %383 : vector<16x1xf32>
    %385 = vector.broadcast %384 : vector<16x1xf32> to vector<16x32xf32>
    %386 = arith.subf %378, %385 : vector<16x32xf32>
    %387 = arith.mulf %386, %386 : vector<16x32xf32>
    %cst_142 = arith.constant dense<0.000000e+00> : vector<16xf32>
    %388 = vector.multi_reduction <add>, %387, %cst_142 [1] : vector<16x32xf32> to vector<16xf32>
    %389 = vector.shape_cast %388 : vector<16xf32> to vector<16x1xf32>
    %cst_143 = arith.constant 3.200000e+01 : f32
    %390 = vector.broadcast %cst_143 : f32 to vector<16x1xf32>
    %391 = arith.divf %389, %390 : vector<16x1xf32>
    %cst_144 = arith.constant 9.99999974E-6 : f32
    %392 = vector.broadcast %cst_144 : f32 to vector<16x1xf32>
    %393 = arith.addf %391, %392 : vector<16x1xf32>
    %394 = math.rsqrt %393 : vector<16x1xf32>
    %395 = vector.broadcast %394 : vector<16x1xf32> to vector<16x32xf32>
    %396 = arith.mulf %386, %395 : vector<16x32xf32>
    %397 = vector.broadcast %379 : vector<1x32xf32> to vector<16x32xf32>
    %398 = arith.mulf %396, %397 : vector<16x32xf32>
    %399 = vector.broadcast %380 : vector<1x32xf32> to vector<16x32xf32>
    %400 = arith.addf %398, %399 : vector<16x32xf32>
    %c808 = arith.constant 808 : index
    %c0_145 = arith.constant 0 : index
    %401 = vector.load %arg3[%c808, %c0_145] : memref<1592x128xf32, #tpu.memory_space<vmem>>, vector<32x96xf32>
    %c840 = arith.constant 840 : index
    %c0_146 = arith.constant 0 : index
    %402 = vector.load %arg3[%c840, %c0_146] : memref<1592x128xf32, #tpu.memory_space<vmem>>, vector<1x96xf32>
    %c848 = arith.constant 848 : index
    %c0_147 = arith.constant 0 : index
    %403 = vector.load %arg3[%c848, %c0_147] : memref<1592x128xf32, #tpu.memory_space<vmem>>, vector<32x32xf32>
    %c880 = arith.constant 880 : index
    %c0_148 = arith.constant 0 : index
    %404 = vector.load %arg3[%c880, %c0_148] : memref<1592x128xf32, #tpu.memory_space<vmem>>, vector<1x32xf32>
    %cst_149 = arith.constant dense<0.000000e+00> : vector<16x96xf32>
    %405 = tpu.matmul %400, %401, %cst_149 {dimension_numbers = #tpu.dot_dimension_numbers<[1], [0], [0], [1], [0, 0, 1, 1], [], []>} : vector<16x32xf32>, vector<32x96xf32>, vector<16x96xf32> -> vector<16x96xf32>
    %406 = vector.broadcast %402 : vector<1x96xf32> to vector<16x96xf32>
    %407 = arith.addf %405, %406 : vector<16x96xf32>
    %408 = vector.extract_strided_slice %407 {offsets = [0, 0], sizes = [16, 8], strides = [1, 1]} : vector<16x96xf32> to vector<16x8xf32>
    %409 = vector.extract_strided_slice %407 {offsets = [0, 32], sizes = [16, 8], strides = [1, 1]} : vector<16x96xf32> to vector<16x8xf32>
    %410 = vector.extract_strided_slice %407 {offsets = [0, 64], sizes = [16, 8], strides = [1, 1]} : vector<16x96xf32> to vector<16x8xf32>
    %cst_150 = arith.constant dense<0.000000e+00> : vector<16x16xf32>
    %411 = tpu.matmul %408, %409, %cst_150 {dimension_numbers = #tpu.dot_dimension_numbers<[1], [1], [0], [0], [0, 0, 1, 0], [], []>} : vector<16x8xf32>, vector<16x8xf32>, vector<16x16xf32> -> vector<16x16xf32>
    %cst_151 = arith.constant 0.353553385 : f32
    %412 = vector.broadcast %cst_151 : f32 to vector<16x16xf32>
    %413 = arith.mulf %411, %412 : vector<16x16xf32>
    %414 = arith.addf %413, %1 : vector<16x16xf32>
    %cst_152 = arith.constant dense<0xFF800000> : vector<16xf32>
    %415 = vector.multi_reduction <maximumf>, %414, %cst_152 [1] : vector<16x16xf32> to vector<16xf32>
    %416 = vector.shape_cast %415 : vector<16xf32> to vector<16x1xf32>
    %417 = vector.broadcast %416 : vector<16x1xf32> to vector<16x16xf32>
    %418 = arith.subf %414, %417 : vector<16x16xf32>
    %419 = math.exp %418 : vector<16x16xf32>
    %cst_153 = arith.constant dense<0.000000e+00> : vector<16xf32>
    %420 = vector.multi_reduction <add>, %419, %cst_153 [1] : vector<16x16xf32> to vector<16xf32>
    %421 = vector.shape_cast %420 : vector<16xf32> to vector<16x1xf32>
    %422 = vector.broadcast %421 : vector<16x1xf32> to vector<16x16xf32>
    %423 = arith.divf %419, %422 : vector<16x16xf32>
    %cst_154 = arith.constant dense<0.000000e+00> : vector<16x8xf32>
    %424 = tpu.matmul %423, %410, %cst_154 {dimension_numbers = #tpu.dot_dimension_numbers<[1], [0], [0], [1], [0, 0, 1, 1], [], []>} : vector<16x16xf32>, vector<16x8xf32>, vector<16x8xf32> -> vector<16x8xf32>
    %425 = vector.extract_strided_slice %407 {offsets = [0, 8], sizes = [16, 8], strides = [1, 1]} : vector<16x96xf32> to vector<16x8xf32>
    %426 = vector.extract_strided_slice %407 {offsets = [0, 40], sizes = [16, 8], strides = [1, 1]} : vector<16x96xf32> to vector<16x8xf32>
    %427 = vector.extract_strided_slice %407 {offsets = [0, 72], sizes = [16, 8], strides = [1, 1]} : vector<16x96xf32> to vector<16x8xf32>
    %cst_155 = arith.constant dense<0.000000e+00> : vector<16x16xf32>
    %428 = tpu.matmul %425, %426, %cst_155 {dimension_numbers = #tpu.dot_dimension_numbers<[1], [1], [0], [0], [0, 0, 1, 0], [], []>} : vector<16x8xf32>, vector<16x8xf32>, vector<16x16xf32> -> vector<16x16xf32>
    %cst_156 = arith.constant 0.353553385 : f32
    %429 = vector.broadcast %cst_156 : f32 to vector<16x16xf32>
    %430 = arith.mulf %428, %429 : vector<16x16xf32>
    %431 = arith.addf %430, %1 : vector<16x16xf32>
    %cst_157 = arith.constant dense<0xFF800000> : vector<16xf32>
    %432 = vector.multi_reduction <maximumf>, %431, %cst_157 [1] : vector<16x16xf32> to vector<16xf32>
    %433 = vector.shape_cast %432 : vector<16xf32> to vector<16x1xf32>
    %434 = vector.broadcast %433 : vector<16x1xf32> to vector<16x16xf32>
    %435 = arith.subf %431, %434 : vector<16x16xf32>
    %436 = math.exp %435 : vector<16x16xf32>
    %cst_158 = arith.constant dense<0.000000e+00> : vector<16xf32>
    %437 = vector.multi_reduction <add>, %436, %cst_158 [1] : vector<16x16xf32> to vector<16xf32>
    %438 = vector.shape_cast %437 : vector<16xf32> to vector<16x1xf32>
    %439 = vector.broadcast %438 : vector<16x1xf32> to vector<16x16xf32>
    %440 = arith.divf %436, %439 : vector<16x16xf32>
    %cst_159 = arith.constant dense<0.000000e+00> : vector<16x8xf32>
    %441 = tpu.matmul %440, %427, %cst_159 {dimension_numbers = #tpu.dot_dimension_numbers<[1], [0], [0], [1], [0, 0, 1, 1], [], []>} : vector<16x16xf32>, vector<16x8xf32>, vector<16x8xf32> -> vector<16x8xf32>
    %442 = vector.extract_strided_slice %407 {offsets = [0, 16], sizes = [16, 8], strides = [1, 1]} : vector<16x96xf32> to vector<16x8xf32>
    %443 = vector.extract_strided_slice %407 {offsets = [0, 48], sizes = [16, 8], strides = [1, 1]} : vector<16x96xf32> to vector<16x8xf32>
    %444 = vector.extract_strided_slice %407 {offsets = [0, 80], sizes = [16, 8], strides = [1, 1]} : vector<16x96xf32> to vector<16x8xf32>
    %cst_160 = arith.constant dense<0.000000e+00> : vector<16x16xf32>
    %445 = tpu.matmul %442, %443, %cst_160 {dimension_numbers = #tpu.dot_dimension_numbers<[1], [1], [0], [0], [0, 0, 1, 0], [], []>} : vector<16x8xf32>, vector<16x8xf32>, vector<16x16xf32> -> vector<16x16xf32>
    %cst_161 = arith.constant 0.353553385 : f32
    %446 = vector.broadcast %cst_161 : f32 to vector<16x16xf32>
    %447 = arith.mulf %445, %446 : vector<16x16xf32>
    %448 = arith.addf %447, %1 : vector<16x16xf32>
    %cst_162 = arith.constant dense<0xFF800000> : vector<16xf32>
    %449 = vector.multi_reduction <maximumf>, %448, %cst_162 [1] : vector<16x16xf32> to vector<16xf32>
    %450 = vector.shape_cast %449 : vector<16xf32> to vector<16x1xf32>
    %451 = vector.broadcast %450 : vector<16x1xf32> to vector<16x16xf32>
    %452 = arith.subf %448, %451 : vector<16x16xf32>
    %453 = math.exp %452 : vector<16x16xf32>
    %cst_163 = arith.constant dense<0.000000e+00> : vector<16xf32>
    %454 = vector.multi_reduction <add>, %453, %cst_163 [1] : vector<16x16xf32> to vector<16xf32>
    %455 = vector.shape_cast %454 : vector<16xf32> to vector<16x1xf32>
    %456 = vector.broadcast %455 : vector<16x1xf32> to vector<16x16xf32>
    %457 = arith.divf %453, %456 : vector<16x16xf32>
    %cst_164 = arith.constant dense<0.000000e+00> : vector<16x8xf32>
    %458 = tpu.matmul %457, %444, %cst_164 {dimension_numbers = #tpu.dot_dimension_numbers<[1], [0], [0], [1], [0, 0, 1, 1], [], []>} : vector<16x16xf32>, vector<16x8xf32>, vector<16x8xf32> -> vector<16x8xf32>
    %459 = vector.extract_strided_slice %407 {offsets = [0, 24], sizes = [16, 8], strides = [1, 1]} : vector<16x96xf32> to vector<16x8xf32>
    %460 = vector.extract_strided_slice %407 {offsets = [0, 56], sizes = [16, 8], strides = [1, 1]} : vector<16x96xf32> to vector<16x8xf32>
    %461 = vector.extract_strided_slice %407 {offsets = [0, 88], sizes = [16, 8], strides = [1, 1]} : vector<16x96xf32> to vector<16x8xf32>
    %cst_165 = arith.constant dense<0.000000e+00> : vector<16x16xf32>
    %462 = tpu.matmul %459, %460, %cst_165 {dimension_numbers = #tpu.dot_dimension_numbers<[1], [1], [0], [0], [0, 0, 1, 0], [], []>} : vector<16x8xf32>, vector<16x8xf32>, vector<16x16xf32> -> vector<16x16xf32>
    %cst_166 = arith.constant 0.353553385 : f32
    %463 = vector.broadcast %cst_166 : f32 to vector<16x16xf32>
    %464 = arith.mulf %462, %463 : vector<16x16xf32>
    %465 = arith.addf %464, %1 : vector<16x16xf32>
    %cst_167 = arith.constant dense<0xFF800000> : vector<16xf32>
    %466 = vector.multi_reduction <maximumf>, %465, %cst_167 [1] : vector<16x16xf32> to vector<16xf32>
    %467 = vector.shape_cast %466 : vector<16xf32> to vector<16x1xf32>
    %468 = vector.broadcast %467 : vector<16x1xf32> to vector<16x16xf32>
    %469 = arith.subf %465, %468 : vector<16x16xf32>
    %470 = math.exp %469 : vector<16x16xf32>
    %cst_168 = arith.constant dense<0.000000e+00> : vector<16xf32>
    %471 = vector.multi_reduction <add>, %470, %cst_168 [1] : vector<16x16xf32> to vector<16xf32>
    %472 = vector.shape_cast %471 : vector<16xf32> to vector<16x1xf32>
    %473 = vector.broadcast %472 : vector<16x1xf32> to vector<16x16xf32>
    %474 = arith.divf %470, %473 : vector<16x16xf32>
    %cst_169 = arith.constant dense<0.000000e+00> : vector<16x8xf32>
    %475 = tpu.matmul %474, %461, %cst_169 {dimension_numbers = #tpu.dot_dimension_numbers<[1], [0], [0], [1], [0, 0, 1, 1], [], []>} : vector<16x16xf32>, vector<16x8xf32>, vector<16x8xf32> -> vector<16x8xf32>
    %476 = tpu.concatenate %424, %441, %458, %475 in 1 : vector<16x8xf32>, vector<16x8xf32>, vector<16x8xf32>, vector<16x8xf32> -> vector<16x32xf32>
    %cst_170 = arith.constant dense<0.000000e+00> : vector<16x32xf32>
    %477 = tpu.matmul %476, %403, %cst_170 {dimension_numbers = #tpu.dot_dimension_numbers<[1], [0], [0], [1], [0, 0, 1, 1], [], []>} : vector<16x32xf32>, vector<32x32xf32>, vector<16x32xf32> -> vector<16x32xf32>
    %478 = vector.broadcast %404 : vector<1x32xf32> to vector<16x32xf32>
    %479 = arith.addf %477, %478 : vector<16x32xf32>
    %480 = arith.addf %378, %479 : vector<16x32xf32>
    %c904 = arith.constant 904 : index
    %c0_171 = arith.constant 0 : index
    %481 = vector.load %arg3[%c904, %c0_171] : memref<1592x128xf32, #tpu.memory_space<vmem>>, vector<1x32xf32>
    %c912 = arith.constant 912 : index
    %c0_172 = arith.constant 0 : index
    %482 = vector.load %arg3[%c912, %c0_172] : memref<1592x128xf32, #tpu.memory_space<vmem>>, vector<1x32xf32>
    %cst_173 = arith.constant dense<0.000000e+00> : vector<16xf32>
    %483 = vector.multi_reduction <add>, %480, %cst_173 [1] : vector<16x32xf32> to vector<16xf32>
    %484 = vector.shape_cast %483 : vector<16xf32> to vector<16x1xf32>
    %cst_174 = arith.constant 3.200000e+01 : f32
    %485 = vector.broadcast %cst_174 : f32 to vector<16x1xf32>
    %486 = arith.divf %484, %485 : vector<16x1xf32>
    %487 = vector.broadcast %486 : vector<16x1xf32> to vector<16x32xf32>
    %488 = arith.subf %480, %487 : vector<16x32xf32>
    %489 = arith.mulf %488, %488 : vector<16x32xf32>
    %cst_175 = arith.constant dense<0.000000e+00> : vector<16xf32>
    %490 = vector.multi_reduction <add>, %489, %cst_175 [1] : vector<16x32xf32> to vector<16xf32>
    %491 = vector.shape_cast %490 : vector<16xf32> to vector<16x1xf32>
    %cst_176 = arith.constant 3.200000e+01 : f32
    %492 = vector.broadcast %cst_176 : f32 to vector<16x1xf32>
    %493 = arith.divf %491, %492 : vector<16x1xf32>
    %cst_177 = arith.constant 9.99999974E-6 : f32
    %494 = vector.broadcast %cst_177 : f32 to vector<16x1xf32>
    %495 = arith.addf %493, %494 : vector<16x1xf32>
    %496 = math.rsqrt %495 : vector<16x1xf32>
    %497 = vector.broadcast %496 : vector<16x1xf32> to vector<16x32xf32>
    %498 = arith.mulf %488, %497 : vector<16x32xf32>
    %499 = vector.broadcast %481 : vector<1x32xf32> to vector<16x32xf32>
    %500 = arith.mulf %498, %499 : vector<16x32xf32>
    %501 = vector.broadcast %482 : vector<1x32xf32> to vector<16x32xf32>
    %502 = arith.addf %500, %501 : vector<16x32xf32>
    %c920 = arith.constant 920 : index
    %c0_178 = arith.constant 0 : index
    %503 = vector.load %arg3[%c920, %c0_178] : memref<1592x128xf32, #tpu.memory_space<vmem>>, vector<32x128xf32>
    %cst_179 = arith.constant dense<0.000000e+00> : vector<16x128xf32>
    %504 = tpu.matmul %502, %503, %cst_179 {dimension_numbers = #tpu.dot_dimension_numbers<[1], [0], [0], [1], [0, 0, 1, 1], [], []>} : vector<16x32xf32>, vector<32x128xf32>, vector<16x128xf32> -> vector<16x128xf32>
    %c952 = arith.constant 952 : index
    %c0_180 = arith.constant 0 : index
    %505 = vector.load %arg3[%c952, %c0_180] : memref<1592x128xf32, #tpu.memory_space<vmem>>, vector<1x128xf32>
    %506 = vector.broadcast %505 : vector<1x128xf32> to vector<16x128xf32>
    %507 = arith.addf %504, %506 : vector<16x128xf32>
    %cst_181 = arith.constant 5.000000e-01 : f32
    %508 = vector.broadcast %cst_181 : f32 to vector<16x128xf32>
    %509 = arith.mulf %508, %507 : vector<16x128xf32>
    %cst_182 = arith.constant 4.471500e-02 : f32
    %510 = vector.broadcast %cst_182 : f32 to vector<16x128xf32>
    %511 = arith.mulf %510, %507 : vector<16x128xf32>
    %512 = arith.mulf %511, %507 : vector<16x128xf32>
    %513 = arith.mulf %512, %507 : vector<16x128xf32>
    %514 = arith.addf %507, %513 : vector<16x128xf32>
    %cst_183 = arith.constant 0.797884583 : f32
    %515 = vector.broadcast %cst_183 : f32 to vector<16x128xf32>
    %516 = arith.mulf %515, %514 : vector<16x128xf32>
    %517 = math.tanh %516 : vector<16x128xf32>
    %cst_184 = arith.constant 1.000000e+00 : f32
    %518 = vector.broadcast %cst_184 : f32 to vector<16x128xf32>
    %519 = arith.addf %518, %517 : vector<16x128xf32>
    %520 = arith.mulf %509, %519 : vector<16x128xf32>
    %c960 = arith.constant 960 : index
    %c0_185 = arith.constant 0 : index
    %521 = vector.load %arg3[%c960, %c0_185] : memref<1592x128xf32, #tpu.memory_space<vmem>>, vector<128x32xf32>
    %cst_186 = arith.constant dense<0.000000e+00> : vector<16x32xf32>
    %522 = tpu.matmul %520, %521, %cst_186 {dimension_numbers = #tpu.dot_dimension_numbers<[1], [0], [0], [1], [0, 0, 1, 1], [], []>} : vector<16x128xf32>, vector<128x32xf32>, vector<16x32xf32> -> vector<16x32xf32>
    %523 = arith.addf %480, %522 : vector<16x32xf32>
    %c1088 = arith.constant 1088 : index
    %c0_187 = arith.constant 0 : index
    %524 = vector.load %arg3[%c1088, %c0_187] : memref<1592x128xf32, #tpu.memory_space<vmem>>, vector<1x32xf32>
    %525 = vector.broadcast %524 : vector<1x32xf32> to vector<16x32xf32>
    %526 = arith.addf %523, %525 : vector<16x32xf32>
    %c1176 = arith.constant 1176 : index
    %c0_188 = arith.constant 0 : index
    %527 = vector.load %arg3[%c1176, %c0_188] : memref<1592x128xf32, #tpu.memory_space<vmem>>, vector<1x32xf32>
    %c1184 = arith.constant 1184 : index
    %c0_189 = arith.constant 0 : index
    %528 = vector.load %arg3[%c1184, %c0_189] : memref<1592x128xf32, #tpu.memory_space<vmem>>, vector<1x32xf32>
    %cst_190 = arith.constant dense<0.000000e+00> : vector<16xf32>
    %529 = vector.multi_reduction <add>, %526, %cst_190 [1] : vector<16x32xf32> to vector<16xf32>
    %530 = vector.shape_cast %529 : vector<16xf32> to vector<16x1xf32>
    %cst_191 = arith.constant 3.200000e+01 : f32
    %531 = vector.broadcast %cst_191 : f32 to vector<16x1xf32>
    %532 = arith.divf %530, %531 : vector<16x1xf32>
    %533 = vector.broadcast %532 : vector<16x1xf32> to vector<16x32xf32>
    %534 = arith.subf %526, %533 : vector<16x32xf32>
    %535 = arith.mulf %534, %534 : vector<16x32xf32>
    %cst_192 = arith.constant dense<0.000000e+00> : vector<16xf32>
    %536 = vector.multi_reduction <add>, %535, %cst_192 [1] : vector<16x32xf32> to vector<16xf32>
    %537 = vector.shape_cast %536 : vector<16xf32> to vector<16x1xf32>
    %cst_193 = arith.constant 3.200000e+01 : f32
    %538 = vector.broadcast %cst_193 : f32 to vector<16x1xf32>
    %539 = arith.divf %537, %538 : vector<16x1xf32>
    %cst_194 = arith.constant 9.99999974E-6 : f32
    %540 = vector.broadcast %cst_194 : f32 to vector<16x1xf32>
    %541 = arith.addf %539, %540 : vector<16x1xf32>
    %542 = math.rsqrt %541 : vector<16x1xf32>
    %543 = vector.broadcast %542 : vector<16x1xf32> to vector<16x32xf32>
    %544 = arith.mulf %534, %543 : vector<16x32xf32>
    %545 = vector.broadcast %527 : vector<1x32xf32> to vector<16x32xf32>
    %546 = arith.mulf %544, %545 : vector<16x32xf32>
    %547 = vector.broadcast %528 : vector<1x32xf32> to vector<16x32xf32>
    %548 = arith.addf %546, %547 : vector<16x32xf32>
    %c1096 = arith.constant 1096 : index
    %c0_195 = arith.constant 0 : index
    %549 = vector.load %arg3[%c1096, %c0_195] : memref<1592x128xf32, #tpu.memory_space<vmem>>, vector<32x96xf32>
    %c1128 = arith.constant 1128 : index
    %c0_196 = arith.constant 0 : index
    %550 = vector.load %arg3[%c1128, %c0_196] : memref<1592x128xf32, #tpu.memory_space<vmem>>, vector<1x96xf32>
    %c1136 = arith.constant 1136 : index
    %c0_197 = arith.constant 0 : index
    %551 = vector.load %arg3[%c1136, %c0_197] : memref<1592x128xf32, #tpu.memory_space<vmem>>, vector<32x32xf32>
    %c1168 = arith.constant 1168 : index
    %c0_198 = arith.constant 0 : index
    %552 = vector.load %arg3[%c1168, %c0_198] : memref<1592x128xf32, #tpu.memory_space<vmem>>, vector<1x32xf32>
    %cst_199 = arith.constant dense<0.000000e+00> : vector<16x96xf32>
    %553 = tpu.matmul %548, %549, %cst_199 {dimension_numbers = #tpu.dot_dimension_numbers<[1], [0], [0], [1], [0, 0, 1, 1], [], []>} : vector<16x32xf32>, vector<32x96xf32>, vector<16x96xf32> -> vector<16x96xf32>
    %554 = vector.broadcast %550 : vector<1x96xf32> to vector<16x96xf32>
    %555 = arith.addf %553, %554 : vector<16x96xf32>
    %556 = vector.extract_strided_slice %555 {offsets = [0, 0], sizes = [16, 8], strides = [1, 1]} : vector<16x96xf32> to vector<16x8xf32>
    %557 = vector.extract_strided_slice %555 {offsets = [0, 32], sizes = [16, 8], strides = [1, 1]} : vector<16x96xf32> to vector<16x8xf32>
    %558 = vector.extract_strided_slice %555 {offsets = [0, 64], sizes = [16, 8], strides = [1, 1]} : vector<16x96xf32> to vector<16x8xf32>
    %cst_200 = arith.constant dense<0.000000e+00> : vector<16x16xf32>
    %559 = tpu.matmul %556, %557, %cst_200 {dimension_numbers = #tpu.dot_dimension_numbers<[1], [1], [0], [0], [0, 0, 1, 0], [], []>} : vector<16x8xf32>, vector<16x8xf32>, vector<16x16xf32> -> vector<16x16xf32>
    %cst_201 = arith.constant 0.353553385 : f32
    %560 = vector.broadcast %cst_201 : f32 to vector<16x16xf32>
    %561 = arith.mulf %559, %560 : vector<16x16xf32>
    %562 = arith.addf %561, %1 : vector<16x16xf32>
    %cst_202 = arith.constant dense<0xFF800000> : vector<16xf32>
    %563 = vector.multi_reduction <maximumf>, %562, %cst_202 [1] : vector<16x16xf32> to vector<16xf32>
    %564 = vector.shape_cast %563 : vector<16xf32> to vector<16x1xf32>
    %565 = vector.broadcast %564 : vector<16x1xf32> to vector<16x16xf32>
    %566 = arith.subf %562, %565 : vector<16x16xf32>
    %567 = math.exp %566 : vector<16x16xf32>
    %cst_203 = arith.constant dense<0.000000e+00> : vector<16xf32>
    %568 = vector.multi_reduction <add>, %567, %cst_203 [1] : vector<16x16xf32> to vector<16xf32>
    %569 = vector.shape_cast %568 : vector<16xf32> to vector<16x1xf32>
    %570 = vector.broadcast %569 : vector<16x1xf32> to vector<16x16xf32>
    %571 = arith.divf %567, %570 : vector<16x16xf32>
    %cst_204 = arith.constant dense<0.000000e+00> : vector<16x8xf32>
    %572 = tpu.matmul %571, %558, %cst_204 {dimension_numbers = #tpu.dot_dimension_numbers<[1], [0], [0], [1], [0, 0, 1, 1], [], []>} : vector<16x16xf32>, vector<16x8xf32>, vector<16x8xf32> -> vector<16x8xf32>
    %573 = vector.extract_strided_slice %555 {offsets = [0, 8], sizes = [16, 8], strides = [1, 1]} : vector<16x96xf32> to vector<16x8xf32>
    %574 = vector.extract_strided_slice %555 {offsets = [0, 40], sizes = [16, 8], strides = [1, 1]} : vector<16x96xf32> to vector<16x8xf32>
    %575 = vector.extract_strided_slice %555 {offsets = [0, 72], sizes = [16, 8], strides = [1, 1]} : vector<16x96xf32> to vector<16x8xf32>
    %cst_205 = arith.constant dense<0.000000e+00> : vector<16x16xf32>
    %576 = tpu.matmul %573, %574, %cst_205 {dimension_numbers = #tpu.dot_dimension_numbers<[1], [1], [0], [0], [0, 0, 1, 0], [], []>} : vector<16x8xf32>, vector<16x8xf32>, vector<16x16xf32> -> vector<16x16xf32>
    %cst_206 = arith.constant 0.353553385 : f32
    %577 = vector.broadcast %cst_206 : f32 to vector<16x16xf32>
    %578 = arith.mulf %576, %577 : vector<16x16xf32>
    %579 = arith.addf %578, %1 : vector<16x16xf32>
    %cst_207 = arith.constant dense<0xFF800000> : vector<16xf32>
    %580 = vector.multi_reduction <maximumf>, %579, %cst_207 [1] : vector<16x16xf32> to vector<16xf32>
    %581 = vector.shape_cast %580 : vector<16xf32> to vector<16x1xf32>
    %582 = vector.broadcast %581 : vector<16x1xf32> to vector<16x16xf32>
    %583 = arith.subf %579, %582 : vector<16x16xf32>
    %584 = math.exp %583 : vector<16x16xf32>
    %cst_208 = arith.constant dense<0.000000e+00> : vector<16xf32>
    %585 = vector.multi_reduction <add>, %584, %cst_208 [1] : vector<16x16xf32> to vector<16xf32>
    %586 = vector.shape_cast %585 : vector<16xf32> to vector<16x1xf32>
    %587 = vector.broadcast %586 : vector<16x1xf32> to vector<16x16xf32>
    %588 = arith.divf %584, %587 : vector<16x16xf32>
    %cst_209 = arith.constant dense<0.000000e+00> : vector<16x8xf32>
    %589 = tpu.matmul %588, %575, %cst_209 {dimension_numbers = #tpu.dot_dimension_numbers<[1], [0], [0], [1], [0, 0, 1, 1], [], []>} : vector<16x16xf32>, vector<16x8xf32>, vector<16x8xf32> -> vector<16x8xf32>
    %590 = vector.extract_strided_slice %555 {offsets = [0, 16], sizes = [16, 8], strides = [1, 1]} : vector<16x96xf32> to vector<16x8xf32>
    %591 = vector.extract_strided_slice %555 {offsets = [0, 48], sizes = [16, 8], strides = [1, 1]} : vector<16x96xf32> to vector<16x8xf32>
    %592 = vector.extract_strided_slice %555 {offsets = [0, 80], sizes = [16, 8], strides = [1, 1]} : vector<16x96xf32> to vector<16x8xf32>
    %cst_210 = arith.constant dense<0.000000e+00> : vector<16x16xf32>
    %593 = tpu.matmul %590, %591, %cst_210 {dimension_numbers = #tpu.dot_dimension_numbers<[1], [1], [0], [0], [0, 0, 1, 0], [], []>} : vector<16x8xf32>, vector<16x8xf32>, vector<16x16xf32> -> vector<16x16xf32>
    %cst_211 = arith.constant 0.353553385 : f32
    %594 = vector.broadcast %cst_211 : f32 to vector<16x16xf32>
    %595 = arith.mulf %593, %594 : vector<16x16xf32>
    %596 = arith.addf %595, %1 : vector<16x16xf32>
    %cst_212 = arith.constant dense<0xFF800000> : vector<16xf32>
    %597 = vector.multi_reduction <maximumf>, %596, %cst_212 [1] : vector<16x16xf32> to vector<16xf32>
    %598 = vector.shape_cast %597 : vector<16xf32> to vector<16x1xf32>
    %599 = vector.broadcast %598 : vector<16x1xf32> to vector<16x16xf32>
    %600 = arith.subf %596, %599 : vector<16x16xf32>
    %601 = math.exp %600 : vector<16x16xf32>
    %cst_213 = arith.constant dense<0.000000e+00> : vector<16xf32>
    %602 = vector.multi_reduction <add>, %601, %cst_213 [1] : vector<16x16xf32> to vector<16xf32>
    %603 = vector.shape_cast %602 : vector<16xf32> to vector<16x1xf32>
    %604 = vector.broadcast %603 : vector<16x1xf32> to vector<16x16xf32>
    %605 = arith.divf %601, %604 : vector<16x16xf32>
    %cst_214 = arith.constant dense<0.000000e+00> : vector<16x8xf32>
    %606 = tpu.matmul %605, %592, %cst_214 {dimension_numbers = #tpu.dot_dimension_numbers<[1], [0], [0], [1], [0, 0, 1, 1], [], []>} : vector<16x16xf32>, vector<16x8xf32>, vector<16x8xf32> -> vector<16x8xf32>
    %607 = vector.extract_strided_slice %555 {offsets = [0, 24], sizes = [16, 8], strides = [1, 1]} : vector<16x96xf32> to vector<16x8xf32>
    %608 = vector.extract_strided_slice %555 {offsets = [0, 56], sizes = [16, 8], strides = [1, 1]} : vector<16x96xf32> to vector<16x8xf32>
    %609 = vector.extract_strided_slice %555 {offsets = [0, 88], sizes = [16, 8], strides = [1, 1]} : vector<16x96xf32> to vector<16x8xf32>
    %cst_215 = arith.constant dense<0.000000e+00> : vector<16x16xf32>
    %610 = tpu.matmul %607, %608, %cst_215 {dimension_numbers = #tpu.dot_dimension_numbers<[1], [1], [0], [0], [0, 0, 1, 0], [], []>} : vector<16x8xf32>, vector<16x8xf32>, vector<16x16xf32> -> vector<16x16xf32>
    %cst_216 = arith.constant 0.353553385 : f32
    %611 = vector.broadcast %cst_216 : f32 to vector<16x16xf32>
    %612 = arith.mulf %610, %611 : vector<16x16xf32>
    %613 = arith.addf %612, %1 : vector<16x16xf32>
    %cst_217 = arith.constant dense<0xFF800000> : vector<16xf32>
    %614 = vector.multi_reduction <maximumf>, %613, %cst_217 [1] : vector<16x16xf32> to vector<16xf32>
    %615 = vector.shape_cast %614 : vector<16xf32> to vector<16x1xf32>
    %616 = vector.broadcast %615 : vector<16x1xf32> to vector<16x16xf32>
    %617 = arith.subf %613, %616 : vector<16x16xf32>
    %618 = math.exp %617 : vector<16x16xf32>
    %cst_218 = arith.constant dense<0.000000e+00> : vector<16xf32>
    %619 = vector.multi_reduction <add>, %618, %cst_218 [1] : vector<16x16xf32> to vector<16xf32>
    %620 = vector.shape_cast %619 : vector<16xf32> to vector<16x1xf32>
    %621 = vector.broadcast %620 : vector<16x1xf32> to vector<16x16xf32>
    %622 = arith.divf %618, %621 : vector<16x16xf32>
    %cst_219 = arith.constant dense<0.000000e+00> : vector<16x8xf32>
    %623 = tpu.matmul %622, %609, %cst_219 {dimension_numbers = #tpu.dot_dimension_numbers<[1], [0], [0], [1], [0, 0, 1, 1], [], []>} : vector<16x16xf32>, vector<16x8xf32>, vector<16x8xf32> -> vector<16x8xf32>
    %624 = tpu.concatenate %572, %589, %606, %623 in 1 : vector<16x8xf32>, vector<16x8xf32>, vector<16x8xf32>, vector<16x8xf32> -> vector<16x32xf32>
    %cst_220 = arith.constant dense<0.000000e+00> : vector<16x32xf32>
    %625 = tpu.matmul %624, %551, %cst_220 {dimension_numbers = #tpu.dot_dimension_numbers<[1], [0], [0], [1], [0, 0, 1, 1], [], []>} : vector<16x32xf32>, vector<32x32xf32>, vector<16x32xf32> -> vector<16x32xf32>
    %626 = vector.broadcast %552 : vector<1x32xf32> to vector<16x32xf32>
    %627 = arith.addf %625, %626 : vector<16x32xf32>
    %628 = arith.addf %526, %627 : vector<16x32xf32>
    %c1192 = arith.constant 1192 : index
    %c0_221 = arith.constant 0 : index
    %629 = vector.load %arg3[%c1192, %c0_221] : memref<1592x128xf32, #tpu.memory_space<vmem>>, vector<1x32xf32>
    %c1200 = arith.constant 1200 : index
    %c0_222 = arith.constant 0 : index
    %630 = vector.load %arg3[%c1200, %c0_222] : memref<1592x128xf32, #tpu.memory_space<vmem>>, vector<1x32xf32>
    %cst_223 = arith.constant dense<0.000000e+00> : vector<16xf32>
    %631 = vector.multi_reduction <add>, %628, %cst_223 [1] : vector<16x32xf32> to vector<16xf32>
    %632 = vector.shape_cast %631 : vector<16xf32> to vector<16x1xf32>
    %cst_224 = arith.constant 3.200000e+01 : f32
    %633 = vector.broadcast %cst_224 : f32 to vector<16x1xf32>
    %634 = arith.divf %632, %633 : vector<16x1xf32>
    %635 = vector.broadcast %634 : vector<16x1xf32> to vector<16x32xf32>
    %636 = arith.subf %628, %635 : vector<16x32xf32>
    %637 = arith.mulf %636, %636 : vector<16x32xf32>
    %cst_225 = arith.constant dense<0.000000e+00> : vector<16xf32>
    %638 = vector.multi_reduction <add>, %637, %cst_225 [1] : vector<16x32xf32> to vector<16xf32>
    %639 = vector.shape_cast %638 : vector<16xf32> to vector<16x1xf32>
    %cst_226 = arith.constant 3.200000e+01 : f32
    %640 = vector.broadcast %cst_226 : f32 to vector<16x1xf32>
    %641 = arith.divf %639, %640 : vector<16x1xf32>
    %cst_227 = arith.constant 9.99999974E-6 : f32
    %642 = vector.broadcast %cst_227 : f32 to vector<16x1xf32>
    %643 = arith.addf %641, %642 : vector<16x1xf32>
    %644 = math.rsqrt %643 : vector<16x1xf32>
    %645 = vector.broadcast %644 : vector<16x1xf32> to vector<16x32xf32>
    %646 = arith.mulf %636, %645 : vector<16x32xf32>
    %647 = vector.broadcast %629 : vector<1x32xf32> to vector<16x32xf32>
    %648 = arith.mulf %646, %647 : vector<16x32xf32>
    %649 = vector.broadcast %630 : vector<1x32xf32> to vector<16x32xf32>
    %650 = arith.addf %648, %649 : vector<16x32xf32>
    %c1208 = arith.constant 1208 : index
    %c0_228 = arith.constant 0 : index
    %651 = vector.load %arg3[%c1208, %c0_228] : memref<1592x128xf32, #tpu.memory_space<vmem>>, vector<32x128xf32>
    %cst_229 = arith.constant dense<0.000000e+00> : vector<16x128xf32>
    %652 = tpu.matmul %650, %651, %cst_229 {dimension_numbers = #tpu.dot_dimension_numbers<[1], [0], [0], [1], [0, 0, 1, 1], [], []>} : vector<16x32xf32>, vector<32x128xf32>, vector<16x128xf32> -> vector<16x128xf32>
    %c1240 = arith.constant 1240 : index
    %c0_230 = arith.constant 0 : index
    %653 = vector.load %arg3[%c1240, %c0_230] : memref<1592x128xf32, #tpu.memory_space<vmem>>, vector<1x128xf32>
    %654 = vector.broadcast %653 : vector<1x128xf32> to vector<16x128xf32>
    %655 = arith.addf %652, %654 : vector<16x128xf32>
    %cst_231 = arith.constant 5.000000e-01 : f32
    %656 = vector.broadcast %cst_231 : f32 to vector<16x128xf32>
    %657 = arith.mulf %656, %655 : vector<16x128xf32>
    %cst_232 = arith.constant 4.471500e-02 : f32
    %658 = vector.broadcast %cst_232 : f32 to vector<16x128xf32>
    %659 = arith.mulf %658, %655 : vector<16x128xf32>
    %660 = arith.mulf %659, %655 : vector<16x128xf32>
    %661 = arith.mulf %660, %655 : vector<16x128xf32>
    %662 = arith.addf %655, %661 : vector<16x128xf32>
    %cst_233 = arith.constant 0.797884583 : f32
    %663 = vector.broadcast %cst_233 : f32 to vector<16x128xf32>
    %664 = arith.mulf %663, %662 : vector<16x128xf32>
    %665 = math.tanh %664 : vector<16x128xf32>
    %cst_234 = arith.constant 1.000000e+00 : f32
    %666 = vector.broadcast %cst_234 : f32 to vector<16x128xf32>
    %667 = arith.addf %666, %665 : vector<16x128xf32>
    %668 = arith.mulf %657, %667 : vector<16x128xf32>
    %c1248 = arith.constant 1248 : index
    %c0_235 = arith.constant 0 : index
    %669 = vector.load %arg3[%c1248, %c0_235] : memref<1592x128xf32, #tpu.memory_space<vmem>>, vector<128x32xf32>
    %cst_236 = arith.constant dense<0.000000e+00> : vector<16x32xf32>
    %670 = tpu.matmul %668, %669, %cst_236 {dimension_numbers = #tpu.dot_dimension_numbers<[1], [0], [0], [1], [0, 0, 1, 1], [], []>} : vector<16x128xf32>, vector<128x32xf32>, vector<16x32xf32> -> vector<16x32xf32>
    %671 = arith.addf %628, %670 : vector<16x32xf32>
    %c1376 = arith.constant 1376 : index
    %c0_237 = arith.constant 0 : index
    %672 = vector.load %arg3[%c1376, %c0_237] : memref<1592x128xf32, #tpu.memory_space<vmem>>, vector<1x32xf32>
    %673 = vector.broadcast %672 : vector<1x32xf32> to vector<16x32xf32>
    %674 = arith.addf %671, %673 : vector<16x32xf32>
    %c1544 = arith.constant 1544 : index
    %c0_238 = arith.constant 0 : index
    %675 = vector.load %arg3[%c1544, %c0_238] : memref<1592x128xf32, #tpu.memory_space<vmem>>, vector<1x32xf32>
    %c1552 = arith.constant 1552 : index
    %c0_239 = arith.constant 0 : index
    %676 = vector.load %arg3[%c1552, %c0_239] : memref<1592x128xf32, #tpu.memory_space<vmem>>, vector<1x32xf32>
    %cst_240 = arith.constant dense<0.000000e+00> : vector<16xf32>
    %677 = vector.multi_reduction <add>, %674, %cst_240 [1] : vector<16x32xf32> to vector<16xf32>
    %678 = vector.shape_cast %677 : vector<16xf32> to vector<16x1xf32>
    %cst_241 = arith.constant 3.200000e+01 : f32
    %679 = vector.broadcast %cst_241 : f32 to vector<16x1xf32>
    %680 = arith.divf %678, %679 : vector<16x1xf32>
    %681 = vector.broadcast %680 : vector<16x1xf32> to vector<16x32xf32>
    %682 = arith.subf %674, %681 : vector<16x32xf32>
    %683 = arith.mulf %682, %682 : vector<16x32xf32>
    %cst_242 = arith.constant dense<0.000000e+00> : vector<16xf32>
    %684 = vector.multi_reduction <add>, %683, %cst_242 [1] : vector<16x32xf32> to vector<16xf32>
    %685 = vector.shape_cast %684 : vector<16xf32> to vector<16x1xf32>
    %cst_243 = arith.constant 3.200000e+01 : f32
    %686 = vector.broadcast %cst_243 : f32 to vector<16x1xf32>
    %687 = arith.divf %685, %686 : vector<16x1xf32>
    %cst_244 = arith.constant 9.99999974E-6 : f32
    %688 = vector.broadcast %cst_244 : f32 to vector<16x1xf32>
    %689 = arith.addf %687, %688 : vector<16x1xf32>
    %690 = math.rsqrt %689 : vector<16x1xf32>
    %691 = vector.broadcast %690 : vector<16x1xf32> to vector<16x32xf32>
    %692 = arith.mulf %682, %691 : vector<16x32xf32>
    %693 = vector.broadcast %675 : vector<1x32xf32> to vector<16x32xf32>
    %694 = arith.mulf %692, %693 : vector<16x32xf32>
    %695 = vector.broadcast %676 : vector<1x32xf32> to vector<16x32xf32>
    %696 = arith.addf %694, %695 : vector<16x32xf32>
    %c768 = arith.constant 768 : index
    %c0_245 = arith.constant 0 : index
    %697 = vector.load %arg3[%c768, %c0_245] : memref<1592x128xf32, #tpu.memory_space<vmem>>, vector<32x128xf32>
    %cst_246 = arith.constant dense<0.000000e+00> : vector<16x128xf32>
    %698 = tpu.matmul %696, %697, %cst_246 {dimension_numbers = #tpu.dot_dimension_numbers<[1], [0], [0], [1], [0, 0, 1, 1], [], []>} : vector<16x32xf32>, vector<32x128xf32>, vector<16x128xf32> -> vector<16x128xf32>
    %c0_247 = arith.constant 0 : index
    %c0_248 = arith.constant 0 : index
    %699 = vector.load %arg4[%c0_247, %c0_248] : memref<16x128xf32, #tpu.memory_space<vmem>>, vector<16x128xf32>
    tpu.vector_store %arg4[%c0_247, %c0_248], %698 {strides = array<i32>} : memref<16x128xf32, #tpu.memory_space<vmem>>, vector<16x128xf32>,
    return
  }
  func.func @transform_0(%arg0: i32) -> (i32, i32) {
    %c0_i32 = arith.constant 0 : i32
    %c0_i32_0 = arith.constant 0 : i32
    %c0_i32_1 = arith.constant 0 : i32
    return %c0_i32, %c0_i32_0 : i32, i32
  }
  func.func @transform_1(%arg0: i32) -> (i32, i32) {
    %c0_i32 = arith.constant 0 : i32
    %c0_i32_0 = arith.constant 0 : i32
    %c0_i32_1 = arith.constant 0 : i32
    return %c0_i32, %c0_i32_0 : i32, i32
  }
  func.func @transform_2(%arg0: i32) -> (i32, i32) {
    %c0_i32 = arith.constant 0 : i32
    %c0_i32_0 = arith.constant 0 : i32
    %c0_i32_1 = arith.constant 0 : i32
    return %c0_i32, %c0_i32_0 : i32, i32
  }
  func.func @transform_3(%arg0: i32) -> (i32, i32) {
    %c0_i32 = arith.constant 0 : i32
    %c0_i32_0 = arith.constant 0 : i32
    %c0_i32_1 = arith.constant 0 : i32
    return %c0_i32, %c0_i32_0 : i32, i32
  }
}

</mosaic_0001>

<bundles_post_ra>
// kernel: eq.1
= control target key start
LH: loop header
LB: loop body
LE: loop exit
PB: predicated region body
PF: predicated region fallthrough
CT: control target
= control target key end

     0   :  { %vm7_vm0 = vcmask 64512   ;;  %vm13_vm1 = vcmask 130112   ;;  %s39_s0 = inlined_call_operand.vmem [shape: s32[2,8], index: 0, kind: input, shape index: {}]   ;;  %s40_s1 = inlined_call_operand.vmem [shape: s32[16], index: 1, kind: output, shape index: {}]  }
   0x1   :  { %v4_v0 = vld [vmem:[%s39_s0] sm:$0x3]  ;;  %s22_s0 = smov 8  }
   0x2   :  { %5 = vst [vmem:[#allocation1] sm:$0x3] %v4_v0 }
   0x9   :  { %v10_v1 = vld [vmem:[#allocation1 + $0x1] sm:$0x1]   ;;  %v6_v2 = vld [vmem:[#allocation1] sm:$0x1]  }
   0xa   :  { %11 = vrot.lane.b32.xlu0 %v10_v1, %s22_s0  ;;  %8 = vst.msk [vmem:[#allocation0] sm:$0x1] %vm7_vm0, %v6_v2  }
  0x7c   :  { %v12_v3 = vpop.permute.xlu0 %11  }
  0x7d   :  { %14 = vst.msk [vmem:[#allocation0] sm:$0x1] %vm13_vm1, %v12_v3  }
  0x84   :  { %v17_v4 = vld [vmem:[#allocation0] sm:$0x1] }
  0x85   :  { %20 = vst [vmem:[%s40_s1] sm:$0x1] %v17_v4 }

// kernel: forward.1
= control target key start
LH: loop header
LB: loop body
LE: loop exit
PB: predicated region body
PF: predicated region fallthrough
CT: control target
= control target key end

     0   :  { %8 = vsyncpa [#allocation3], 0  ;;  %s4189_s15 = smov [#allocation2]   ;;  %s4190_s17 = smov 128   ;;  %s5062_s0 = inlined_call_operand.vmem [shape: f32[10,192], index: 0, kind: input, shape index: {}]   ;;  %s5063_s1 = inlined_call_operand.vmem [shape: f32[16,64], index: 1, kind: input, shape index: {}]   ;;  %s5064_s2 = inlined_call_operand.hbm [shape: f32[1592,128], index: 2, kind: input, shape index: {}]   ;;  %s5065_s3 = inlined_call_operand.vmem [shape: f32[16,128], index: 3, kind: output, shape index: {}]  }
   0x1   :  { %s17_s14 = sshll.u32 %s5064_s2, 4  ;;  %s19_s16 = sshll.u32 %s4189_s15, 4  ;;  %s18_s14 = int_to_ptr.hbm [resolvable:$true] %s17_s14  ;;  %s20_s16 = int_to_ptr.vmem [resolvable:$true] %s19_s16 }
   0x2   :  { %s4191_s18 = smov 8  }
   0x3   :  { %25 = dma.hbm_to_vmem [thread:$0]  %s18_s14, 25472, %s20_s16, [#allocation3], %s4190_s17, %s4190_s17, %s4191_s18  }
   0x4   :  { %4187 = dma.done.wait [#allocation3], 25472  }
   0x5   :  { %4188 = vsyncadd [#allocation3], 4294941824  ;;  %v53_v0 = vld [vmem:[#allocation2 + $0x78] sm:$0xff]  ;;  %v52_v1 = vld [vmem:[#allocation2 + $0x70] sm:$0xff]  ;;  %vm5066_vm0 = vcmask 523264   ;;  %vm66_vm1 = vcmask 1044480  }
   0x6   :  { %75 = vmatpush.msra.mxu0 %v53_v0  ;;  %v51_v2 = vld [vmem:[#allocation2 + $0x68] sm:$0xff]  ;;  %v61_v3 = vld [vmem:[#allocation2 + $0xb8] sm:$0xff]  ;;  %v50_v4 = vld [vmem:[#allocation2 + $0x60] sm:$0xff]  ;;  %vm123_vm2 = vcmask 261120   ;;  %vm127_vm3 = vcmask 254976   ;;  %v4192_v41 = vmov 32.0  }
   0x7   :  { %106 = vmatpush.msra.mxu1 %v61_v3  ;;  %v60_v5 = vld [vmem:[#allocation2 + $0xb0] sm:$0xff]  ;;  %v59_v6 = vld [vmem:[#allocation2 + $0xa8] sm:$0xff]  ;;  %v49_v7 = vld [vmem:[#allocation2 + $0x58] sm:$0xff]  ;;  %3971 = vrcp.f32 %v4192_v41  ;;  %vm228_vm11 = vcmask 64512   ;;  %vm264_vm12 = vcmask 80896   ;;  %vm268_vm13 = vcmask 74752  }
   0x8   :  { %76 = vmatpush.msra.mxu0 %v52_v1  ;;  %v58_v8 = vld [vmem:[#allocation2 + $0xa0] sm:$0xff]  ;;  %v48_v9 = vld [vmem:[#allocation2 + $0x50] sm:$0xff]  ;;  %v47_v10 = vld [vmem:[#allocation2 + $0x48] sm:$0xff]  ;;  %s4194_s26 = smov 64   ;;  %s4195_s27 = smov 88   ;;  %vm325_vm14 = vcmask 1041408  }
   0x9   :  { %107 = vmatpush.msra.mxu1 %v60_v5  ;;  %v57_v11 = vld [vmem:[#allocation2 + $0x98] sm:$0xff]  ;;  %v46_v12 = vld [vmem:[#allocation2 + $0x40] sm:$0xff]  ;;  %v56_v13 = vld [vmem:[#allocation2 + $0x90] sm:$0xff]  ;;  %s4196_s28 = smov 80   ;;  %s4197_s29 = smov 112  }
   0xa   :  { %77 = vmatpush.msra.mxu0 %v51_v2  ;;  %v55_v14 = vld [vmem:[#allocation2 + $0x88] sm:$0xff]  ;;  %v45_v15 = vld [vmem:[#allocation2 + $0x38] sm:$0xff]  ;;  %v54_v16 = vld [vmem:[#allocation2 + $0x80] sm:$0xff]  ;;  %s4198_s30 = smov 120   ;;  %s4199_s4 = smov 72  }
   0xb   :  { %108 = vmatpush.msra.mxu1 %v59_v6  ;;  %v44_v17 = vld [vmem:[#allocation2 + $0x30] sm:$0xff]  ;;  %v35_v18 = vld [vmem:[%s5062_s0 + $0x8] sm:$0xff]  ;;  %v42_v20 = vld [vmem:[#allocation2 + $0x20] sm:$0xff]  ;;  %s4200_s5 = smov 104   ;;  %s4201_s6 = smov 56  }
   0xc   :  { %78 = vmatpush.msra.mxu0 %v50_v4  ;;  %v43_v19 = vld [vmem:[#allocation2 + $0x28] sm:$0xff]  ;;  %v41_v21 = vld [vmem:[#allocation2 + $0x18] sm:$0xff]  ;;  %v40_v22 = vld [vmem:[#allocation2 + $0x10] sm:$0xff]  ;;  %s4202_s7 = smov 48   ;;  %s4203_s8 = smov 40  }
   0xd   :  { %109 = vmatpush.msra.mxu1 %v58_v8  ;;  %v37_v23 = vld [vmem:[%s5062_s0 + $0x18] sm:$0x3]  ;;  %v39_v24 = vld [vmem:[#allocation2 + $0x8] sm:$0xff]  ;;  %v38_v25 = vld [vmem:[#allocation2] sm:$0xff]  ;;  %v3972_v42 = vpop.eup %3971  ;;  %s4204_s9 = smov 24   ;;  %s4205_s10 = smov 16  }
   0xe   :  { %79 = vmatpush.msra.mxu0 %v49_v7  ;;  %v34_v26 = vld [vmem:[%s5062_s0] sm:$0xff]  ;;  %v36_v27 = vld [vmem:[%s5062_s0 + $0x10] sm:$0x3]  ;;  %v132_v43 = vmul.f32 32.0, %v3972_v42  ;;  %vm136_vm4 = vweird.f32 %v3972_v42  ;;  %v184_v59 = vld [vmem:[#allocation2 + $0xd8] sm:$0xff]  ;;  %s4193_s0 = smov 96  }
   0xf   :  { %110 = vmatpush.msra.mxu1 %v57_v11  ;;  %v62_v28 = vld [vmem:[#allocation2 + $0xc0] sm:$0x1f]  ;;  %v183_v60 = vld [vmem:[#allocation2 + $0xd0] sm:$0xff]  ;;  %v182_v61 = vld [vmem:[#allocation2 + $0xc8] sm:$0xff] }
  0x10   :  { %80 = vmatpush.msra.mxu0 %v48_v9  ;;  %v64_v29 = vrot.slane %v62_v28, 3  ;;  %v133_v44 = vsub.f32 1.0, %v132_v43  ;;  %v185_v58 = vld [vmem:[#allocation2 + $0xe0] sm:$0xff] }
  0x11   :  { %111 = vmatpush.msra.mxu1 %v56_v13  ;;  %211 = vmatpush.msra.mxu2 %v185_v58  ;;  %v4283_v41 = vld [vmem:[#allocation2 + $0x620] sm:$0x3] }
  0x12   :  { %81 = vmatpush.msra.mxu0 %v47_v10  ;;  %v67_v30 = vsel %vm66_vm1, %v62_v28, %v64_v29  ;;  %v134_v45 = vmul.f32 %v3972_v42, %v133_v44 }
  0x13   :  { %112 = vmatpush.msra.mxu1 %v55_v14  ;;  %212 = vmatpush.msra.mxu2 %v184_v59 }
  0x14   :  { %82 = vmatpush.msra.mxu0 %v46_v12  ;;  %v135_v46 = vadd.f32 %v3972_v42, %v134_v45  ;;  %v3930_v12 = vld [vmem:[#allocation2 + $0x118] ss:$0 sm:$0xff] }
  0x15   :  { %113 = vmatpush.msra.mxu1 %v54_v16  ;;  %213 = vmatpush.msra.mxu2 %v183_v60  ;;  %v3931_v16 = vld [vmem:[#allocation2 + $0x120] ss:$0 sm:$0xff] }
  0x16   :  { %83 = vmatpush.msra.mxu0 %v45_v15  ;;  %3729 = vmatmul.msk.f32.vlgmr.msra.gmra.mxu1 %vm5066_vm0, %v35_v18  ;;  %v4253_v47 = vsel %vm136_vm4, %v3972_v42, %v135_v46 }
  0x17   :  { %214 = vmatpush.msra.mxu2 %v182_v61 }
  0x18   :  { %84 = vmatpush.msra.mxu0 %v44_v17 }
  0x1a   :  { %85 = vmatpush.msra.mxu0 %v43_v19 }
  0x1c   :  { %86 = vmatpush.msra.mxu0 %v42_v20 }
  0x1e   :  { %87 = vmatpush.msra.mxu0 %v41_v21  ;;  %3730 = vmatmul.msk.f32.gmra.mxu1 %vm5066_vm0, %v37_v23 }
  0x20   :  { %88 = vmatpush.msra.mxu0 %v40_v22 }
  0x22   :  { %89 = vmatpush.msra.mxu0 %v39_v24 }
  0x24   :  { %90 = vmatpush.msra.mxu0 %v38_v25 }
  0x25   :  { %91 = vmatmul.f32.vlgmr.msra.gmra.mxu0 %v34_v26 }
  0x2d   :  { %94 = vmatmul.f32.gmra.mxu0 %v36_v27  ;;  %v3932_v27 = vld [vmem:[#allocation2 + $0xe8] ss:$0 sm:$0xff] }
  0x93   :  { %v115_v31 = vpop.f32.mrf.mxu1 }
  0x9b   :  { %v118_v37 = vpop.f32.mrf.mxu1 }
  0xa2   :  { %v92_v32 = vpop.f32.mrf.mxu0 }
  0xa3   :  { %v93_v33 = vadd.f32 %v92_v32, %v67_v30 }
  0xa5   :  { %v4245_v34 = vadd.f32 %v115_v31, %v93_v33 }
  0xa7   :  { %v124_v35 = vsel %vm123_vm2, %v4245_v34, 0.0 }
  0xa8   :  { %125 = vadd.xlane.f32.xlu0 %v124_v35  ;;  %v4279_v35 = vld [vmem:[#allocation2 + $0x618] sm:$0xff] }
  0xaa   :  { %v95_v36 = vpop.f32.mrf.mxu0 }
  0xab   :  { %v96_v38 = vadd.f32 %v95_v36, %v64_v29 }
  0xad   :  { %v4249_v39 = vadd.f32 %v118_v37, %v96_v38 }
  0xaf   :  { %v128_v40 = vsel %vm127_vm3, %v4249_v39, 0.0 }
  0xb0   :  { %129 = vadd.xlane.f32.xlu0 %v128_v40 }
 0x11b   :  { %v126_v48 = vpop.xlane.xlu0 %125 }
 0x11c   :  { %v138_v49 = vmul.f32 %v4253_v47, %v126_v48 }
 0x11e   :  { %v140_v50 = vsub.f32 %v4245_v34, %v138_v49 }
 0x120   :  { %v142_v51 = vmul.f32 %v140_v50, %v140_v50 }
 0x122   :  { %v144_v52 = vsel %vm123_vm2, %v142_v51, 0.0 }
 0x123   :  { %145 = vadd.xlane.f32.xlu1 %v144_v52  ;;  %v130_v53 = vpop.xlane.xlu0 %129 }
 0x124   :  { %v139_v54 = vmul.f32 %v4253_v47, %v130_v53 }
 0x126   :  { %v141_v55 = vsub.f32 %v4249_v39, %v139_v54 }
 0x128   :  { %v143_v56 = vmul.f32 %v141_v55, %v141_v55 }
 0x12a   :  { %v147_v57 = vsel %vm127_vm3, %v143_v56, 0.0 }
 0x12b   :  { %148 = vadd.xlane.f32.xlu1 %v147_v57 }
 0x196   :  { %v146_v62 = vpop.xlane.xlu1 %145 }
 0x197   :  { %v150_v63 = vmul.f32 %v146_v62, %v4253_v47 }
 0x199   :  { %v152_v0 = vadd.f32 1e-12, %v150_v63 }
 0x19b   :  { %3973 = vrsqrt.f32 %v152_v0  ;;  %vm160_vm6 = vweird.f32 %v152_v0 }
 0x19e   :  { %v149_v1 = vpop.xlane.xlu1 %148 }
 0x19f   :  { %v151_v2 = vmul.f32 %v149_v1, %v4253_v47 }
 0x1a1   :  { %v3974_v3 = vpop.eup %3973  ;;  %v153_v4 = vadd.f32 1e-12, %v151_v2 }
 0x1a2   :  { %v155_v5 = vmul.f32 %v3974_v3, %v152_v0  ;;  %vm161_vm5 = vweird.f32 %v3974_v3 }
 0x1a3   :  { %3975 = vrsqrt.f32 %v153_v4  ;;  %vm162_vm7 = vmor %vm160_vm6, %vm161_vm5  ;;  %vm170_vm9 = vweird.f32 %v153_v4 }
 0x1a4   :  { %v156_v6 = vmul.f32 %v3974_v3, %v155_v5 }
 0x1a6   :  { %v157_v7 = vmul.f32 0.5, %v156_v6 }
 0x1a8   :  { %v158_v8 = vsub.f32 1.5, %v157_v7 }
 0x1a9   :  { %v3976_v9 = vpop.eup %3975 }
 0x1aa   :  { %v159_v10 = vmul.f32 %v3974_v3, %v158_v8  ;;  %v165_v11 = vmul.f32 %v3976_v9, %v153_v4  ;;  %vm171_vm8 = vweird.f32 %v3976_v9 }
 0x1ab   :  { %vm172_vm10 = vmor %vm170_vm9, %vm171_vm8 }
 0x1ac   :  { %v166_v13 = vmul.f32 %v3976_v9, %v165_v11  ;;  %v163_v14 = vsel %vm162_vm7, %v3974_v3, %v159_v10 }
 0x1ad   :  { %v174_v15 = vmul.f32 %v163_v14, %v140_v50 }
 0x1ae   :  { %v167_v17 = vmul.f32 0.5, %v166_v13 }
 0x1af   :  { %v177_v18 = vmul.f32 %v3930_v12, %v174_v15 }
 0x1b0   :  { %v168_v19 = vsub.f32 1.5, %v167_v17 }
 0x1b1   :  { %v180_v20 = vadd.f32 %v3931_v16, %v177_v18 }
 0x1b2   :  { %v169_v21 = vmul.f32 %v3976_v9, %v168_v19 }
 0x1b3   :  { %3731 = vmatmul.msk.f32.vlgmr.msra.gmra.mxu2 %vm123_vm2, %v180_v20 }
 0x1b4   :  { %v173_v22 = vsel %vm172_vm10, %v3976_v9, %v169_v21 }
 0x1b5   :  { %v175_v23 = vmul.f32 %v173_v22, %v141_v55 }
 0x1b7   :  { %v178_v24 = vmul.f32 %v3930_v12, %v175_v23 }
 0x1b9   :  { %v181_v25 = vadd.f32 %v3931_v16, %v178_v24 }
 0x1bb   :  { %3732 = vmatmul.msk.f32.gmra.mxu2 %vm123_vm2, %v181_v25 }
 0x236   :  { %v216_v26 = vpop.f32.mrf.mxu2 }
 0x237   :  { %v4269_v30 = vadd.f32 %v3932_v27, %v216_v26 }
 0x23e   :  { %v219_v28 = vpop.f32.mrf.mxu2 }
 0x23f   :  { %v4265_v29 = vadd.f32 %v3932_v27, %v219_v28 }
 0x241   :  { %226 = vrot.lane.b32.xlu2 %v4265_v29, %s4193_s0 }
 0x249   :  { %224 = vrot.lane.b32.xlu2 %v4269_v30, %s4193_s0 }
 0x29b   :  { %v227_v31 = vpop.permute.xlu2 %226 }
 0x29c   :  { %3733 = vmatpush.xpose.msk.msrb.mxu1 %vm228_vm11, %v227_v31 }
 0x2a3   :  { %v225_v32 = vpop.permute.xlu2 %224 }
 0x2a4   :  { %3734 = vmatpush.xpose.msk.msrb.mxu1 %vm228_vm11, %v225_v32 }
 0x2a7   :  { %3735 = vmatmul.msk.f32.vlgmr.msrb.gmra.mxu1 %vm228_vm11, %v4269_v30 }
 0x2af   :  { %3736 = vmatmul.msk.f32.gmra.mxu1 %vm228_vm11, %v4265_v29 }
 0x324   :  { %v254_v33 = vpop.f32.mrf.mxu1 }
 0x325   :  { %v260_v36 = vmul.f32 0.35355338, %v254_v33 }
 0x327   :  { %v262_v37 = vadd.f32 %v260_v36, %v4279_v35 }
 0x329   :  { %v265_v38 = vsel %vm264_vm12, %v262_v37, -inf }
 0x32a   :  { %266 = vmax.xlane.f32.xlu0 %v265_v38 }
 0x32c   :  { %v257_v40 = vpop.f32.mrf.mxu1 }
 0x32d   :  { %v261_v42 = vmul.f32 0.35355338, %v257_v40 }
 0x32f   :  { %v263_v43 = vadd.f32 %v261_v42, %v4283_v41 }
 0x331   :  { %v269_v44 = vsel %vm268_vm13, %v263_v43, -inf }
 0x332   :  { %270 = vmax.xlane.f32.xlu1 %v269_v44 }
 0x33e   :  { %314 = vrot.lane.b32.xlu0 %v4269_v30, %s4194_s26 }
 0x346   :  { %355 = vrot.lane.b32.xlu0 %v4269_v30, %s4195_s27 }
 0x34b   :  { %316 = vrot.lane.b32.xlu1 %v4265_v29, %s4194_s26 }
 0x34e   :  { %482 = vrot.lane.b32.xlu0 %v4269_v30, %s4196_s28 }
 0x353   :  { %357 = vrot.lane.b32.xlu1 %v4265_v29, %s4195_s27 }
 0x356   :  { %478 = vrot.lane.b32.xlu0 %v4269_v30, %s4197_s29 }
 0x35b   :  { %351 = vrot.lane.b32.xlu1 %v4269_v30, %s4198_s30 }
 0x363   :  { %353 = vrot.lane.b32.xlu1 %v4265_v29, %s4198_s30 }
 0x36b   :  { %611 = vrot.lane.b32.xlu1 %v4265_v29, %s4199_s4 }
 0x373   :  { %609 = vrot.lane.b32.xlu1 %v4269_v30, %s4199_s4 }
 0x39d   :  { %v267_v45 = vpop.xlane.xlu0 %266 }
 0x39e   :  { %v272_v46 = vsub.f32 %v262_v37, %v267_v45 }
 0x3a0   :  { %v274_v48 = vmul.f32 1.442695, %v272_v46 }
 0x3a2   :  { %3977 = vpow2.f32 %v274_v48 }
 0x3a5   :  { %v271_v49 = vpop.xlane.xlu1 %270 }
 0x3a6   :  { %v273_v50 = vsub.f32 %v263_v43, %v271_v49 }
 0x3a8   :  { %v3978_v51 = vpop.eup %3977  ;;  %v276_v52 = vmul.f32 1.442695, %v273_v50 }
 0x3a9   :  { %v278_v53 = vsel %vm264_vm12, %v3978_v51, 0.0 }
 0x3aa   :  { %3979 = vpow2.f32 %v276_v52  ;;  %279 = vadd.xlane.f32.xlu2 %v278_v53 }
 0x3b0   :  { %v4308_v54 = vpop.eup %3979  ;;  %v315_v57 = vpop.permute.xlu0 %314 }
 0x3b1   :  { %v281_v55 = vsel %vm268_vm13, %v4308_v54, 0.0 }
 0x3b2   :  { %282 = vadd.xlane.f32.xlu0 %v281_v55 }
 0x3b8   :  { %v356_v59 = vpop.permute.xlu0 %355 }
 0x3bd   :  { %v317_v56 = vpop.permute.xlu1 %316 }
 0x3be   :  { %3737 = vmatpush.msk.msrb.mxu2 %vm325_vm14, %v317_v56 }
 0x3c0   :  { %343 = vmatpush.msrb.mxu2 %v315_v57  ;;  %v483_v0 = vpop.permute.xlu0 %482 }
 0x3c2   :  { %484 = vrot.lane.b32.xlu2 %v4265_v29, %s4196_s28 }
 0x3c5   :  { %v358_v58 = vpop.permute.xlu1 %357 }
 0x3c6   :  { %3740 = vmatpush.xpose.msk.msra.mxu3 %vm228_vm11, %v358_v58  ;;  %480 = vrot.lane.b32.xlu0 %v4265_v29, %s4197_s29 }
 0x3c8   :  { %v479_v1 = vpop.permute.xlu0 %478 }
 0x3ca   :  { %605 = vrot.lane.b32.xlu2 %v4269_v30, %s4200_s5  ;;  %3741 = vmatpush.xpose.msk.msra.mxu3 %vm228_vm11, %v356_v59 }
 0x3cd   :  { %v352_v60 = vpop.permute.xlu1 %351 }
 0x3ce   :  { %607 = vrot.lane.b32.xlu0 %v4265_v29, %s4200_s5  ;;  %3742 = vmatmul.msk.f32.vlgmr.msra.gmra.mxu3 %vm228_vm11, %v352_v60 }
 0x3d5   :  { %v354_v61 = vpop.permute.xlu1 %353 }
 0x3d6   :  { %3743 = vmatmul.msk.f32.gmra.mxu3 %vm228_vm11, %v354_v61 }
 0x3dd   :  { %v612_v62 = vpop.permute.xlu1 %611 }
 0x3de   :  { %3754 = vmatpush.xpose.msk.msrb.mxu0 %vm228_vm11, %v612_v62 }
 0x3e5   :  { %v610_v63 = vpop.permute.xlu1 %609 }
 0x3e6   :  { %3755 = vmatpush.xpose.msk.msrb.mxu0 %vm228_vm11, %v610_v63 }
 0x41d   :  { %v280_v2 = vpop.xlane.xlu2 %279 }
 0x41e   :  { %3981 = vrcp.f32 %v280_v2  ;;  %v295_v8 = vand.u32 2147483648, %v280_v2  ;;  %v293_v10 = vand.u32 2147483647, %v280_v2  ;;  %vm289_vm1 = vweird.f32 %v280_v2 }
 0x420   :  { %v296_v13 = vor.u32 1.1754944e-38, %v295_v8  ;;  %vm294_vm5 = vcmp.eq.f32.partialorder %v293_v10, 8.507059e+37 }
 0x424   :  { %v3982_v3 = vpop.eup %3981 }
 0x425   :  { %v285_v4 = vmul.f32 %v3982_v3, %v280_v2  ;;  %v485_v5 = vpop.permute.xlu2 %484  ;;  %v283_v6 = vpop.xlane.xlu0 %282  ;;  %vm290_vm15 = vweird.f32 %v3982_v3 }
 0x426   :  { %3983 = vrcp.f32 %v283_v6  ;;  %3747 = vmatpush.xpose.msk.msra.mxu2 %vm228_vm11, %v485_v5  ;;  %vm291_vm4 = vmor %vm289_vm1, %vm290_vm15  ;;  %v310_v20 = vand.u32 2147483648, %v283_v6  ;;  %v308_v22 = vand.u32 2147483647, %v283_v6  ;;  %vm304_vm7 = vweird.f32 %v283_v6 }
 0x427   :  { %v286_v7 = vsub.f32 1.0, %v285_v4 }
 0x428   :  { %v311_v24 = vor.u32 1.1754944e-38, %v310_v20  ;;  %vm309_vm9 = vcmp.eq.f32.partialorder %v308_v22, 8.507059e+37 }
 0x429   :  { %v287_v9 = vmul.f32 %v3982_v3, %v286_v7 }
 0x42a   :  { %3748 = vmatpush.xpose.msk.msra.mxu2 %vm228_vm11, %v483_v0 }
 0x42b   :  { %v288_v11 = vadd.f32 %v3982_v3, %v287_v9 }
 0x42c   :  { %v3984_v12 = vpop.eup %3983 }
 0x42d   :  { %v300_v14 = vmul.f32 %v3984_v12, %v283_v6  ;;  %v606_v15 = vpop.permute.xlu2 %605  ;;  %v292_v16 = vsel %vm291_vm4, %v3982_v3, %v288_v11  ;;  %vm305_vm6 = vweird.f32 %v3984_v12 }
 0x42e   :  { %3756 = vmatmul.msk.f32.vlgmr.msrb.gmra.mxu0 %vm228_vm11, %v606_v15  ;;  %v297_v17 = vsel %vm294_vm5, %v296_v13, %v292_v16  ;;  %vm306_vm8 = vmor %vm304_vm7, %vm305_vm6 }
 0x42f   :  { %v301_v18 = vsub.f32 1.0, %v300_v14  ;;  %v298_v19 = vmul.f32 %v3978_v51, %v297_v17 }
 0x431   :  { %3738 = vmatmul.msk.f32.vlgmr.msrb.gmra.mxu2 %vm264_vm12, %v298_v19  ;;  %v302_v21 = vmul.f32 %v3984_v12, %v301_v18 }
 0x433   :  { %v303_v23 = vadd.f32 %v3984_v12, %v302_v21 }
 0x435   :  { %v307_v25 = vsel %vm306_vm8, %v3984_v12, %v303_v23 }
 0x436   :  { %v312_v26 = vsel %vm309_vm9, %v311_v24, %v307_v25 }
 0x437   :  { %v313_v27 = vmul.f32 %v4308_v54, %v312_v26 }
 0x438   :  { %v481_v28 = vpop.permute.xlu0 %480 }
 0x439   :  { %3739 = vmatmul.msk.f32.gmra.mxu2 %vm264_vm12, %v313_v27 }
 0x440   :  { %v608_v31 = vpop.permute.xlu0 %607 }
 0x441   :  { %3749 = vmatmul.msk.f32.vlgmr.msra.gmra.mxu2 %vm228_vm11, %v479_v1  ;;  %3757 = vmatmul.msk.f32.gmra.mxu0 %vm228_vm11, %v608_v31 }
 0x449   :  { %3750 = vmatmul.msk.f32.gmra.mxu2 %vm228_vm11, %v481_v28 }
 0x451   :  { %v384_v32 = vpop.f32.mrf.mxu3 }
 0x452   :  { %v390_v33 = vmul.f32 0.35355338, %v384_v32 }
 0x454   :  { %v392_v36 = vadd.f32 %v390_v33, %v4279_v35 }
 0x456   :  { %v394_v37 = vsel %vm264_vm12, %v392_v36, -inf }
 0x457   :  { %395 = vmax.xlane.f32.xlu1 %v394_v37 }
 0x459   :  { %v387_v38 = vpop.f32.mrf.mxu3 }
 0x45a   :  { %v391_v40 = vmul.f32 0.35355338, %v387_v38 }
 0x45c   :  { %v393_v42 = vadd.f32 %v391_v40, %v4283_v41 }
 0x45e   :  { %v397_v43 = vsel %vm268_vm13, %v393_v42, -inf }
 0x45f   :  { %398 = vmax.xlane.f32.xlu2 %v397_v43 }
 0x4ab   :  { %v638_v44 = vpop.f32.mrf.mxu0 }
 0x4ac   :  { %v644_v45 = vmul.f32 0.35355338, %v638_v44 }
 0x4ae   :  { %v646_v46 = vadd.f32 %v644_v45, %v4279_v35 }
 0x4b0   :  { %v648_v48 = vsel %vm264_vm12, %v646_v46, -inf }
 0x4b1   :  { %649 = vmax.xlane.f32.xlu2 %v648_v48 }
 0x4b4   :  { %v4342_v49 = vpop.f32.mrf.mxu2 }
 0x4bc   :  { %v4344_v50 = vpop.f32.mrf.mxu2 }
 0x4be   :  { %v641_v53 = vpop.f32.mrf.mxu0 }
 0x4bf   :  { %v645_v55 = vmul.f32 0.35355338, %v641_v53 }
 0x4c1   :  { %v647_v62 = vadd.f32 %v645_v55, %v4283_v41 }
 0x4c3   :  { %v651_v1 = vsel %vm268_vm13, %v647_v62, -inf }
 0x4c4   :  { %v511_v51 = vpop.f32.mrf.mxu2 }
 0x4c5   :  { %v517_v52 = vmul.f32 0.35355338, %v511_v51 }
 0x4c7   :  { %v519_v54 = vadd.f32 %v517_v52, %v4279_v35 }
 0x4c9   :  { %v521_v56 = vsel %vm264_vm12, %v519_v54, -inf }
 0x4ca   :  { %v396_v57 = vpop.xlane.xlu1 %395  ;;  %522 = vmax.xlane.f32.xlu0 %v521_v56 }
 0x4cb   :  { %v400_v58 = vsub.f32 %v392_v36, %v396_v57 }
 0x4cc   :  { %v514_v59 = vpop.f32.mrf.mxu2 }
 0x4cd   :  { %v402_v60 = vmul.f32 1.442695, %v400_v58  ;;  %v518_v61 = vmul.f32 0.35355338, %v514_v59 }
 0x4cf   :  { %3985 = vpow2.f32 %v402_v60  ;;  %v520_v63 = vadd.f32 %v518_v61, %v4283_v41 }
 0x4d1   :  { %v524_v0 = vsel %vm268_vm13, %v520_v63, -inf }
 0x4d2   :  { %v399_v2 = vpop.xlane.xlu2 %398  ;;  %525 = vmax.xlane.f32.xlu1 %v524_v0  ;;  %652 = vmax.xlane.f32.xlu0 %v651_v1 }
 0x4d3   :  { %v401_v35 = vsub.f32 %v393_v42, %v399_v2 }
 0x4d5   :  { %v4352_v3 = vpop.eup %3985  ;;  %v404_v4 = vmul.f32 1.442695, %v401_v35 }
 0x4d6   :  { %v406_v5 = vsel %vm264_vm12, %v4352_v3, 0.0 }
 0x4d7   :  { %3987 = vpow2.f32 %v404_v4  ;;  %407 = vadd.xlane.f32.xlu2 %v406_v5 }
 0x4dd   :  { %v4356_v6 = vpop.eup %3987 }
 0x4de   :  { %v409_v41 = vsel %vm268_vm13, %v4356_v6, 0.0 }
 0x4df   :  { %410 = vadd.xlane.f32.xlu1 %v409_v41 }
 0x4f8   :  { %444 = vrot.lane.b32.xlu1 %v4265_v29, %s4201_s6 }
 0x500   :  { %569 = vrot.lane.b32.xlu1 %v4269_v30, %s4202_s7 }
 0x508   :  { %696 = vrot.lane.b32.xlu1 %v4269_v30, %s4203_s8 }
 0x524   :  { %v650_v7 = vpop.xlane.xlu2 %649 }
 0x525   :  { %v654_v8 = vsub.f32 %v646_v46, %v650_v7 }
 0x527   :  { %v656_v9 = vmul.f32 1.442695, %v654_v8 }
 0x529   :  { %3989 = vpow2.f32 %v656_v9 }
 0x52f   :  { %v4366_v10 = vpop.eup %3989 }
 0x530   :  { %v660_v11 = vsel %vm264_vm12, %v4366_v10, 0.0 }
 0x531   :  { %661 = vadd.xlane.f32.xlu2 %v660_v11 }
 0x53d   :  { %v523_v12 = vpop.xlane.xlu0 %522 }
 0x53e   :  { %v527_v16 = vsub.f32 %v519_v54, %v523_v12 }
 0x540   :  { %v529_v17 = vmul.f32 1.442695, %v527_v16 }
 0x545   :  { %v653_v13 = vpop.xlane.xlu0 %652  ;;  %v526_v18 = vpop.xlane.xlu1 %525 }
 0x546   :  { %v655_v14 = vsub.f32 %v647_v62, %v653_v13  ;;  %v528_v20 = vsub.f32 %v520_v63, %v526_v18 }
 0x548   :  { %v658_v15 = vmul.f32 1.442695, %v655_v14  ;;  %v531_v22 = vmul.f32 1.442695, %v528_v20 }
 0x549   :  { %442 = vrot.lane.b32.xlu2 %v4269_v30, %s4201_s6 }
 0x54a   :  { %3991 = vpow2.f32 %v658_v15  ;;  %v408_v28 = vpop.xlane.xlu2 %407 }
 0x54b   :  { %3993 = vpow2.f32 %v529_v17  ;;  %v423_v43 = vand.u32 2147483648, %v408_v28  ;;  %vm417_vm15 = vweird.f32 %v408_v28  ;;  %v421_v44 = vand.u32 2147483647, %v408_v28 }
 0x54c   :  { %3995 = vpow2.f32 %v531_v22 }
 0x54d   :  { %3997 = vrcp.f32 %v408_v28  ;;  %v424_v48 = vor.u32 1.1754944e-38, %v423_v43  ;;  %vm422_vm4 = vcmp.eq.f32.partialorder %v421_v44, 8.507059e+37 }
 0x550   :  { %v4372_v19 = vpop.eup %3991 }
 0x551   :  { %698 = vrot.lane.b32.xlu2 %v4265_v29, %s4203_s8  ;;  %v663_v21 = vsel %vm268_vm13, %v4372_v19, 0.0  ;;  %v4378_v23 = vpop.eup %3993 }
 0x552   :  { %664 = vadd.xlane.f32.xlu0 %v663_v21  ;;  %v533_v30 = vsel %vm264_vm12, %v4378_v23, 0.0  ;;  %v4382_v24 = vpop.eup %3995  ;;  %v411_v25 = vpop.xlane.xlu1 %410 }
 0x553   :  { %v536_v26 = vsel %vm268_vm13, %v4382_v24, 0.0  ;;  %v3998_v31 = vpop.eup %3997  ;;  %3999 = vrcp.f32 %v411_v25  ;;  %v438_v54 = vand.u32 2147483648, %v411_v25  ;;  %vm432_vm6 = vweird.f32 %v411_v25 }
 0x554   :  { %v413_v32 = vmul.f32 %v3998_v31, %v408_v28  ;;  %vm418_vm10 = vweird.f32 %v3998_v31  ;;  %v436_v59 = vand.u32 2147483647, %v411_v25 }
 0x555   :  { %vm419_vm1 = vmor %vm417_vm15, %vm418_vm10  ;;  %v439_v62 = vor.u32 1.1754944e-38, %v438_v54 }
 0x556   :  { %v414_v33 = vsub.f32 1.0, %v413_v32  ;;  %vm437_vm8 = vcmp.eq.f32.partialorder %v436_v59, 8.507059e+37  ;;  %v190_v59 = vld [vmem:[#allocation2 + $0x108] sm:$0xff] }
 0x557   :  { %783 = vmatpush.msrb.mxu2 %v190_v59 }
 0x558   :  { %v415_v37 = vmul.f32 %v3998_v31, %v414_v33 }
 0x559   :  { %v4000_v36 = vpop.eup %3999 }
 0x55a   :  { %534 = vadd.xlane.f32.xlu0 %v533_v30  ;;  %v428_v38 = vmul.f32 %v4000_v36, %v411_v25  ;;  %v416_v40 = vadd.f32 %v3998_v31, %v415_v37  ;;  %vm433_vm5 = vweird.f32 %v4000_v36 }
 0x55b   :  { %vm434_vm7 = vmor %vm432_vm6, %vm433_vm5 }
 0x55c   :  { %v429_v42 = vsub.f32 1.0, %v428_v38  ;;  %v420_v46 = vsel %vm419_vm1, %v3998_v31, %v416_v40 }
 0x55d   :  { %v425_v51 = vsel %vm422_vm4, %v424_v48, %v420_v46 }
 0x55e   :  { %v426_v58 = vmul.f32 %v4352_v3, %v425_v51 }
 0x562   :  { %537 = vadd.xlane.f32.xlu0 %v536_v26 }
 0x56a   :  { %v445_v27 = vpop.permute.xlu1 %444 }
 0x56b   :  { %3744 = vmatpush.msk.msra.mxu1 %vm325_vm14, %v445_v27 }
 0x572   :  { %v4389_v55 = vpop.permute.xlu1 %569 }
 0x576   :  { %571 = vrot.lane.b32.xlu0 %v4265_v29, %s4202_s7  ;;  %v430_v29 = vmul.f32 %v4000_v36, %v429_v42 }
 0x578   :  { %v431_v52 = vadd.f32 %v4000_v36, %v430_v29 }
 0x57a   :  { %v435_v61 = vsel %vm434_vm7, %v4000_v36, %v431_v52  ;;  %v697_v5 = vpop.permute.xlu1 %696 }
 0x57b   :  { %v440_v0 = vsel %vm437_vm8, %v439_v62, %v435_v61  ;;  %v188_v61 = vld [vmem:[#allocation2 + $0xf8] sm:$0xff]  ;;  %v187_v62 = vld [vmem:[#allocation2 + $0xf0] sm:$0xff] }
 0x57c   :  { %v441_v3 = vmul.f32 %v4356_v6, %v440_v0 }
 0x5a4   :  { %v662_v45 = vpop.xlane.xlu2 %661 }
 0x5a5   :  { %4001 = vrcp.f32 %v662_v45  ;;  %v677_v2 = vand.u32 2147483648, %v662_v45  ;;  %vm671_vm10 = vweird.f32 %v662_v45  ;;  %v675_v35 = vand.u32 2147483647, %v662_v45 }
 0x5a7   :  { %v678_v7 = vor.u32 1.1754944e-38, %v677_v2  ;;  %vm676_vm1 = vcmp.eq.f32.partialorder %v675_v35, 8.507059e+37 }
 0x5ab   :  { %v4002_v53 = vpop.eup %4001 }
 0x5ac   :  { %v667_v56 = vmul.f32 %v4002_v53, %v662_v45  ;;  %v443_v57 = vpop.permute.xlu2 %442  ;;  %vm672_vm9 = vweird.f32 %v4002_v53 }
 0x5ad   :  { %470 = vmatpush.msra.mxu1 %v443_v57  ;;  %vm673_vm15 = vmor %vm671_vm10, %vm672_vm9 }
 0x5ae   :  { %v668_v60 = vsub.f32 1.0, %v667_v56  ;;  %3745 = vmatmul.msk.f32.vlgmr.msra.gmra.mxu1 %vm264_vm12, %v426_v58 }
 0x5b0   :  { %v669_v63 = vmul.f32 %v4002_v53, %v668_v60  ;;  %v189_v60 = vld [vmem:[#allocation2 + $0x100] sm:$0xff] }
 0x5b1   :  { %784 = vmatpush.msrb.mxu2 %v189_v60 }
 0x5b2   :  { %v670_v1 = vadd.f32 %v4002_v53, %v669_v63 }
 0x5b3   :  { %785 = vmatpush.msrb.mxu2 %v188_v61 }
 0x5b4   :  { %v699_v4 = vpop.permute.xlu2 %698  ;;  %v674_v41 = vsel %vm673_vm15, %v4002_v53, %v670_v1 }
 0x5b5   :  { %3758 = vmatpush.msk.msrb.mxu1 %vm325_vm14, %v699_v4  ;;  %v679_v8 = vsel %vm676_vm1, %v678_v7, %v674_v41  ;;  %786 = vmatpush.msrb.mxu2 %v187_v62 }
 0x5b6   :  { %3746 = vmatmul.msk.f32.gmra.mxu1 %vm264_vm12, %v441_v3  ;;  %v680_v9 = vmul.f32 %v4366_v10, %v679_v8 }
 0x5b7   :  { %724 = vmatpush.msrb.mxu1 %v697_v5 }
 0x5be   :  { %3759 = vmatmul.msk.f32.vlgmr.msrb.gmra.mxu1 %vm264_vm12, %v680_v9 }
 0x5c5   :  { %v665_v11 = vpop.xlane.xlu0 %664 }
 0x5c6   :  { %4003 = vrcp.f32 %v665_v11  ;;  %v692_v15 = vand.u32 2147483648, %v665_v11  ;;  %v690_v17 = vand.u32 2147483647, %v665_v11  ;;  %vm686_vm5 = vweird.f32 %v665_v11 }
 0x5c8   :  { %v693_v21 = vor.u32 1.1754944e-38, %v692_v15  ;;  %vm691_vm7 = vcmp.eq.f32.partialorder %v690_v17, 8.507059e+37 }
 0x5cc   :  { %v4004_v12 = vpop.eup %4003 }
 0x5cd   :  { %v682_v13 = vmul.f32 %v4004_v12, %v665_v11  ;;  %v535_v6 = vpop.xlane.xlu0 %534  ;;  %vm687_vm4 = vweird.f32 %v4004_v12 }
 0x5ce   :  { %4005 = vrcp.f32 %v535_v6  ;;  %vm688_vm6 = vmor %vm686_vm5, %vm687_vm4  ;;  %v550_v37 = vand.u32 2147483648, %v535_v6  ;;  %vm544_vm9 = vweird.f32 %v535_v6  ;;  %v548_v38 = vand.u32 2147483647, %v535_v6 }
 0x5cf   :  { %v683_v14 = vsub.f32 1.0, %v682_v13 }
 0x5d0   :  { %v551_v43 = vor.u32 1.1754944e-38, %v550_v37  ;;  %vm549_vm15 = vcmp.eq.f32.partialorder %v548_v38, 8.507059e+37 }
 0x5d1   :  { %v684_v16 = vmul.f32 %v4004_v12, %v683_v14 }
 0x5d3   :  { %v685_v18 = vadd.f32 %v4004_v12, %v684_v16 }
 0x5d4   :  { %v4006_v20 = vpop.eup %4005 }
 0x5d5   :  { %v540_v22 = vmul.f32 %v4006_v20, %v535_v6  ;;  %v538_v10 = vpop.xlane.xlu0 %537  ;;  %v689_v30 = vsel %vm688_vm6, %v4004_v12, %v685_v18  ;;  %vm545_vm8 = vweird.f32 %v4006_v20 }
 0x5d6   :  { %4007 = vrcp.f32 %v538_v10  ;;  %v694_v25 = vsel %vm691_vm7, %v693_v21, %v689_v30  ;;  %vm546_vm10 = vmor %vm544_vm9, %vm545_vm8  ;;  %v565_v46 = vand.u32 2147483648, %v538_v10  ;;  %vm559_vm4 = vweird.f32 %v538_v10 }
 0x5d7   :  { %v695_v26 = vmul.f32 %v4372_v19, %v694_v25  ;;  %v541_v27 = vsub.f32 1.0, %v540_v22  ;;  %v563_v48 = vand.u32 2147483647, %v538_v10  ;;  %vm758_vm7 = vcmask 130048  }
 0x5d8   :  { %v566_v52 = vor.u32 1.1754944e-38, %v565_v46  ;;  %vm761_vm8 = vcmask 195584  }
 0x5d9   :  { %3760 = vmatmul.msk.f32.gmra.mxu1 %vm264_vm12, %v695_v26  ;;  %v542_v31 = vmul.f32 %v4006_v20, %v541_v27  ;;  %vm564_vm6 = vcmp.eq.f32.partialorder %v563_v48, 8.507059e+37  ;;  %v851_v26 = vld [vmem:[#allocation2 + $0x150] sm:$0xff]  ;;  %v850_v27 = vld [vmem:[#allocation2 + $0x148] sm:$0xff] }
 0x5db   :  { %v543_v36 = vadd.f32 %v4006_v20, %v542_v31  ;;  %v848_v31 = vld [vmem:[#allocation2 + $0x138] sm:$0xff] }
 0x5dc   :  { %v4008_v28 = vpop.eup %4007 }
 0x5dd   :  { %v555_v32 = vmul.f32 %v4008_v28, %v538_v10  ;;  %v547_v40 = vsel %vm546_vm10, %v4006_v20, %v543_v36  ;;  %vm560_vm1 = vweird.f32 %v4008_v28 }
 0x5de   :  { %v552_v44 = vsel %vm549_vm15, %v551_v43, %v547_v40  ;;  %vm561_vm5 = vmor %vm559_vm4, %vm560_vm1 }
 0x5df   :  { %v556_v33 = vsub.f32 1.0, %v555_v32  ;;  %v553_v29 = vmul.f32 %v4378_v23, %v552_v44 }
 0x5e1   :  { %v557_v42 = vmul.f32 %v4008_v28, %v556_v33 }
 0x5e3   :  { %v558_v19 = vadd.f32 %v4008_v28, %v557_v42 }
 0x5e5   :  { %v562_v51 = vsel %vm561_vm5, %v4008_v28, %v558_v19  ;;  %v849_v28 = vld [vmem:[#allocation2 + $0x140] sm:$0xff] }
 0x5e6   :  { %v567_v53 = vsel %vm564_vm6, %v566_v52, %v562_v51  ;;  %v3934_v51 = vld [vmem:[#allocation2 + $0x128] ss:$0 sm:$0xff] }
 0x5e7   :  { %v568_v54 = vmul.f32 %v4382_v24, %v567_v53 }
 0x5e8   :  { %v572_v45 = vpop.permute.xlu0 %571 }
 0x5e9   :  { %3751 = vmatpush.msk.msrb.mxu3 %vm325_vm14, %v572_v45 }
 0x5eb   :  { %597 = vmatpush.msrb.mxu3 %v4389_v55 }
 0x5ec   :  { %3752 = vmatmul.msk.f32.vlgmr.msrb.gmra.mxu3 %vm264_vm12, %v553_v29 }
 0x5ed   :  { %872 = vmatpush.msra.mxu3 %v851_v26 }
 0x5ef   :  { %873 = vmatpush.msra.mxu3 %v850_v27 }
 0x5f1   :  { %874 = vmatpush.msra.mxu3 %v849_v28  ;;  %v3937_v28 = vld [vmem:[#allocation2 + $0x1a0] ss:$0 sm:$0xff] }
 0x5f3   :  { %875 = vmatpush.msra.mxu3 %v848_v31 }
 0x5f4   :  { %3753 = vmatmul.msk.f32.gmra.mxu3 %vm264_vm12, %v568_v54 }
 0x62b   :  { %v472_v56 = vpop.f32.mrf.mxu1 }
 0x62c   :  { %734 = vrot.lane.b32.xlu0 %v472_v56, %s4191_s18  ;;  %v3935_v56 = vld [vmem:[#allocation2 + $0x130] ss:$0 sm:$0xff] }
 0x633   :  { %v475_v57 = vpop.f32.mrf.mxu1 }
 0x634   :  { %736 = vrot.lane.b32.xlu0 %v475_v57, %s4191_s18 }
 0x63b   :  { %v726_v23 = vpop.f32.mrf.mxu1 }
 0x63c   :  { %750 = vrot.lane.b32.xlu1 %v726_v23, %s4204_s9 }
 0x656   :  { %v729_v55 = vpop.f32.mrf.mxu1 }
 0x657   :  { %752 = vrot.lane.b32.xlu1 %v729_v55, %s4204_s9 }
 0x66f   :  { %v599_v58 = vpop.f32.mrf.mxu3 }
 0x670   :  { %742 = vrot.lane.b32.xlu2 %v599_v58, %s4205_s10 }
 0x677   :  { %v602_v24 = vpop.f32.mrf.mxu3 }
 0x678   :  { %744 = vrot.lane.b32.xlu2 %v602_v24, %s4205_s10 }
 0x69e   :  { %v735_v63 = vpop.permute.xlu0 %734 }
 0x69f   :  { %v756_v0 = vsel %vm228_vm11, %v4342_v49, %v735_v63  ;;  %v3933_v49 = vld [vmem:[#allocation2 + $0x110] ss:$0 sm:$0xff]  ;;  %v908_v63 = vld [vmem:[#allocation2 + $0x198] sm:$0xff] }
 0x6a0   :  { %923 = vmatpush.msra.mxu0 %v908_v63 }
 0x6a6   :  { %v737_v3 = vpop.permute.xlu0 %736 }
 0x6a7   :  { %v757_v5 = vsel %vm228_vm11, %v4344_v50, %v737_v3  ;;  %v902_v3 = vld [vmem:[#allocation2 + $0x168] sm:$0xff] }
 0x6ae   :  { %v751_v2 = vpop.permute.xlu1 %750 }
 0x6c9   :  { %v753_v7 = vpop.permute.xlu1 %752 }
 0x6ca   :  { %v743_v1 = vpop.permute.xlu2 %742 }
 0x6cb   :  { %v759_v35 = vsel %vm758_vm7, %v756_v0, %v743_v1  ;;  %v907_v0 = vld [vmem:[#allocation2 + $0x190] sm:$0xff]  ;;  %v906_v1 = vld [vmem:[#allocation2 + $0x188] sm:$0xff] }
 0x6cc   :  { %v762_v4 = vsel %vm761_vm8, %v759_v35, %v751_v2  ;;  %924 = vmatpush.msra.mxu0 %v907_v0  ;;  %v905_v2 = vld [vmem:[#allocation2 + $0x180] sm:$0xff]  ;;  %v904_v35 = vld [vmem:[#allocation2 + $0x178] sm:$0xff] }
 0x6cd   :  { %3761 = vmatmul.msk.f32.vlgmr.msrb.gmra.mxu2 %vm123_vm2, %v762_v4  ;;  %v903_v4 = vld [vmem:[#allocation2 + $0x170] sm:$0xff] }
 0x6ce   :  { %925 = vmatpush.msra.mxu0 %v906_v1 }
 0x6d0   :  { %926 = vmatpush.msra.mxu0 %v905_v2 }
 0x6d2   :  { %v745_v41 = vpop.permute.xlu2 %744  ;;  %927 = vmatpush.msra.mxu0 %v904_v35 }
 0x6d3   :  { %v760_v8 = vsel %vm758_vm7, %v757_v5, %v745_v41  ;;  %v901_v5 = vld [vmem:[#allocation2 + $0x160] sm:$0xff]  ;;  %v3936_v41 = vld [vmem:[#allocation2 + $0x158] ss:$0 sm:$0xff] }
 0x6d4   :  { %v763_v9 = vsel %vm761_vm8, %v760_v8, %v753_v7  ;;  %928 = vmatpush.msra.mxu0 %v903_v4  ;;  %v3938_v4 = vld [vmem:[#allocation2 + $0x1f8] ss:$0 sm:$0xff] }
 0x6d5   :  { %3762 = vmatmul.msk.f32.gmra.mxu2 %vm123_vm2, %v763_v9 }
 0x6d6   :  { %929 = vmatpush.msra.mxu0 %v902_v3 }
 0x6d8   :  { %930 = vmatpush.msra.mxu0 %v901_v5 }
 0x750   :  { %v788_v11 = vpop.f32.mrf.mxu2 }
 0x751   :  { %v789_v12 = vadd.f32 %v3933_v49, %v788_v11 }
 0x753   :  { %v4423_v13 = vadd.f32 %v789_v12, %v4245_v34 }
 0x755   :  { %v798_v6 = vsel %vm123_vm2, %v4423_v13, 0.0 }
 0x756   :  { %799 = vadd.xlane.f32.xlu0 %v798_v6 }
 0x758   :  { %v791_v14 = vpop.f32.mrf.mxu2 }
 0x759   :  { %v792_v50 = vadd.f32 %v3933_v49, %v791_v14 }
 0x75b   :  { %v4428_v15 = vadd.f32 %v792_v50, %v4249_v39 }
 0x75d   :  { %v801_v16 = vsel %vm127_vm3, %v4428_v15, 0.0 }
 0x75e   :  { %802 = vadd.xlane.f32.xlu2 %v801_v16 }
 0x7c9   :  { %v800_v17 = vpop.xlane.xlu0 %799 }
 0x7ca   :  { %v804_v18 = vmul.f32 %v800_v17, %v4253_v47 }
 0x7cc   :  { %v806_v20 = vsub.f32 %v4423_v13, %v804_v18 }
 0x7ce   :  { %v808_v34 = vmul.f32 %v806_v20, %v806_v20 }
 0x7d0   :  { %v810_v21 = vsel %vm123_vm2, %v808_v34, 0.0 }
 0x7d1   :  { %v803_v22 = vpop.xlane.xlu2 %802  ;;  %811 = vadd.xlane.f32.xlu1 %v810_v21 }
 0x7d2   :  { %v805_v10 = vmul.f32 %v803_v22, %v4253_v47 }
 0x7d4   :  { %v807_v30 = vsub.f32 %v4428_v15, %v805_v10 }
 0x7d6   :  { %v809_v39 = vmul.f32 %v807_v30, %v807_v30 }
 0x7d8   :  { %v813_v25 = vsel %vm127_vm3, %v809_v39, 0.0 }
 0x7d9   :  { %814 = vadd.xlane.f32.xlu2 %v813_v25 }
 0x844   :  { %v812_v32 = vpop.xlane.xlu1 %811 }
 0x845   :  { %v816_v33 = vmul.f32 %v812_v32, %v4253_v47 }
 0x847   :  { %v818_v36 = vadd.f32 1e-12, %v816_v33 }
 0x849   :  { %4009 = vrsqrt.f32 %v818_v36  ;;  %vm826_vm10 = vweird.f32 %v818_v36 }
 0x84c   :  { %v815_v37 = vpop.xlane.xlu2 %814 }
 0x84d   :  { %v817_v38 = vmul.f32 %v815_v37, %v4253_v47 }
 0x84f   :  { %v4010_v40 = vpop.eup %4009  ;;  %v819_v42 = vadd.f32 1e-12, %v817_v38 }
 0x850   :  { %v821_v43 = vmul.f32 %v4010_v40, %v818_v36  ;;  %vm827_vm9 = vweird.f32 %v4010_v40 }
 0x851   :  { %4011 = vrsqrt.f32 %v819_v42  ;;  %vm828_vm15 = vmor %vm826_vm10, %vm827_vm9  ;;  %vm836_vm4 = vweird.f32 %v819_v42 }
 0x852   :  { %v822_v44 = vmul.f32 %v4010_v40, %v821_v43 }
 0x854   :  { %v823_v45 = vmul.f32 0.5, %v822_v44 }
 0x856   :  { %v824_v19 = vsub.f32 1.5, %v823_v45 }
 0x857   :  { %v4012_v46 = vpop.eup %4011 }
 0x858   :  { %v825_v29 = vmul.f32 %v4010_v40, %v824_v19  ;;  %v831_v48 = vmul.f32 %v4012_v46, %v819_v42  ;;  %vm837_vm1 = vweird.f32 %v4012_v46 }
 0x859   :  { %vm838_vm5 = vmor %vm836_vm4, %vm837_vm1 }
 0x85a   :  { %v829_v52 = vsel %vm828_vm15, %v4010_v40, %v825_v29  ;;  %v832_v53 = vmul.f32 %v4012_v46, %v831_v48 }
 0x85b   :  { %v840_v54 = vmul.f32 %v829_v52, %v806_v20  ;;  %v999_v52 = vld [vmem:[#allocation2 + $0x1c0] sm:$0xff] }
 0x85c   :  { %v833_v57 = vmul.f32 0.5, %v832_v53  ;;  %1025 = vmatpush.msra.mxu1 %v999_v52  ;;  %v998_v53 = vld [vmem:[#allocation2 + $0x1b8] sm:$0xff] }
 0x85d   :  { %v843_v23 = vmul.f32 %v3934_v51, %v840_v54  ;;  %v997_v54 = vld [vmem:[#allocation2 + $0x1b0] sm:$0xff] }
 0x85e   :  { %v834_v55 = vsub.f32 1.5, %v833_v57  ;;  %1026 = vmatpush.msra.mxu1 %v998_v53 }
 0x85f   :  { %v846_v58 = vadd.f32 %v3935_v56, %v843_v23 }
 0x860   :  { %v835_v24 = vmul.f32 %v4012_v46, %v834_v55  ;;  %1027 = vmatpush.msra.mxu1 %v997_v54 }
 0x861   :  { %3763 = vmatmul.msk.f32.vlgmr.msra.gmra.mxu3 %vm123_vm2, %v846_v58 }
 0x862   :  { %v839_v59 = vsel %vm838_vm5, %v4012_v46, %v835_v24 }
 0x863   :  { %v841_v60 = vmul.f32 %v839_v59, %v807_v30 }
 0x865   :  { %v844_v61 = vmul.f32 %v3934_v51, %v841_v60 }
 0x867   :  { %v847_v62 = vadd.f32 %v3935_v56, %v844_v61  ;;  %v996_v56 = vld [vmem:[#allocation2 + $0x1a8] sm:$0xff] }
 0x868   :  { %1028 = vmatpush.msra.mxu1 %v996_v56 }
 0x869   :  { %3764 = vmatmul.msk.f32.gmra.mxu3 %vm123_vm2, %v847_v62 }
 0x8e4   :  { %v877_v7 = vpop.f32.mrf.mxu3 }
 0x8e5   :  { %v878_v8 = vadd.f32 %v3936_v41, %v877_v7  ;;  %v3939_v7 = vld [vmem:[#allocation2 + $0x200] ss:$0 sm:$0xff] }
 0x8e7   :  { %v885_v9 = vmul.f32 0.044715, %v878_v8  ;;  %v883_v22 = vmul.f32 0.5, %v878_v8 }
 0x8e9   :  { %v887_v49 = vmul.f32 %v885_v9, %v878_v8 }
 0x8eb   :  { %v889_v11 = vmul.f32 %v887_v49, %v878_v8 }
 0x8ec   :  { %v880_v12 = vpop.f32.mrf.mxu3 }
 0x8ed   :  { %v891_v6 = vadd.f32 %v889_v11, %v878_v8  ;;  %v881_v14 = vadd.f32 %v3936_v41, %v880_v12 }
 0x8ef   :  { %v893_v50 = vmul.f32 0.7978846, %v891_v6  ;;  %v886_v16 = vmul.f32 0.044715, %v881_v14  ;;  %v884_v25 = vmul.f32 0.5, %v881_v14 }
 0x8f1   :  { %4013 = vtanh.f32 %v893_v50  ;;  %v888_v17 = vmul.f32 %v886_v16, %v881_v14 }
 0x8f3   :  { %v890_v18 = vmul.f32 %v888_v17, %v881_v14  ;;  %v3940_v17 = vld [vmem:[#allocation2 + $0x1c8] ss:$0 sm:$0xff] }
 0x8f5   :  { %v892_v20 = vadd.f32 %v890_v18, %v881_v14 }
 0x8f7   :  { %v4014_v34 = vpop.eup %4013  ;;  %v894_v21 = vmul.f32 0.7978846, %v892_v20 }
 0x8f8   :  { %v897_v10 = vadd.f32 1.0, %v4014_v34 }
 0x8f9   :  { %4015 = vtanh.f32 %v894_v21 }
 0x8fa   :  { %v899_v30 = vmul.f32 %v897_v10, %v883_v22 }
 0x8fc   :  { %3765 = vmatmul.msk.f32.vlgmr.msra.gmra.mxu0 %vm5066_vm0, %v899_v30 }
 0x8ff   :  { %v4016_v39 = vpop.eup %4015 }
 0x900   :  { %v898_v26 = vadd.f32 1.0, %v4016_v39 }
 0x902   :  { %v900_v27 = vmul.f32 %v898_v26, %v884_v25 }
 0x904   :  { %3766 = vmatmul.msk.f32.gmra.mxu0 %vm5066_vm0, %v900_v27 }
 0x979   :  { %v932_v31 = vpop.f32.mrf.mxu0 }
 0x97a   :  { %v938_v32 = vadd.f32 %v932_v31, %v4423_v13 }
 0x97c   :  { %v4445_v33 = vadd.f32 %v3937_v28, %v938_v32 }
 0x97e   :  { %v946_v36 = vsel %vm123_vm2, %v4445_v33, 0.0 }
 0x97f   :  { %947 = vadd.xlane.f32.xlu0 %v946_v36 }
 0x981   :  { %v935_v37 = vpop.f32.mrf.mxu0 }
 0x982   :  { %v939_v38 = vadd.f32 %v935_v37, %v4428_v15 }
 0x984   :  { %v4450_v40 = vadd.f32 %v3937_v28, %v939_v38 }
 0x986   :  { %v949_v42 = vsel %vm127_vm3, %v4450_v40, 0.0 }
 0x987   :  { %950 = vadd.xlane.f32.xlu1 %v949_v42 }
 0x9f2   :  { %v948_v43 = vpop.xlane.xlu0 %947 }
 0x9f3   :  { %v952_v44 = vmul.f32 %v948_v43, %v4253_v47 }
 0x9f5   :  { %v954_v13 = vsub.f32 %v4445_v33, %v952_v44 }
 0x9f7   :  { %v956_v45 = vmul.f32 %v954_v13, %v954_v13 }
 0x9f9   :  { %v958_v19 = vsel %vm123_vm2, %v956_v45, 0.0 }
 0x9fa   :  { %959 = vadd.xlane.f32.xlu2 %v958_v19  ;;  %v951_v46 = vpop.xlane.xlu1 %950  ;;  %v4159_v19 = vld [vmem:[#allocation2 + $0x618] sm:$0xff] }
 0x9fb   :  { %v953_v29 = vmul.f32 %v951_v46, %v4253_v47 }
 0x9fd   :  { %v955_v15 = vsub.f32 %v4450_v40, %v953_v29 }
 0x9ff   :  { %v957_v48 = vmul.f32 %v955_v15, %v955_v15 }
 0xa01   :  { %v961_v51 = vsel %vm127_vm3, %v957_v48, 0.0 }
 0xa02   :  { %962 = vadd.xlane.f32.xlu0 %v961_v51 }
 0xa6d   :  { %v960_v57 = vpop.xlane.xlu2 %959 }
 0xa6e   :  { %v964_v23 = vmul.f32 %v960_v57, %v4253_v47  ;;  %v4160_v57 = vld [vmem:[#allocation2 + $0x620] sm:$0x3] }
 0xa70   :  { %v966_v55 = vadd.f32 1e-12, %v964_v23 }
 0xa72   :  { %4017 = vrsqrt.f32 %v966_v55  ;;  %vm974_vm9 = vweird.f32 %v966_v55 }
 0xa75   :  { %v963_v58 = vpop.xlane.xlu0 %962 }
 0xa76   :  { %v965_v24 = vmul.f32 %v963_v58, %v4253_v47 }
 0xa78   :  { %v4018_v59 = vpop.eup %4017  ;;  %v967_v60 = vadd.f32 1e-12, %v965_v24 }
 0xa79   :  { %v969_v61 = vmul.f32 %v4018_v59, %v966_v55  ;;  %vm975_vm6 = vweird.f32 %v4018_v59 }
 0xa7a   :  { %4019 = vrsqrt.f32 %v967_v60  ;;  %vm976_vm10 = vmor %vm974_vm9, %vm975_vm6  ;;  %vm984_vm1 = vweird.f32 %v967_v60 }
 0xa7b   :  { %v970_v62 = vmul.f32 %v4018_v59, %v969_v61 }
 0xa7d   :  { %v971_v63 = vmul.f32 0.5, %v970_v62 }
 0xa7f   :  { %v972_v0 = vsub.f32 1.5, %v971_v63 }
 0xa80   :  { %v4020_v1 = vpop.eup %4019 }
 0xa81   :  { %v973_v2 = vmul.f32 %v4018_v59, %v972_v0  ;;  %v979_v35 = vmul.f32 %v4020_v1, %v967_v60  ;;  %vm985_vm15 = vweird.f32 %v4020_v1 }
 0xa82   :  { %vm986_vm4 = vmor %vm984_vm1, %vm985_vm15 }
 0xa83   :  { %v977_v3 = vsel %vm976_vm10, %v4018_v59, %v973_v2  ;;  %v980_v5 = vmul.f32 %v4020_v1, %v979_v35 }
 0xa84   :  { %v988_v41 = vmul.f32 %v977_v3, %v954_v13 }
 0xa85   :  { %v981_v8 = vmul.f32 0.5, %v980_v5 }
 0xa86   :  { %v991_v9 = vmul.f32 %v3938_v4, %v988_v41 }
 0xa87   :  { %v982_v49 = vsub.f32 1.5, %v981_v8 }
 0xa88   :  { %v994_v11 = vadd.f32 %v3939_v7, %v991_v9 }
 0xa89   :  { %v983_v12 = vmul.f32 %v4020_v1, %v982_v49 }
 0xa8a   :  { %3767 = vmatmul.msk.f32.vlgmr.msra.gmra.mxu1 %vm123_vm2, %v994_v11 }
 0xa8b   :  { %v987_v6 = vsel %vm986_vm4, %v4020_v1, %v983_v12 }
 0xa8c   :  { %v989_v14 = vmul.f32 %v987_v6, %v955_v15 }
 0xa8e   :  { %v992_v50 = vmul.f32 %v3938_v4, %v989_v14 }
 0xa90   :  { %v995_v16 = vadd.f32 %v3939_v7, %v992_v50 }
 0xa92   :  { %3768 = vmatmul.msk.f32.gmra.mxu1 %vm123_vm2, %v995_v16 }
 0xb07   :  { %v1030_v18 = vpop.f32.mrf.mxu1 }
 0xb08   :  { %v4464_v20 = vadd.f32 %v3940_v17, %v1030_v18 }
 0xb0a   :  { %1038 = vrot.lane.b32.xlu2 %v4464_v20, %s4193_s0 }
 0xb0f   :  { %v1033_v34 = vpop.f32.mrf.mxu1 }
 0xb10   :  { %v4468_v21 = vadd.f32 %v3940_v17, %v1033_v34 }
 0xb12   :  { %1161 = vrot.lane.b32.xlu2 %v4464_v20, %s4198_s30  ;;  %1167 = vrot.lane.b32.xlu0 %v4468_v21, %s4195_s27 }
 0xb13   :  { %1040 = vrot.lane.b32.xlu1 %v4468_v21, %s4193_s0 }
 0xb1a   :  { %1163 = vrot.lane.b32.xlu2 %v4468_v21, %s4198_s30  ;;  %1165 = vrot.lane.b32.xlu0 %v4464_v20, %s4195_s27 }
 0xb1b   :  { %1294 = vrot.lane.b32.xlu1 %v4468_v21, %s4196_s28 }
 0xb22   :  { %1419 = vrot.lane.b32.xlu2 %v4464_v20, %s4199_s4  ;;  %1288 = vrot.lane.b32.xlu0 %v4464_v20, %s4197_s29 }
 0xb23   :  { %1292 = vrot.lane.b32.xlu1 %v4464_v20, %s4196_s28 }
 0xb2a   :  { %1290 = vrot.lane.b32.xlu0 %v4468_v21, %s4197_s29 }
 0xb2b   :  { %1421 = vrot.lane.b32.xlu1 %v4468_v21, %s4199_s4 }
 0xb32   :  { %1417 = vrot.lane.b32.xlu0 %v4468_v21, %s4200_s5 }
 0xb33   :  { %1415 = vrot.lane.b32.xlu1 %v4464_v20, %s4200_s5 }
 0xb3b   :  { %1127 = vrot.lane.b32.xlu1 %v4468_v21, %s4194_s26 }
 0xb64   :  { %v1039_v22 = vpop.permute.xlu2 %1038 }
 0xb6c   :  { %v1162_v25 = vpop.permute.xlu2 %1161 }
 0xb74   :  { %v1164_v28 = vpop.permute.xlu2 %1163 }
 0xb7c   :  { %v1420_v36 = vpop.permute.xlu2 %1419 }
 0xb84   :  { %v1168_v10 = vpop.permute.xlu0 %1167 }
 0xb85   :  { %v1041_v30 = vpop.permute.xlu1 %1040  ;;  %3776 = vmatpush.xpose.msk.msrb.mxu0 %vm228_vm11, %v1168_v10 }
 0xb86   :  { %3769 = vmatpush.xpose.msk.msra.mxu2 %vm228_vm11, %v1041_v30 }
 0xb8a   :  { %3770 = vmatpush.xpose.msk.msra.mxu2 %vm228_vm11, %v1039_v22 }
 0xb8c   :  { %v1166_v39 = vpop.permute.xlu0 %1165 }
 0xb8d   :  { %3771 = vmatmul.msk.f32.vlgmr.msra.gmra.mxu2 %vm228_vm11, %v4464_v20  ;;  %v1295_v26 = vpop.permute.xlu1 %1294  ;;  %3777 = vmatpush.xpose.msk.msrb.mxu0 %vm228_vm11, %v1166_v39 }
 0xb8e   :  { %3783 = vmatpush.xpose.msk.msrb.mxu2 %vm228_vm11, %v1295_v26 }
 0xb90   :  { %3778 = vmatmul.msk.f32.vlgmr.msrb.gmra.mxu0 %vm228_vm11, %v1162_v25 }
 0xb94   :  { %v1289_v31 = vpop.permute.xlu0 %1288 }
 0xb95   :  { %3772 = vmatmul.msk.f32.gmra.mxu2 %vm228_vm11, %v4468_v21  ;;  %v1293_v27 = vpop.permute.xlu1 %1292 }
 0xb96   :  { %3784 = vmatpush.xpose.msk.msrb.mxu2 %vm228_vm11, %v1293_v27 }
 0xb98   :  { %3779 = vmatmul.msk.f32.gmra.mxu0 %vm228_vm11, %v1164_v28 }
 0xb9c   :  { %v1291_v37 = vpop.permute.xlu0 %1290 }
 0xb9d   :  { %3785 = vmatmul.msk.f32.vlgmr.msrb.gmra.mxu2 %vm228_vm11, %v1289_v31  ;;  %v1422_v32 = vpop.permute.xlu1 %1421 }
 0xb9e   :  { %3790 = vmatpush.xpose.msk.msra.mxu0 %vm228_vm11, %v1422_v32 }
 0xba2   :  { %3791 = vmatpush.xpose.msk.msra.mxu0 %vm228_vm11, %v1420_v36 }
 0xba4   :  { %v1418_v42 = vpop.permute.xlu0 %1417 }
 0xba5   :  { %3786 = vmatmul.msk.f32.gmra.mxu2 %vm228_vm11, %v1291_v37  ;;  %v1416_v38 = vpop.permute.xlu1 %1415 }
 0xba6   :  { %3792 = vmatmul.msk.f32.vlgmr.msra.gmra.mxu0 %vm228_vm11, %v1416_v38 }
 0xbad   :  { %v1128_v43 = vpop.permute.xlu1 %1127 }
 0xbae   :  { %3773 = vmatpush.msk.msrb.mxu3 %vm325_vm14, %v1128_v43  ;;  %3793 = vmatmul.msk.f32.gmra.mxu0 %vm228_vm11, %v1418_v42 }
 0xc0d   :  { %v1194_v44 = vpop.f32.mrf.mxu0 }
 0xc0e   :  { %v1200_v13 = vmul.f32 0.35355338, %v1194_v44 }
 0xc10   :  { %v1067_v45 = vpop.f32.mrf.mxu2  ;;  %v1202_v46 = vadd.f32 %v4159_v19, %v1200_v13 }
 0xc11   :  { %v1073_v29 = vmul.f32 0.35355338, %v1067_v45 }
 0xc12   :  { %v1204_v15 = vsel %vm264_vm12, %v1202_v46, -inf }
 0xc13   :  { %1205 = vmax.xlane.f32.xlu1 %v1204_v15  ;;  %v1075_v48 = vadd.f32 %v4159_v19, %v1073_v29 }
 0xc15   :  { %v1197_v51 = vpop.f32.mrf.mxu0  ;;  %v1077_v52 = vsel %vm264_vm12, %v1075_v48, -inf }
 0xc16   :  { %v1201_v53 = vmul.f32 0.35355338, %v1197_v51  ;;  %1078 = vmax.xlane.f32.xlu2 %v1077_v52 }
 0xc18   :  { %v1070_v54 = vpop.f32.mrf.mxu2  ;;  %v1203_v23 = vadd.f32 %v4160_v57, %v1201_v53 }
 0xc19   :  { %v1074_v56 = vmul.f32 0.35355338, %v1070_v54 }
 0xc1a   :  { %v1207_v58 = vsel %vm268_vm13, %v1203_v23, -inf }
 0xc1b   :  { %v1076_v55 = vadd.f32 %v4160_v57, %v1074_v56 }
 0xc1d   :  { %v1080_v24 = vsel %vm268_vm13, %v1076_v55, -inf }
 0xc1e   :  { %1208 = vmax.xlane.f32.xlu2 %v1207_v58  ;;  %1081 = vmax.xlane.f32.xlu0 %v1080_v24 }
 0xc20   :  { %v1321_v59 = vpop.f32.mrf.mxu2 }
 0xc21   :  { %v1327_v60 = vmul.f32 0.35355338, %v1321_v59 }
 0xc23   :  { %v1448_v61 = vpop.f32.mrf.mxu0  ;;  %v1329_v62 = vadd.f32 %v4159_v19, %v1327_v60 }
 0xc24   :  { %v1454_v63 = vmul.f32 0.35355338, %v1448_v61 }
 0xc25   :  { %v1331_v0 = vsel %vm264_vm12, %v1329_v62, -inf }
 0xc26   :  { %1332 = vmax.xlane.f32.xlu1 %v1331_v0  ;;  %v1456_v1 = vadd.f32 %v4159_v19, %v1454_v63 }
 0xc28   :  { %v1324_v2 = vpop.f32.mrf.mxu2  ;;  %v1458_v35 = vsel %vm264_vm12, %v1456_v1, -inf }
 0xc29   :  { %v1328_v4 = vmul.f32 0.35355338, %v1324_v2  ;;  %1459 = vmax.xlane.f32.xlu0 %v1458_v35 }
 0xc2b   :  { %v1451_v3 = vpop.f32.mrf.mxu0  ;;  %v1330_v5 = vadd.f32 %v4160_v57, %v1328_v4 }
 0xc2c   :  { %v1455_v41 = vmul.f32 0.35355338, %v1451_v3 }
 0xc2d   :  { %v1334_v7 = vsel %vm268_vm13, %v1330_v5, -inf }
 0xc2e   :  { %1335 = vmax.xlane.f32.xlu2 %v1334_v7  ;;  %v1457_v8 = vadd.f32 %v4160_v57, %v1455_v41 }
 0xc30   :  { %v1461_v9 = vsel %vm268_vm13, %v1457_v8, -inf }
 0xc31   :  { %1462 = vmax.xlane.f32.xlu1 %v1461_v9 }
 0xc86   :  { %v1206_v49 = vpop.xlane.xlu1 %1205 }
 0xc87   :  { %v1210_v11 = vsub.f32 %v1202_v46, %v1206_v49 }
 0xc89   :  { %v1212_v12 = vmul.f32 1.442695, %v1210_v11  ;;  %v1079_v6 = vpop.xlane.xlu2 %1078 }
 0xc8a   :  { %v1083_v14 = vsub.f32 %v1075_v48, %v1079_v6 }
 0xc8b   :  { %4021 = vpow2.f32 %v1212_v12 }
 0xc8c   :  { %v1085_v50 = vmul.f32 1.442695, %v1083_v14 }
 0xc8e   :  { %4023 = vpow2.f32 %v1085_v50 }
 0xc91   :  { %v4525_v16 = vpop.eup %4021  ;;  %v1209_v17 = vpop.xlane.xlu2 %1208 }
 0xc92   :  { %v1082_v18 = vpop.xlane.xlu0 %1081  ;;  %v1211_v34 = vsub.f32 %v1203_v23, %v1209_v17  ;;  %v1216_v10 = vsel %vm264_vm12, %v4525_v16, 0.0 }
 0xc93   :  { %v1084_v22 = vsub.f32 %v1076_v55, %v1082_v18  ;;  %1217 = vadd.xlane.f32.xlu2 %v1216_v10 }
 0xc94   :  { %v4529_v30 = vpop.eup %4023  ;;  %v1214_v39 = vmul.f32 1.442695, %v1211_v34 }
 0xc95   :  { %v1087_v25 = vmul.f32 1.442695, %v1084_v22  ;;  %v1089_v26 = vsel %vm264_vm12, %v4529_v30, 0.0 }
 0xc96   :  { %4025 = vpow2.f32 %v1214_v39  ;;  %1090 = vadd.xlane.f32.xlu0 %v1089_v26 }
 0xc97   :  { %4027 = vpow2.f32 %v1087_v25 }
 0xc99   :  { %v1333_v38 = vpop.xlane.xlu1 %1332 }
 0xc9a   :  { %v1337_v44 = vsub.f32 %v1329_v62, %v1333_v38 }
 0xc9c   :  { %v4533_v27 = vpop.eup %4025  ;;  %v1460_v36 = vpop.xlane.xlu0 %1459  ;;  %v1339_v45 = vmul.f32 1.442695, %v1337_v44 }
 0xc9d   :  { %v4535_v28 = vpop.eup %4027  ;;  %v1219_v31 = vsel %vm268_vm13, %v4533_v27, 0.0  ;;  %v1464_v37 = vsub.f32 %v1456_v1, %v1460_v36 }
 0xc9e   :  { %1220 = vadd.xlane.f32.xlu0 %v1219_v31  ;;  %v1092_v32 = vsel %vm268_vm13, %v4535_v28, 0.0 }
 0xc9f   :  { %1093 = vadd.xlane.f32.xlu1 %v1092_v32  ;;  %v1466_v42 = vmul.f32 1.442695, %v1464_v37 }
 0xca1   :  { %v1336_v43 = vpop.xlane.xlu2 %1335  ;;  %4029 = vpow2.f32 %v1466_v42 }
 0xca2   :  { %v1338_v13 = vsub.f32 %v1330_v5, %v1336_v43  ;;  %4031 = vpow2.f32 %v1339_v45 }
 0xca4   :  { %v1463_v19 = vpop.xlane.xlu1 %1462  ;;  %v1341_v46 = vmul.f32 1.442695, %v1338_v13 }
 0xca5   :  { %v1465_v15 = vsub.f32 %v1457_v8, %v1463_v19 }
 0xca6   :  { %4033 = vpow2.f32 %v1341_v46 }
 0xca7   :  { %v4547_v29 = vpop.eup %4029  ;;  %v1468_v51 = vmul.f32 1.442695, %v1465_v15 }
 0xca8   :  { %v1470_v48 = vsel %vm264_vm12, %v4547_v29, 0.0  ;;  %v4551_v52 = vpop.eup %4031 }
 0xca9   :  { %4035 = vpow2.f32 %v1468_v51  ;;  %v1343_v56 = vsel %vm264_vm12, %v4551_v52, 0.0 }
 0xcab   :  { %1254 = vrot.lane.b32.xlu2 %v4468_v21, %s4201_s6 }
 0xcac   :  { %v4553_v53 = vpop.eup %4033 }
 0xcad   :  { %v1346_v54 = vsel %vm268_vm13, %v4553_v53, 0.0 }
 0xcaf   :  { %v4559_v57 = vpop.eup %4035 }
 0xcb0   :  { %v1473_v23 = vsel %vm268_vm13, %v4559_v57, 0.0 }
 0xcb2   :  { %1125 = vrot.lane.b32.xlu0 %v4464_v20, %s4194_s26 }
 0xcb8   :  { %1252 = vrot.lane.b32.xlu1 %v4464_v20, %s4201_s6 }
 0xcd4   :  { %1471 = vadd.xlane.f32.xlu2 %v1470_v48 }
 0xcdc   :  { %1347 = vadd.xlane.f32.xlu0 %v1346_v54  ;;  %1344 = vadd.xlane.f32.xlu2 %v1343_v56 }
 0xce2   :  { %1474 = vadd.xlane.f32.xlu1 %v1473_v23 }
 0xcf4   :  { %1381 = vrot.lane.b32.xlu2 %v4468_v21, %s4202_s7 }
 0xcfc   :  { %1379 = vrot.lane.b32.xlu2 %v4464_v20, %s4202_s7 }
 0xd04   :  { %1508 = vrot.lane.b32.xlu2 %v4468_v21, %s4203_s8 }
 0xd06   :  { %v1218_v55 = vpop.xlane.xlu2 %1217 }
 0xd07   :  { %v1233_v50 = vand.u32 2147483648, %v1218_v55  ;;  %vm1227_vm15 = vweird.f32 %v1218_v55  ;;  %v1231_v18 = vand.u32 2147483647, %v1218_v55 }
 0xd09   :  { %v1091_v58 = vpop.xlane.xlu0 %1090  ;;  %v1234_v36 = vor.u32 1.1754944e-38, %v1233_v50 }
 0xd0a   :  { %4037 = vrcp.f32 %v1091_v58  ;;  %vm1100_vm5 = vweird.f32 %v1091_v58  ;;  %v1106_v5 = vand.u32 2147483648, %v1091_v58  ;;  %v1104_v7 = vand.u32 2147483647, %v1091_v58 }
 0xd0b   :  { %4039 = vrcp.f32 %v1218_v55 }
 0xd0c   :  { %1506 = vrot.lane.b32.xlu2 %v4464_v20, %s4203_s8  ;;  %v1107_v12 = vor.u32 1.1754944e-38, %v1106_v5  ;;  %vm1105_vm10 = vcmp.eq.f32.partialorder %v1104_v7, 8.507059e+37 }
 0xd0e   :  { %v1255_v24 = vpop.permute.xlu2 %1254 }
 0xd0f   :  { %3780 = vmatpush.msk.msrb.mxu1 %vm325_vm14, %v1255_v24 }
 0xd10   :  { %v4038_v59 = vpop.eup %4037 }
 0xd11   :  { %v4040_v60 = vpop.eup %4039  ;;  %v1096_v61 = vmul.f32 %v4038_v59, %v1091_v58  ;;  %v4572_v62 = vpop.xlane.xlu0 %1220  ;;  %vm1101_vm13 = vweird.f32 %v4038_v59 }
 0xd12   :  { %4041 = vrcp.f32 %v4572_v62  ;;  %v1094_v63 = vpop.xlane.xlu1 %1093  ;;  %v1223_v21 = vmul.f32 %v4040_v60, %v1218_v55  ;;  %vm1102_vm6 = vmor %vm1100_vm5, %vm1101_vm13  ;;  %vm1228_vm9 = vweird.f32 %v4040_v60  ;;  %vm1232_vm5 = vcmp.eq.f32.partialorder %v1231_v18, 8.507059e+37 }
 0xd13   :  { %v1097_v0 = vsub.f32 1.0, %v1096_v61  ;;  %4043 = vrcp.f32 %v1094_v63  ;;  %vm4576_vm4 = vmor %vm1227_vm15, %vm1228_vm9  ;;  %vm1115_vm0 = vweird.f32 %v1094_v63  ;;  %v1121_v10 = vand.u32 2147483648, %v1094_v63 }
 0xd14   :  { %v1224_v35 = vsub.f32 1.0, %v1223_v21  ;;  %v1119_v32 = vand.u32 2147483647, %v1094_v63  ;;  %v1248_v44 = vand.u32 2147483648, %v4572_v62  ;;  %v1246_v19 = vand.u32 2147483647, %v4572_v62 }
 0xd15   :  { %v1098_v1 = vmul.f32 %v4038_v59, %v1097_v0  ;;  %v1122_v38 = vor.u32 1.1754944e-38, %v1121_v10 }
 0xd16   :  { %v1225_v41 = vmul.f32 %v4040_v60, %v1224_v35  ;;  %v1249_v48 = vor.u32 1.1754944e-38, %v1248_v44  ;;  %vm1247_vm15 = vcmp.eq.f32.partialorder %v1246_v19, 8.507059e+37 }
 0xd17   :  { %v1099_v3 = vadd.f32 %v4038_v59, %v1098_v1 }
 0xd18   :  { %v4042_v2 = vpop.eup %4041  ;;  %v1226_v6 = vadd.f32 %v4040_v60, %v1225_v41 }
 0xd19   :  { %v4044_v4 = vpop.eup %4043  ;;  %v1238_v8 = vmul.f32 %v4042_v2, %v4572_v62  ;;  %v1103_v49 = vsel %vm1102_vm6, %v4038_v59, %v1099_v3  ;;  %vm1120_vm6 = vcmp.eq.f32.partialorder %v1119_v32, 8.507059e+37  ;;  %vm1243_vm9 = vweird.f32 %v4042_v2 }
 0xd1a   :  { %v1111_v20 = vmul.f32 %v4044_v4, %v1094_v63  ;;  %v1108_v17 = vsel %vm1105_vm10, %v1107_v12, %v1103_v49  ;;  %vm1116_vm1 = vweird.f32 %v4044_v4  ;;  %v1230_v39 = vsel %vm4576_vm4, %v4040_v60, %v1226_v6 }
 0xd1b   :  { %v1239_v14 = vsub.f32 1.0, %v1238_v8  ;;  %v1109_v31 = vmul.f32 %v4529_v30, %v1108_v17  ;;  %vm1117_vm13 = vmor %vm1115_vm0, %vm1116_vm1  ;;  %v1235_v42 = vsel %vm1232_vm5, %v1234_v36, %v1230_v39  ;;  %vm1242_vm10 = vweird.f32 %v4572_v62 }
 0xd1c   :  { %v1112_v9 = vsub.f32 1.0, %v1111_v20  ;;  %v1236_v30 = vmul.f32 %v4525_v16, %v1235_v42  ;;  %vm1244_vm0 = vmor %vm1242_vm10, %vm1243_vm9 }
 0xd1d   :  { %v1240_v25 = vmul.f32 %v4042_v2, %v1239_v14 }
 0xd1e   :  { %v1113_v11 = vmul.f32 %v4044_v4, %v1112_v9 }
 0xd1f   :  { %v1241_v43 = vadd.f32 %v4042_v2, %v1240_v25 }
 0xd20   :  { %v1114_v34 = vadd.f32 %v4044_v4, %v1113_v11 }
 0xd21   :  { %v1245_v15 = vsel %vm1244_vm0, %v4042_v2, %v1241_v43 }
 0xd22   :  { %v1118_v37 = vsel %vm1117_vm13, %v4044_v4, %v1114_v34  ;;  %v1250_v51 = vsel %vm1247_vm15, %v1249_v48, %v1245_v15 }
 0xd23   :  { %v1123_v13 = vsel %vm1120_vm6, %v1122_v38, %v1118_v37  ;;  %v1251_v54 = vmul.f32 %v4533_v27, %v1250_v51 }
 0xd24   :  { %v1126_v26 = vpop.permute.xlu0 %1125  ;;  %v1124_v46 = vmul.f32 %v4535_v28, %v1123_v13 }
 0xd25   :  { %1153 = vmatpush.msrb.mxu3 %v1126_v26 }
 0xd26   :  { %3774 = vmatmul.msk.f32.vlgmr.msrb.gmra.mxu3 %vm264_vm12, %v1109_v31 }
 0xd2a   :  { %v1253_v45 = vpop.permute.xlu1 %1252 }
 0xd2b   :  { %1280 = vmatpush.msrb.mxu1 %v1253_v45 }
 0xd2c   :  { %3781 = vmatmul.msk.f32.vlgmr.msrb.gmra.mxu1 %vm264_vm12, %v1236_v30 }
 0xd2e   :  { %3775 = vmatmul.msk.f32.gmra.mxu3 %vm264_vm12, %v1124_v46 }
 0xd34   :  { %3782 = vmatmul.msk.f32.gmra.mxu1 %vm264_vm12, %v1251_v54  ;;  %v1004_v54 = vld [vmem:[#allocation2 + $0x1e8] sm:$0xff] }
 0xd35   :  { %1591 = vmatpush.msra.mxu2 %v1004_v54 }
 0xd47   :  { %v1472_v56 = vpop.xlane.xlu2 %1471 }
 0xd48   :  { %4045 = vrcp.f32 %v1472_v56  ;;  %v1487_v34 = vand.u32 2147483648, %v1472_v56  ;;  %v1485_v22 = vand.u32 2147483647, %v1472_v56 }
 0xd4a   :  { %v1488_v26 = vor.u32 1.1754944e-38, %v1487_v34  ;;  %v1657_v34 = vld [vmem:[#allocation2 + $0x220] sm:$0xff] }
 0xd4e   :  { %v4046_v55 = vpop.eup %4045 }
 0xd4f   :  { %v1348_v16 = vpop.xlane.xlu0 %1347  ;;  %v1345_v23 = vpop.xlane.xlu2 %1344  ;;  %v1477_v27 = vmul.f32 %v4046_v55, %v1472_v56  ;;  %vm1482_vm0 = vweird.f32 %v4046_v55 }
 0xd50   :  { %4047 = vrcp.f32 %v1348_v16  ;;  %v1360_v0 = vand.u32 2147483648, %v1345_v23  ;;  %v1358_v2 = vand.u32 2147483647, %v1345_v23  ;;  %vm1354_vm4 = vweird.f32 %v1345_v23 }
 0xd51   :  { %4049 = vrcp.f32 %v1345_v23  ;;  %v1478_v35 = vsub.f32 1.0, %v1477_v27  ;;  %v1375_v9 = vand.u32 2147483648, %v1348_v16  ;;  %vm1369_vm9 = vweird.f32 %v1348_v16 }
 0xd52   :  { %v1361_v20 = vor.u32 1.1754944e-38, %v1360_v0  ;;  %vm1359_vm5 = vcmp.eq.f32.partialorder %v1358_v2, 8.507059e+37  ;;  %v1373_v6 = vand.u32 2147483647, %v1348_v16 }
 0xd53   :  { %v1479_v8 = vmul.f32 %v4046_v55, %v1478_v35  ;;  %v1376_v17 = vor.u32 1.1754944e-38, %v1375_v9 }
 0xd54   :  { %vm1374_vm15 = vcmp.eq.f32.partialorder %v1373_v6, 8.507059e+37 }
 0xd55   :  { %v4593_v58 = vpop.xlane.xlu1 %1474  ;;  %v1480_v50 = vadd.f32 %v4046_v55, %v1479_v8 }
 0xd56   :  { %v4048_v28 = vpop.eup %4047  ;;  %4051 = vrcp.f32 %v4593_v58  ;;  %v1502_v37 = vand.u32 2147483648, %v4593_v58  ;;  %v1500_v43 = vand.u32 2147483647, %v4593_v58 }
 0xd57   :  { %v4050_v24 = vpop.eup %4049  ;;  %v1365_v59 = vmul.f32 %v4048_v28, %v1348_v16  ;;  %v1382_v60 = vpop.permute.xlu2 %1381  ;;  %vm1370_vm6 = vweird.f32 %v4048_v28  ;;  %v1002_v16 = vld [vmem:[#allocation2 + $0x1d8] sm:$0xff] }
 0xd58   :  { %v1350_v61 = vmul.f32 %v4050_v24, %v1345_v23  ;;  %3787 = vmatpush.msk.msra.mxu3 %vm325_vm14, %v1382_v60  ;;  %vm1355_vm1 = vweird.f32 %v4050_v24  ;;  %vm1371_vm10 = vmor %vm1369_vm9, %vm1370_vm6  ;;  %vm1496_vm6 = vweird.f32 %v4593_v58  ;;  %v1503_v44 = vor.u32 1.1754944e-38, %v1502_v37  ;;  %v1001_v23 = vld [vmem:[#allocation2 + $0x1d0] sm:$0xff] }
 0xd59   :  { %v1366_v62 = vsub.f32 1.0, %v1365_v59  ;;  %vm1356_vm13 = vmor %vm1354_vm4, %vm1355_vm1  ;;  %vm1481_vm1 = vweird.f32 %v1472_v56  ;;  %vm1501_vm9 = vcmp.eq.f32.partialorder %v1500_v43, 8.507059e+37  ;;  %v1003_v56 = vld [vmem:[#allocation2 + $0x1e0] sm:$0xff] }
 0xd5a   :  { %v1351_v63 = vsub.f32 1.0, %v1350_v61  ;;  %vm1483_vm4 = vmor %vm1481_vm1, %vm1482_vm0  ;;  %1592 = vmatpush.msra.mxu2 %v1003_v56 }
 0xd5b   :  { %v1367_v21 = vmul.f32 %v4048_v28, %v1366_v62  ;;  %v1484_v25 = vsel %vm1483_vm4, %v4046_v55, %v1480_v50 }
 0xd5c   :  { %v1352_v1 = vmul.f32 %v4050_v24, %v1351_v63  ;;  %v4052_v4 = vpop.eup %4051  ;;  %1593 = vmatpush.msra.mxu2 %v1002_v16 }
 0xd5d   :  { %v1368_v7 = vadd.f32 %v4048_v28, %v1367_v21  ;;  %v1492_v49 = vmul.f32 %v4052_v4, %v4593_v58 }
 0xd5e   :  { %v1353_v3 = vadd.f32 %v4050_v24, %v1352_v1  ;;  %1594 = vmatpush.msra.mxu2 %v1001_v23  ;;  %v3941_v1 = vld [vmem:[#allocation2 + $0x1f0] ss:$0 sm:$0xff] }
 0xd5f   :  { %v1380_v5 = vpop.permute.xlu2 %1379  ;;  %v1372_v14 = vsel %vm1371_vm10, %v4048_v28, %v1368_v7  ;;  %v1493_v18 = vsub.f32 1.0, %v1492_v49 }
 0xd60   :  { %v1357_v41 = vsel %vm1356_vm13, %v4050_v24, %v1353_v3  ;;  %1407 = vmatpush.msra.mxu3 %v1380_v5  ;;  %v1377_v39 = vsel %vm1374_vm15, %v1376_v17, %v1372_v14  ;;  %vm1486_vm13 = vcmp.eq.f32.partialorder %v1485_v22, 8.507059e+37  ;;  %v1659_v17 = vld [vmem:[#allocation2 + $0x230] sm:$0xff]  ;;  %v1656_v22 = vld [vmem:[#allocation2 + $0x218] sm:$0xff] }
 0xd61   :  { %v1362_v11 = vsel %vm1359_vm5, %v1361_v20, %v1357_v41  ;;  %v1378_v31 = vmul.f32 %v4553_v53, %v1377_v39  ;;  %v1489_v32 = vsel %vm1486_vm13, %v1488_v26, %v1484_v25  ;;  %vm1497_vm5 = vweird.f32 %v4052_v4 }
 0xd62   :  { %v1363_v12 = vmul.f32 %v4551_v52, %v1362_v11  ;;  %v1494_v52 = vmul.f32 %v4052_v4, %v1493_v18  ;;  %v1490_v42 = vmul.f32 %v4547_v29, %v1489_v32  ;;  %1680 = vmatpush.msrb.mxu3 %v1659_v17  ;;  %v1658_v18 = vld [vmem:[#allocation2 + $0x228] sm:$0xff]  ;;  %vm5069_vm13 = vcmask 523264  }
 0xd64   :  { %3788 = vmatmul.msk.f32.vlgmr.msra.gmra.mxu3 %vm264_vm12, %v1363_v12  ;;  %v1495_v36 = vadd.f32 %v4052_v4, %v1494_v52 }
 0xd65   :  { %1681 = vmatpush.msrb.mxu3 %v1658_v18 }
 0xd67   :  { %v1509_v10 = vpop.permute.xlu2 %1508  ;;  %1682 = vmatpush.msrb.mxu3 %v1657_v34  ;;  %v3945_v34 = vld [vmem:[#allocation2 + $0x280] ss:$0 sm:$0xff] }
 0xd68   :  { %3794 = vmatpush.msk.msra.mxu1 %vm325_vm14, %v1509_v10  ;;  %vm1498_vm14 = vmor %vm1496_vm6, %vm1497_vm5 }
 0xd69   :  { %v1499_v53 = vsel %vm1498_vm14, %v4052_v4, %v1495_v36  ;;  %1683 = vmatpush.msrb.mxu3 %v1656_v22  ;;  %vm5070_vm5 = vmmov %vm5069_vm13 }
 0xd6a   :  { %v1504_v13 = vsel %vm1501_vm9, %v1503_v44, %v1499_v53  ;;  %vm1804_vm9 = vcmask 258048  }
 0xd6b   :  { %v1505_v45 = vmul.f32 %v4559_v57, %v1504_v13  ;;  %v3942_v13 = vld [vmem:[#allocation2 + $0x208] ss:$0 sm:$0xff] }
 0xd6c   :  { %3789 = vmatmul.msk.f32.gmra.mxu3 %vm264_vm12, %v1378_v31 }
 0xd6f   :  { %v1507_v38 = vpop.permute.xlu2 %1506 }
 0xd70   :  { %1534 = vmatpush.msra.mxu1 %v1507_v38 }
 0xd71   :  { %3795 = vmatmul.msk.f32.vlgmr.msra.gmra.mxu1 %vm264_vm12, %v1490_v42 }
 0xd79   :  { %3796 = vmatmul.msk.f32.gmra.mxu1 %vm264_vm12, %v1505_v45 }
 0xda9   :  { %v1282_v30 = vpop.f32.mrf.mxu1  ;;  %v1155_v19 = vpop.f32.mrf.mxu3 }
 0xdaa   :  { %1544 = vrot.lane.b32.xlu0 %v1282_v30, %s4191_s18 }
 0xdb1   :  { %v1158_v46 = vpop.f32.mrf.mxu3  ;;  %v1285_v29 = vpop.f32.mrf.mxu1 }
 0xde7   :  { %v1409_v15 = vpop.f32.mrf.mxu3 }
 0xde8   :  { %1552 = vrot.lane.b32.xlu2 %v1409_v15, %s4205_s10 }
 0xdee   :  { %v1536_v48 = vpop.f32.mrf.mxu1 }
 0xdef   :  { %v1412_v51 = vpop.f32.mrf.mxu3  ;;  %1560 = vrot.lane.b32.xlu1 %v1536_v48, %s4204_s9 }
 0xdf0   :  { %1554 = vrot.lane.b32.xlu0 %v1412_v51, %s4205_s10  ;;  %1546 = vrot.lane.b32.xlu2 %v1285_v29, %s4191_s18 }
 0xdf6   :  { %v1539_v57 = vpop.f32.mrf.mxu1 }
 0xdf8   :  { %1562 = vrot.lane.b32.xlu2 %v1539_v57, %s4204_s9 }
 0xe1c   :  { %v1545_v58 = vpop.permute.xlu0 %1544 }
 0xe1d   :  { %v1566_v24 = vsel %vm228_vm11, %v1155_v19, %v1545_v58  ;;  %v1715_v58 = vld [vmem:[#allocation2 + $0x270] sm:$0xff] }
 0xe42   :  { %v1553_v55 = vpop.permute.xlu2 %1552 }
 0xe43   :  { %v1568_v59 = vsel %vm758_vm7, %v1566_v24, %v1553_v55  ;;  %v1716_v55 = vld [vmem:[#allocation2 + $0x278] sm:$0xff]  ;;  %v1713_v24 = vld [vmem:[#allocation2 + $0x260] sm:$0xff] }
 0xe44   :  { %1731 = vmatpush.msrb.mxu0 %v1716_v55 }
 0xe46   :  { %1732 = vmatpush.msrb.mxu0 %v1715_v58 }
 0xe4a   :  { %v1547_v28 = vpop.permute.xlu2 %1546 }
 0xe4b   :  { %v1567_v62 = vsel %vm228_vm11, %v1158_v46, %v1547_v28  ;;  %v3943_v46 = vld [vmem:[#allocation2 + $0x210] ss:$0 sm:$0xff]  ;;  %v1714_v28 = vld [vmem:[#allocation2 + $0x268] sm:$0xff] }
 0xe4c   :  { %1733 = vmatpush.msrb.mxu0 %v1714_v28 }
 0xe4e   :  { %1734 = vmatpush.msrb.mxu0 %v1713_v24 }
 0xe52   :  { %v1563_v0 = vpop.permute.xlu2 %1562 }
 0xe61   :  { %v1561_v60 = vpop.permute.xlu1 %1560 }
 0xe62   :  { %v1570_v61 = vsel %vm761_vm8, %v1568_v59, %v1561_v60  ;;  %v1555_v27 = vpop.permute.xlu0 %1554  ;;  %v1712_v59 = vld [vmem:[#allocation2 + $0x258] sm:$0xff]  ;;  %v1711_v60 = vld [vmem:[#allocation2 + $0x250] sm:$0xff] }
 0xe63   :  { %3797 = vmatmul.msk.f32.vlgmr.msra.gmra.mxu2 %vm123_vm2, %v1570_v61  ;;  %v1569_v63 = vsel %vm758_vm7, %v1567_v62, %v1555_v27  ;;  %1735 = vmatpush.msrb.mxu0 %v1712_v59  ;;  %v1710_v61 = vld [vmem:[#allocation2 + $0x248] sm:$0xff]  ;;  %v1709_v27 = vld [vmem:[#allocation2 + $0x240] sm:$0xff]  ;;  %v3944_v62 = vld [vmem:[#allocation2 + $0x238] ss:$0 sm:$0xff] }
 0xe64   :  { %v1571_v21 = vsel %vm761_vm8, %v1569_v63, %v1563_v0 }
 0xe65   :  { %1736 = vmatpush.msrb.mxu0 %v1711_v60  ;;  %v3946_v60 = vld [vmem:[#allocation2 + $0x288] ss:$0 sm:$0xff] }
 0xe67   :  { %1737 = vmatpush.msrb.mxu0 %v1710_v61 }
 0xe69   :  { %1738 = vmatpush.msrb.mxu0 %v1709_v27 }
 0xe6b   :  { %3798 = vmatmul.msk.f32.gmra.mxu2 %vm123_vm2, %v1571_v21 }
 0xee6   :  { %v1596_v2 = vpop.f32.mrf.mxu2 }
 0xee7   :  { %v1597_v35 = vadd.f32 %v3941_v1, %v1596_v2 }
 0xee9   :  { %v4625_v4 = vadd.f32 %v1597_v35, %v4445_v33 }
 0xeeb   :  { %v1606_v3 = vsel %vm123_vm2, %v4625_v4, 0.0 }
 0xeec   :  { %1607 = vadd.xlane.f32.xlu0 %v1606_v3 }
 0xeee   :  { %v1599_v20 = vpop.f32.mrf.mxu2 }
 0xeef   :  { %v1600_v5 = vadd.f32 %v3941_v1, %v1599_v20 }
 0xef1   :  { %v4630_v41 = vadd.f32 %v1600_v5, %v4450_v40 }
 0xef3   :  { %v1609_v7 = vsel %vm127_vm3, %v4630_v41, 0.0 }
 0xef4   :  { %1610 = vadd.xlane.f32.xlu2 %v1609_v7 }
 0xf5f   :  { %v1608_v8 = vpop.xlane.xlu0 %1607 }
 0xf60   :  { %v1612_v9 = vmul.f32 %v1608_v8, %v4253_v47 }
 0xf62   :  { %v1614_v49 = vsub.f32 %v4625_v4, %v1612_v9 }
 0xf64   :  { %v1616_v33 = vmul.f32 %v1614_v49, %v1614_v49 }
 0xf66   :  { %v1618_v11 = vsel %vm123_vm2, %v1616_v33, 0.0 }
 0xf67   :  { %v1611_v12 = vpop.xlane.xlu2 %1610  ;;  %1619 = vadd.xlane.f32.xlu1 %v1618_v11 }
 0xf68   :  { %v1613_v6 = vmul.f32 %v1611_v12, %v4253_v47 }
 0xf6a   :  { %v1615_v14 = vsub.f32 %v4630_v41, %v1613_v6 }
 0xf6c   :  { %v1617_v40 = vmul.f32 %v1615_v14, %v1615_v14 }
 0xf6e   :  { %v1621_v50 = vsel %vm127_vm3, %v1617_v40, 0.0 }
 0xf6f   :  { %1622 = vadd.xlane.f32.xlu2 %v1621_v50 }
 0xfda   :  { %v1620_v10 = vpop.xlane.xlu1 %1619 }
 0xfdb   :  { %v1624_v39 = vmul.f32 %v1620_v10, %v4253_v47 }
 0xfdd   :  { %v1626_v25 = vadd.f32 1e-12, %v1624_v39 }
 0xfdf   :  { %4053 = vrsqrt.f32 %v1626_v25  ;;  %vm1634_vm10 = vweird.f32 %v1626_v25 }
 0xfe2   :  { %v1623_v52 = vpop.xlane.xlu2 %1622 }
 0xfe3   :  { %v1625_v26 = vmul.f32 %v1623_v52, %v4253_v47 }
 0xfe5   :  { %v4054_v31 = vpop.eup %4053  ;;  %v1627_v32 = vadd.f32 1e-12, %v1625_v26 }
 0xfe6   :  { %v1629_v36 = vmul.f32 %v4054_v31, %v1626_v25  ;;  %vm1635_vm12 = vweird.f32 %v4054_v31 }
 0xfe7   :  { %4055 = vrsqrt.f32 %v1627_v32  ;;  %vm1636_vm0 = vmor %vm1634_vm10, %vm1635_vm12  ;;  %vm1644_vm1 = vweird.f32 %v1627_v32 }
 0xfe8   :  { %v1630_v37 = vmul.f32 %v4054_v31, %v1629_v36 }
 0xfea   :  { %v1631_v38 = vmul.f32 0.5, %v1630_v37 }
 0xfec   :  { %v1632_v42 = vsub.f32 1.5, %v1631_v38 }
 0xfed   :  { %v4056_v43 = vpop.eup %4055 }
 0xfee   :  { %v1633_v53 = vmul.f32 %v4054_v31, %v1632_v42  ;;  %v1639_v44 = vmul.f32 %v4056_v43, %v1627_v32  ;;  %vm1645_vm15 = vweird.f32 %v4056_v43 }
 0xfef   :  { %vm1646_vm4 = vmor %vm1644_vm1, %vm1645_vm15  ;;  %vm1822_vm15 = vcmask 1042432  }
 0xff0   :  { %v1637_v45 = vsel %vm1636_vm0, %v4054_v31, %v1633_v53  ;;  %v1640_v30 = vmul.f32 %v4056_v43, %v1639_v44 }
 0xff1   :  { %v1648_v19 = vmul.f32 %v1637_v45, %v1614_v49 }
 0xff2   :  { %v1641_v29 = vmul.f32 0.5, %v1640_v30 }
 0xff3   :  { %v1651_v15 = vmul.f32 %v3942_v13, %v1648_v19 }
 0xff4   :  { %v1642_v48 = vsub.f32 1.5, %v1641_v29  ;;  %v1839_v29 = vld [vmem:[#allocation2 + $0x2a8] sm:$0xff] }
 0xff5   :  { %v1654_v51 = vadd.f32 %v3943_v46, %v1651_v15  ;;  %v1838_v15 = vld [vmem:[#allocation2 + $0x2a0] sm:$0xff] }
 0xff6   :  { %v1643_v57 = vmul.f32 %v4056_v43, %v1642_v48 }
 0xff7   :  { %3799 = vmatmul.msk.f32.vlgmr.msrb.gmra.mxu3 %vm123_vm2, %v1654_v51 }
 0xff8   :  { %v1647_v54 = vsel %vm1646_vm4, %v4056_v43, %v1643_v57  ;;  %v1837_v57 = vld [vmem:[#allocation2 + $0x298] sm:$0xff]  ;;  %vm1835_vm4 = vcmask 1040384  }
 0xff9   :  { %v1649_v56 = vmul.f32 %v1647_v54, %v1615_v14 }
 0xffb   :  { %v1652_v16 = vmul.f32 %v3942_v13, %v1649_v56 }
 0xffd   :  { %v1655_v23 = vadd.f32 %v3943_v46, %v1652_v16  ;;  %v1840_v46 = vld [vmem:[#allocation2 + $0x2b0] sm:$0xff] }
 0xffe   :  { %1858 = vmatpush.msrb.mxu1 %v1840_v46  ;;  %v1924_v46 = vld [vmem:[#allocation2 + $0x5b8] sm:$0xff] }
 0xfff   :  { %3800 = vmatmul.msk.f32.gmra.mxu3 %vm123_vm2, %v1655_v23 }
0x1000   :  { %1859 = vmatpush.msrb.mxu1 %v1839_v29  ;;  %v1990_v29 = vld [vmem:[#allocation2 + $0x2f8] sm:$0xff] }
0x1002   :  { %1860 = vmatpush.msrb.mxu1 %v1838_v15  ;;  %v1898_v15 = vld [vmem:[#allocation2 + $0x5a8] sm:$0xff] }
0x1003   :  { %1916 = vmatpush.msrb.mxu2 %v1898_v15 }
0x1004   :  { %1861 = vmatpush.msrb.mxu1 %v1837_v57  ;;  %v1988_v57 = vld [vmem:[#allocation2 + $0x2e8] sm:$0xff] }
0x107a   :  { %v1685_v63 = vpop.f32.mrf.mxu3 }
0x107b   :  { %v1686_v0 = vadd.f32 %v3944_v62, %v1685_v63 }
0x107d   :  { %v1693_v21 = vmul.f32 0.044715, %v1686_v0  ;;  %v1691_v12 = vmul.f32 0.5, %v1686_v0 }
0x107f   :  { %v1695_v1 = vmul.f32 %v1693_v21, %v1686_v0  ;;  %v1869_v21 = vld [vmem:[#allocation2 + $0x580] sm:$0xff] }
0x1080   :  { %1887 = vmatpush.msra.mxu1 %v1869_v21  ;;  %v1982_v21 = vld [vmem:[%s5063_s1 + $0x8] sm:$0xff] }
0x1081   :  { %v1697_v2 = vmul.f32 %v1695_v1, %v1686_v0  ;;  %v1927_v1 = vld [vmem:[#allocation2 + $0x5d0] sm:$0xff] }
0x1082   :  { %v1688_v35 = vpop.f32.mrf.mxu3  ;;  %1942 = vmatpush.msra.mxu3 %v1927_v1  ;;  %v3949_v1 = vld [vmem:[#allocation2 + $0x588] ss:$0 sm:$0xff] }
0x1083   :  { %v1699_v3 = vadd.f32 %v1697_v2, %v1686_v0  ;;  %v1689_v20 = vadd.f32 %v3944_v62, %v1688_v35  ;;  %v3947_v62 = vld [vmem:[#allocation2 + $0x290] ss:$0 sm:$0xff]  ;;  %v1868_v2 = vld [vmem:[#allocation2 + $0x578] sm:$0xff] }
0x1084   :  { %1888 = vmatpush.msra.mxu1 %v1868_v2 }
0x1085   :  { %v1701_v5 = vmul.f32 0.7978846, %v1699_v3  ;;  %v1694_v7 = vmul.f32 0.044715, %v1689_v20  ;;  %v1692_v50 = vmul.f32 0.5, %v1689_v20  ;;  %v4206_v3 = vmov 5.0  }
0x1087   :  { %4057 = vtanh.f32 %v1701_v5  ;;  %v1696_v8 = vmul.f32 %v1694_v7, %v1689_v20 }
0x1089   :  { %v1698_v9 = vmul.f32 %v1696_v8, %v1689_v20 }
0x108b   :  { %v1700_v49 = vadd.f32 %v1698_v9, %v1689_v20  ;;  %v1926_v20 = vld [vmem:[#allocation2 + $0x5c8] sm:$0xff] }
0x108c   :  { %1943 = vmatpush.msra.mxu3 %v1926_v20 }
0x108d   :  { %v4058_v33 = vpop.eup %4057  ;;  %v1702_v11 = vmul.f32 0.7978846, %v1700_v49 }
0x108e   :  { %v1705_v6 = vadd.f32 1.0, %v4058_v33 }
0x108f   :  { %4059 = vtanh.f32 %v1702_v11 }
0x1090   :  { %v1707_v14 = vmul.f32 %v1705_v6, %v1691_v12 }
0x1092   :  { %3801 = vmatmul.msk.f32.vlgmr.msrb.gmra.mxu0 %vm5069_vm13, %v1707_v14  ;;  %vm5071_vm13 = vmmov %vm5070_vm5 }
0x1095   :  { %v4060_v40 = vpop.eup %4059 }
0x1096   :  { %v1706_v17 = vadd.f32 1.0, %v4060_v40 }
0x1098   :  { %v1708_v18 = vmul.f32 %v1706_v17, %v1692_v50 }
0x109a   :  { %3802 = vmatmul.msk.f32.gmra.mxu0 %vm5070_vm5, %v1708_v18 }
0x110f   :  { %v1740_v22 = vpop.f32.mrf.mxu0 }
0x1110   :  { %v1746_v10 = vadd.f32 %v1740_v22, %v4625_v4 }
0x1112   :  { %v1750_v39 = vadd.f32 %v3945_v34, %v1746_v10 }
0x1114   :  { %v1754_v25 = vsel %vm123_vm2, %v1750_v39, 0.0 }
0x1115   :  { %1755 = vadd.xlane.f32.xlu0 %v1754_v25 }
0x1117   :  { %v1743_v52 = vpop.f32.mrf.mxu0 }
0x1118   :  { %v1747_v26 = vadd.f32 %v1743_v52, %v4630_v41 }
0x111a   :  { %v1751_v31 = vadd.f32 %v3945_v34, %v1747_v26 }
0x111c   :  { %v1757_v32 = vsel %vm127_vm3, %v1751_v31, 0.0 }
0x111d   :  { %1758 = vadd.xlane.f32.xlu2 %v1757_v32 }
0x1188   :  { %v1756_v36 = vpop.xlane.xlu0 %1755 }
0x1189   :  { %v1760_v37 = vmul.f32 %v1756_v36, %v4253_v47 }
0x118b   :  { %v1762_v38 = vsub.f32 %v1750_v39, %v1760_v37 }
0x118d   :  { %v1764_v42 = vmul.f32 %v1762_v38, %v1762_v38 }
0x118f   :  { %v1766_v43 = vsel %vm123_vm2, %v1764_v42, 0.0 }
0x1190   :  { %1767 = vadd.xlane.f32.xlu0 %v1766_v43  ;;  %v1759_v4 = vpop.xlane.xlu2 %1758 }
0x1191   :  { %v1761_v53 = vmul.f32 %v1759_v4, %v4253_v47 }
0x1193   :  { %v1763_v44 = vsub.f32 %v1751_v31, %v1761_v53 }
0x1195   :  { %v1765_v13 = vmul.f32 %v1763_v44, %v1763_v44 }
0x1197   :  { %v1769_v45 = vsel %vm127_vm3, %v1765_v13, 0.0 }
0x1198   :  { %1770 = vadd.xlane.f32.xlu1 %v1769_v45 }
0x1203   :  { %v1768_v41 = vpop.xlane.xlu0 %1767 }
0x1204   :  { %v1772_v30 = vmul.f32 %v1768_v41, %v4253_v47  ;;  %v1867_v41 = vld [vmem:[#allocation2 + $0x570] sm:$0xff] }
0x1205   :  { %1889 = vmatpush.msra.mxu1 %v1867_v41 }
0x1206   :  { %v1774_v19 = vadd.f32 1e-12, %v1772_v30  ;;  %v1925_v30 = vld [vmem:[#allocation2 + $0x5c0] sm:$0xff] }
0x1207   :  { %1944 = vmatpush.msra.mxu3 %v1925_v30 }
0x1208   :  { %4061 = vrsqrt.f32 %v1774_v19  ;;  %vm1782_vm6 = vweird.f32 %v1774_v19 }
0x1209   :  { %1945 = vmatpush.msra.mxu3 %v1924_v46 }
0x120b   :  { %v1771_v48 = vpop.xlane.xlu1 %1770 }
0x120c   :  { %v1773_v51 = vmul.f32 %v1771_v48, %v4253_v47  ;;  %v1989_v48 = vld [vmem:[#allocation2 + $0x2f0] sm:$0xff] }
0x120e   :  { %v4062_v54 = vpop.eup %4061  ;;  %v1775_v56 = vadd.f32 1e-12, %v1773_v51  ;;  %v1897_v51 = vld [vmem:[#allocation2 + $0x5a0] sm:$0xff] }
0x120f   :  { %v1777_v16 = vmul.f32 %v4062_v54, %v1774_v19  ;;  %vm1783_vm3 = vweird.f32 %v4062_v54  ;;  %v1866_v19 = vld [vmem:[#allocation2 + $0x568] sm:$0xff]  ;;  %1917 = vmatpush.msrb.mxu2 %v1897_v51 }
0x1210   :  { %4063 = vrsqrt.f32 %v1775_v56  ;;  %vm1784_vm14 = vmor %vm1782_vm6, %vm1783_vm3  ;;  %vm1792_vm10 = vweird.f32 %v1775_v56  ;;  %1890 = vmatpush.msra.mxu1 %v1866_v19 }
0x1211   :  { %v1778_v23 = vmul.f32 %v4062_v54, %v1777_v16  ;;  %4065 = vrcp.f32 %v4206_v3  ;;  %v3950_v3 = vld [vmem:[#allocation2 + $0x5d8] ss:$0 sm:$0xff] }
0x1213   :  { %v1779_v55 = vmul.f32 0.5, %v1778_v23  ;;  %v1896_v23 = vld [vmem:[#allocation2 + $0x598] sm:$0xff] }
0x1214   :  { %1918 = vmatpush.msrb.mxu2 %v1896_v23 }
0x1215   :  { %v1780_v58 = vsub.f32 1.5, %v1779_v55  ;;  %v1987_v55 = vld [vmem:[#allocation2 + $0x2e0] sm:$0xff] }
0x1216   :  { %v4064_v28 = vpop.eup %4063 }
0x1217   :  { %v1781_v24 = vmul.f32 %v4062_v54, %v1780_v58  ;;  %v1787_v59 = vmul.f32 %v4064_v28, %v1775_v56  ;;  %vm1793_vm12 = vweird.f32 %v4064_v28  ;;  %v4066_v11 = vpop.eup %4065  ;;  %v1895_v58 = vld [vmem:[#allocation2 + $0x590] sm:$0xff] }
0x1218   :  { %vm1794_vm0 = vmor %vm1792_vm10, %vm1793_vm12  ;;  %v1813_v40 = vmul.f32 5.0, %v4066_v11  ;;  %vm1817_vm1 = vweird.f32 %v4066_v11  ;;  %1919 = vmatpush.msrb.mxu2 %v1895_v58 }
0x1219   :  { %v1785_v61 = vsel %vm1784_vm14, %v4062_v54, %v1781_v24  ;;  %v1788_v27 = vmul.f32 %v4064_v28, %v1787_v59  ;;  %v3948_v54 = vld [vmem:[#allocation2 + $0x2b8] ss:$0 sm:$0xff]  ;;  %v1952_v59 = vld [vmem:[#allocation2 + $0x5f0] sm:$0xff] }
0x121a   :  { %v1796_v63 = vmul.f32 %v1785_v61, %v1762_v38  ;;  %v1814_v22 = vsub.f32 1.0, %v1813_v40  ;;  %v1986_v24 = vld [vmem:[#allocation2 + $0x2d8] sm:$0xff]  ;;  %v1951_v61 = vld [vmem:[#allocation2 + $0x5e8] sm:$0xff] }
0x121b   :  { %v1789_v0 = vmul.f32 0.5, %v1788_v27  ;;  %v1984_v27 = vld [vmem:[#allocation2 + $0x2c8] sm:$0xff] }
0x121c   :  { %v1799_v35 = vmul.f32 %v3946_v60, %v1796_v63  ;;  %v1815_v26 = vmul.f32 %v4066_v11, %v1814_v22  ;;  %v1983_v63 = vld [vmem:[#allocation2 + $0x2c0] sm:$0xff] }
0x121d   :  { %v1790_v5 = vsub.f32 1.5, %v1789_v0  ;;  %v1981_v0 = vld [vmem:[%s5063_s1] sm:$0xff] }
0x121e   :  { %v1802_v7 = vadd.f32 %v3947_v62, %v1799_v35  ;;  %v1816_v37 = vadd.f32 %v4066_v11, %v1815_v26 }
0x121f   :  { %v1791_v8 = vmul.f32 %v4064_v28, %v1790_v5 }
0x1220   :  { %v1805_v9 = vsel %vm1804_vm9, %v1802_v7, 0.0  ;;  %v1823_v17 = vrot.slane %v1802_v7, 5  ;;  %v1818_v4 = vsel %vm1817_vm1, %v4066_v11, %v1816_v37 }
0x1221   :  { %v1806_v49 = vrot.slane %v1805_v9, 4  ;;  %v1795_v33 = vsel %vm1794_vm0, %v4064_v28, %v1791_v8  ;;  %v1953_v28 = vld [vmem:[#allocation2 + $0x5f8] sm:$0xff]  ;;  %v3951_v8 = vld [vmem:[#allocation2 + $0x5b0] ss:$0 sm:$0xff] }
0x1222   :  { %v1797_v12 = vmul.f32 %v1795_v33, %v1763_v44  ;;  %1969 = vmatpush.msra.mxu0 %v1953_v28  ;;  %v3952_v33 = vld [vmem:[#allocation2 + $0x600] ss:$0 sm:$0xff] }
0x1223   :  { %v1807_v14 = vadd.f32 %v1806_v49, %v1805_v9 }
0x1224   :  { %v1800_v6 = vmul.f32 %v3946_v60, %v1797_v12  ;;  %v1985_v60 = vld [vmem:[#allocation2 + $0x2d0] sm:$0xff]  ;;  %1970 = vmatpush.msra.mxu0 %v1952_v59  ;;  %v3953_v59 = vld [vmem:[#allocation2 + $0x378] ss:$0 sm:$0xff] }
0x1225   :  { %v1808_v34 = vrot.slane %v1807_v14, 2 }
0x1226   :  { %v1803_v50 = vadd.f32 %v3947_v62, %v1800_v6  ;;  %v1950_v62 = vld [vmem:[#allocation2 + $0x5e0] sm:$0xff]  ;;  %1971 = vmatpush.msra.mxu0 %v1951_v61 }
0x1227   :  { %v1809_v25 = vadd.f32 %v1808_v34, %v1807_v14 }
0x1228   :  { %v1824_v18 = vrot.slane %v1803_v50, 5  ;;  %1972 = vmatpush.msra.mxu0 %v1950_v62  ;;  %v3954_v62 = vld [vmem:[#allocation2 + $0x380] ss:$0 sm:$0xff] }
0x1229   :  { %v1810_v32 = vrot.slane %v1809_v25, 1 }
0x122a   :  { %v1825_v10 = vsel %vm1822_vm15, %v1823_v17, %v1824_v18  ;;  %v2022_v17 = vld [vmem:[#allocation2 + $0x320] sm:$0xff] }
0x122b   :  { %v1827_v39 = vsel %vm1804_vm9, %v1825_v10, 0.0  ;;  %v1811_v42 = vadd.f32 %v1810_v32, %v1809_v25 }
0x122c   :  { %v1828_v52 = vrot.slane %v1827_v39, 4 }
0x122d   :  { %v1819_v44 = vmul.f32 %v1818_v4, %v1811_v42 }
0x122e   :  { %v1829_v31 = vadd.f32 %v1828_v52, %v1827_v39 }
0x1230   :  { %v1830_v36 = vrot.slane %v1829_v31, 2 }
0x1232   :  { %v1831_v38 = vadd.f32 %v1830_v36, %v1829_v31 }
0x1234   :  { %v1832_v43 = vrot.slane %v1831_v38, 1 }
0x1236   :  { %v1833_v53 = vadd.f32 %v1832_v43, %v1831_v38 }
0x1238   :  { %v1834_v13 = vmul.f32 %v1833_v53, %v1818_v4  ;;  %v2080_v53 = vld [vmem:[#allocation2 + $0x340] sm:$0xff] }
0x1239   :  { %2106 = vmatpush.msra.mxu2 %v2080_v53 }
0x123a   :  { %v1836_v45 = vsel %vm1835_vm4, %v1819_v44, %v1834_v13  ;;  %v2079_v44 = vld [vmem:[#allocation2 + $0x338] sm:$0xff]  ;;  %v2078_v13 = vld [vmem:[#allocation2 + $0x330] sm:$0xff] }
0x123b   :  { %3803 = vmatmul.msk.f32.vlgmr.msrb.gmra.mxu1 %vm123_vm2, %v1836_v45  ;;  %2107 = vmatpush.msra.mxu2 %v2079_v44  ;;  %v2077_v45 = vld [vmem:[#allocation2 + $0x328] sm:$0xff] }
0x123c   :  { %2007 = vmatpush.msrb.mxu1 %v1990_v29 }
0x123d   :  { %2108 = vmatpush.msra.mxu2 %v2078_v13 }
0x123e   :  { %2008 = vmatpush.msrb.mxu1 %v1989_v48 }
0x123f   :  { %2109 = vmatpush.msra.mxu2 %v2077_v45 }
0x1240   :  { %2009 = vmatpush.msrb.mxu1 %v1988_v57 }
0x1242   :  { %2010 = vmatpush.msrb.mxu1 %v1987_v55 }
0x1244   :  { %2011 = vmatpush.msrb.mxu1 %v1986_v24 }
0x1246   :  { %2012 = vmatpush.msrb.mxu1 %v1985_v60 }
0x1248   :  { %2013 = vmatpush.msrb.mxu1 %v1984_v27 }
0x124a   :  { %2014 = vmatpush.msrb.mxu1 %v1983_v63 }
0x12b8   :  { %v1863_v56 = vpop.f32.mrf.mxu1 }
0x12b9   :  { %v1864_v16 = vadd.f32 %v3948_v54, %v1863_v56 }
0x12bb   :  { %3804 = vmatmul.msk.f32.vlgmr.msra.gmra.mxu1 %vm123_vm2, %v1864_v16  ;;  %3806 = vmatmul.msk.f32.vlgmr.msra.gmra.mxu3 %vm123_vm2, %v1864_v16 }
0x12c3   :  { %3808 = vmatmul.msk.f32.vlgmr.msrb.gmra.mxu1 %vm5071_vm13, %v1981_v0 }
0x12cb   :  { %3809 = vmatmul.msk.f32.gmra.mxu1 %vm5070_vm5, %v1982_v21 }
0x1338   :  { %v1892_v2 = vpop.f32.mrf.mxu1 }
0x1339   :  { %v1893_v35 = vadd.f32 %v3949_v1, %v1892_v2 }
0x133b   :  { %3805 = vmatmul.msk.f32.vlgmr.msrb.gmra.mxu2 %vm123_vm2, %v1893_v35 }
0x133e   :  { %v1947_v20 = vpop.f32.mrf.mxu3 }
0x133f   :  { %v1948_v5 = vadd.f32 %v3950_v3, %v1947_v20  ;;  %v3955_v3 = vld [vmem:[#allocation2 + $0x348] ss:$0 sm:$0xff] }
0x1340   :  { %v2016_v7 = vpop.f32.mrf.mxu1 }
0x1341   :  { %3807 = vmatmul.msk.f32.vlgmr.msra.gmra.mxu0 %vm123_vm2, %v1948_v5 }
0x1348   :  { %v2019_v14 = vpop.f32.mrf.mxu1 }
0x13be   :  { %v1921_v9 = vpop.f32.mrf.mxu2  ;;  %v1974_v11 = vpop.f32.mrf.mxu0 }
0x13bf   :  { %v1922_v49 = vadd.f32 %v3951_v8, %v1921_v9 }
0x13c1   :  { %v1977_v12 = vadd.f32 %v1974_v11, %v1922_v49 }
0x13c3   :  { %v1980_v6 = vadd.f32 %v3952_v33, %v1977_v12 }
0x13c5   :  { %v1991_v40 = vperm.slane %v1980_v6, 0  ;;  %v1992_v50 = vperm.slane %v1980_v6, 1  ;;  %v4705_v6 = vld [vmem:[#allocation2 + $0x628] sm:$0xff] }
0x13c7   :  { %v2017_v18 = vadd.f32 %v2016_v7, %v1991_v40  ;;  %v2020_v34 = vadd.f32 %v2019_v14, %v1992_v50 }
0x13c9   :  { %v4671_v22 = vadd.f32 %v2022_v17, %v2017_v18  ;;  %v4673_v10 = vadd.f32 %v2022_v17, %v2020_v34  ;;  %v4709_v18 = vld [vmem:[#allocation2 + $0x630] sm:$0xff] }
0x13cb   :  { %v2030_v39 = vsel %vm123_vm2, %v4673_v10, 0.0  ;;  %v2027_v25 = vsel %vm123_vm2, %v4671_v22, 0.0 }
0x13cc   :  { %2031 = vadd.xlane.f32.xlu0 %v2030_v39  ;;  %2028 = vadd.xlane.f32.xlu2 %v2027_v25 }
0x143f   :  { %v2032_v52 = vpop.xlane.xlu0 %2031  ;;  %v2029_v26 = vpop.xlane.xlu2 %2028 }
0x1440   :  { %v2034_v31 = vmul.f32 %v2032_v52, %v4253_v47  ;;  %v2033_v32 = vmul.f32 %v2029_v26, %v4253_v47 }
0x1442   :  { %v2036_v36 = vsub.f32 %v4673_v10, %v2034_v31  ;;  %v2035_v37 = vsub.f32 %v4671_v22, %v2033_v32 }
0x1444   :  { %v2038_v38 = vmul.f32 %v2036_v36, %v2036_v36  ;;  %v2037_v42 = vmul.f32 %v2035_v37, %v2035_v37 }
0x1446   :  { %v2042_v43 = vsel %vm123_vm2, %v2038_v38, 0.0  ;;  %v2039_v4 = vsel %vm123_vm2, %v2037_v42, 0.0 }
0x1447   :  { %2043 = vadd.xlane.f32.xlu2 %v2042_v43  ;;  %2040 = vadd.xlane.f32.xlu1 %v2039_v4 }
0x14ba   :  { %v2041_v41 = vpop.xlane.xlu1 %2040  ;;  %v2044_v30 = vpop.xlane.xlu2 %2043 }
0x14bb   :  { %v2045_v19 = vmul.f32 %v2041_v41, %v4253_v47  ;;  %v2046_v46 = vmul.f32 %v2044_v30, %v4253_v47 }
0x14bd   :  { %v2047_v29 = vadd.f32 1e-05, %v2045_v19  ;;  %v2048_v15 = vadd.f32 1e-05, %v2046_v46 }
0x14bf   :  { %4067 = vrsqrt.f32 %v2047_v29  ;;  %vm2055_vm6 = vweird.f32 %v2047_v29  ;;  %vm2065_vm12 = vweird.f32 %v2048_v15 }
0x14c0   :  { %4069 = vrsqrt.f32 %v2048_v15 }
0x14c5   :  { %v4068_v48 = vpop.eup %4067 }
0x14c6   :  { %v4070_v51 = vpop.eup %4069  ;;  %v2050_v57 = vmul.f32 %v4068_v48, %v2047_v29  ;;  %vm2056_vm3 = vweird.f32 %v4068_v48 }
0x14c7   :  { %v2060_v54 = vmul.f32 %v4070_v51, %v2048_v15  ;;  %vm2066_vm14 = vweird.f32 %v4070_v51  ;;  %vm2057_vm9 = vmor %vm2055_vm6, %vm2056_vm3 }
0x14c8   :  { %v2051_v56 = vmul.f32 %v4068_v48, %v2050_v57  ;;  %vm2067_vm10 = vmor %vm2065_vm12, %vm2066_vm14 }
0x14c9   :  { %v2061_v16 = vmul.f32 %v4070_v51, %v2060_v54 }
0x14ca   :  { %v2052_v23 = vmul.f32 0.5, %v2051_v56 }
0x14cb   :  { %v2062_v55 = vmul.f32 0.5, %v2061_v16 }
0x14cc   :  { %v2053_v58 = vsub.f32 1.5, %v2052_v23 }
0x14cd   :  { %v2063_v28 = vsub.f32 1.5, %v2062_v55 }
0x14ce   :  { %v2054_v24 = vmul.f32 %v4068_v48, %v2053_v58 }
0x14cf   :  { %v2064_v60 = vmul.f32 %v4070_v51, %v2063_v28 }
0x14d0   :  { %v2058_v61 = vsel %vm2057_vm9, %v4068_v48, %v2054_v24 }
0x14d1   :  { %v2069_v27 = vmul.f32 %v2058_v61, %v2035_v37  ;;  %v2068_v63 = vsel %vm2067_vm10, %v4070_v51, %v2064_v60 }
0x14d2   :  { %v2070_v1 = vmul.f32 %v2068_v63, %v2036_v36 }
0x14d3   :  { %v2072_v0 = vmul.f32 %v3953_v59, %v2069_v27 }
0x14d4   :  { %v2073_v2 = vmul.f32 %v3953_v59, %v2070_v1 }
0x14d5   :  { %v2075_v21 = vadd.f32 %v3954_v62, %v2072_v0 }
0x14d6   :  { %v2076_v35 = vadd.f32 %v3954_v62, %v2073_v2 }
0x14d7   :  { %3810 = vmatmul.msk.f32.vlgmr.msra.gmra.mxu2 %vm123_vm2, %v2075_v21 }
0x14df   :  { %3811 = vmatmul.msk.f32.gmra.mxu2 %vm123_vm2, %v2076_v35 }
0x155a   :  { %v2111_v20 = vpop.f32.mrf.mxu2 }
0x155b   :  { %v4689_v5 = vadd.f32 %v3955_v3, %v2111_v20 }
0x155d   :  { %2119 = vrot.lane.b32.xlu1 %v4689_v5, %s4193_s0 }
0x1562   :  { %v2114_v7 = vpop.f32.mrf.mxu2 }
0x1563   :  { %v2115_v8 = vadd.f32 %v3955_v3, %v2114_v7 }
0x1565   :  { %2245 = vrot.lane.b32.xlu1 %v4689_v5, %s4195_s27  ;;  %2247 = vrot.lane.b32.xlu2 %v2115_v8, %s4195_s27  ;;  %v4716_v52 = vpack.i.bf16 %v4689_v5, %v2115_v8 }
0x1566   :  { %2121 = vrot.lane.b32.xlu0 %v2115_v8, %s4193_s0 }
0x156e   :  { %2243 = vrot.lane.b32.xlu0 %v2115_v8, %s4198_s30 }
0x15bf   :  { %v2248_v9 = vpop.permute.xlu2 %2247 }
0x15c0   :  { %3818 = vmatpush.xpose.msk.msrb.mxu2 %vm228_vm11, %v2248_v9 }
0x15cf   :  { %v2120_v49 = vpop.permute.xlu1 %2119 }
0x15d7   :  { %v2246_v33 = vpop.permute.xlu1 %2245 }
0x15d8   :  { %v2122_v11 = vpop.permute.xlu0 %2121  ;;  %3819 = vmatpush.xpose.msk.msrb.mxu2 %vm228_vm11, %v2246_v33 }
0x15d9   :  { %3812 = vmatpush.xpose.msk.msrb.mxu3 %vm228_vm11, %v2122_v11 }
0x15dd   :  { %3813 = vmatpush.xpose.msk.msrb.mxu3 %vm228_vm11, %v2120_v49 }
0x15e0   :  { %3814 = vmatmul.msk.f32.vlgmr.msrb.gmra.mxu3 %vm228_vm11, %v4689_v5  ;;  %v2244_v13 = vpop.permute.xlu0 %2243 }
0x15e8   :  { %3815 = vmatmul.msk.f32.gmra.mxu3 %vm228_vm11, %v2115_v8 }
0x1663   :  { %v2148_v12 = vpop.f32.mrf.mxu3 }
0x1664   :  { %v2154_v14 = vmul.f32 0.35355338, %v2148_v12 }
0x1666   :  { %v2156_v40 = vadd.f32 %v2154_v14, %v4705_v6 }
0x1668   :  { %v2158_v50 = vsel %vm758_vm7, %v2156_v40, -inf }
0x1669   :  { %2159 = vmax.xlane.f32.xlu2 %v2158_v50 }
0x166b   :  { %v2151_v17 = vpop.f32.mrf.mxu3 }
0x166c   :  { %v2155_v34 = vmul.f32 0.35355338, %v2151_v17 }
0x166e   :  { %v2157_v39 = vadd.f32 %v2155_v34, %v4709_v18 }
0x1670   :  { %v2161_v25 = vsel %vm758_vm7, %v2157_v39, -inf }
0x1671   :  { %2162 = vmax.xlane.f32.xlu2 %v2161_v25 }
0x1689   :  { %2241 = vrot.lane.b32.xlu2 %v4689_v5, %s4198_s30 }
0x1691   :  { %3891 = vrot.lane.b32.xlu2 %v4716_v52, %s4194_s26 }
0x1699   :  { %2499 = vrot.lane.b32.xlu2 %v2115_v8, %s4199_s4 }
0x16a1   :  { %2497 = vrot.lane.b32.xlu2 %v4689_v5, %s4199_s4 }
0x16a9   :  { %2373 = vrot.lane.b32.xlu2 %v2115_v8, %s4196_s28 }
0x16b1   :  { %2495 = vrot.lane.b32.xlu2 %v2115_v8, %s4200_s5 }
0x16b9   :  { %2369 = vrot.lane.b32.xlu2 %v2115_v8, %s4197_s29 }
0x16dc   :  { %v2160_v26 = vpop.xlane.xlu2 %2159 }
0x16dd   :  { %v2164_v31 = vsub.f32 %v2156_v40, %v2160_v26 }
0x16df   :  { %v2166_v32 = vmul.f32 1.442695, %v2164_v31 }
0x16e1   :  { %4071 = vpow2.f32 %v2166_v32 }
0x16e4   :  { %v2163_v36 = vpop.xlane.xlu2 %2162 }
0x16e5   :  { %v2165_v37 = vsub.f32 %v2157_v39, %v2163_v36 }
0x16e7   :  { %v4072_v38 = vpop.eup %4071  ;;  %v2168_v42 = vmul.f32 1.442695, %v2165_v37 }
0x16e8   :  { %v2170_v43 = vsel %vm758_vm7, %v4072_v38, 0.0 }
0x16e9   :  { %4073 = vpow2.f32 %v2168_v42  ;;  %2171 = vadd.xlane.f32.xlu0 %v2170_v43 }
0x16ec   :  { %v2242_v4 = vpop.permute.xlu2 %2241 }
0x16ed   :  { %3820 = vmatmul.msk.f32.vlgmr.msrb.gmra.mxu2 %vm228_vm11, %v2242_v4 }
0x16ef   :  { %v4074_v53 = vpop.eup %4073 }
0x16f0   :  { %v2173_v44 = vsel %vm758_vm7, %v4074_v53, 0.0 }
0x16f1   :  { %2174 = vadd.xlane.f32.xlu1 %v2173_v44 }
0x16f4   :  { %v3892_v45 = vpop.permute.xlu2 %3891 }
0x16f5   :  { %v3893_v41 = vunpack.i.l.bf16 %v3892_v45  ;;  %3821 = vmatmul.msk.f32.gmra.mxu2 %vm228_vm11, %v2244_v13  ;;  %v3894_v30 = vunpack.i.h.bf16 %v3892_v45 }
0x16f7   :  { %2232 = vmatpush.msrb.mxu0 %v3893_v41 }
0x16f9   :  { %2233 = vmatpush.msrb.mxu0 %v3894_v30 }
0x16fc   :  { %v2500_v19 = vpop.permute.xlu2 %2499 }
0x16fd   :  { %2371 = vrot.lane.b32.xlu0 %v4689_v5, %s4196_s28  ;;  %3830 = vmatpush.xpose.msk.msra.mxu2 %vm228_vm11, %v2500_v19 }
0x1704   :  { %v2498_v46 = vpop.permute.xlu2 %2497 }
0x1705   :  { %2367 = vrot.lane.b32.xlu0 %v4689_v5, %s4197_s29  ;;  %3831 = vmatpush.xpose.msk.msra.mxu2 %vm228_vm11, %v2498_v46 }
0x170a   :  { %2493 = vrot.lane.b32.xlu1 %v4689_v5, %s4200_s5 }
0x170c   :  { %v2374_v29 = vpop.permute.xlu2 %2373 }
0x170d   :  { %3824 = vmatpush.xpose.msk.msra.mxu0 %vm228_vm11, %v2374_v29 }
0x1714   :  { %v2496_v14 = vpop.permute.xlu2 %2495 }
0x171c   :  { %v2370_v17 = vpop.permute.xlu2 %2369 }
0x175c   :  { %v2172_v15 = vpop.xlane.xlu0 %2171 }
0x175d   :  { %4075 = vrcp.f32 %v2172_v15  ;;  %v2187_v56 = vand.u32 2147483648, %v2172_v15  ;;  %v2185_v23 = vand.u32 2147483647, %v2172_v15  ;;  %vm2181_vm15 = vweird.f32 %v2172_v15 }
0x175f   :  { %v2188_v28 = vor.u32 1.1754944e-38, %v2187_v56  ;;  %vm2186_vm4 = vcmp.eq.f32.partialorder %v2185_v23, 8.507059e+37 }
0x1763   :  { %v4076_v48 = vpop.eup %4075 }
0x1764   :  { %v2177_v51 = vmul.f32 %v4076_v48, %v2172_v15  ;;  %v2175_v57 = vpop.xlane.xlu1 %2174  ;;  %vm2182_vm0 = vweird.f32 %v4076_v48 }
0x1765   :  { %4077 = vrcp.f32 %v2175_v57  ;;  %vm2183_vm1 = vmor %vm2181_vm15, %vm2182_vm0  ;;  %v2202_v62 = vand.u32 2147483648, %v2175_v57  ;;  %v2200_v1 = vand.u32 2147483647, %v2175_v57  ;;  %vm2196_vm5 = vweird.f32 %v2175_v57 }
0x1766   :  { %v2178_v54 = vsub.f32 1.0, %v2177_v51 }
0x1767   :  { %v2203_v3 = vor.u32 1.1754944e-38, %v2202_v62  ;;  %vm2201_vm6 = vcmp.eq.f32.partialorder %v2200_v1, 8.507059e+37 }
0x1768   :  { %v2179_v16 = vmul.f32 %v4076_v48, %v2178_v54 }
0x176a   :  { %v2180_v55 = vadd.f32 %v4076_v48, %v2179_v16 }
0x176b   :  { %v4078_v58 = vpop.eup %4077 }
0x176c   :  { %v2184_v24 = vsel %vm2183_vm1, %v4076_v48, %v2180_v55  ;;  %v2192_v59 = vmul.f32 %v4078_v58, %v2175_v57  ;;  %vm2197_vm13 = vweird.f32 %v4078_v58 }
0x176d   :  { %v2189_v60 = vsel %vm2186_vm4, %v2188_v28, %v2184_v24  ;;  %vm2198_vm3 = vmor %vm2196_vm5, %vm2197_vm13 }
0x176e   :  { %v2193_v61 = vsub.f32 1.0, %v2192_v59  ;;  %v2190_v27 = vmul.f32 %v4072_v38, %v2189_v60 }
0x176f   :  { %v2372_v63 = vpop.permute.xlu0 %2371 }
0x1770   :  { %v2194_v0 = vmul.f32 %v4078_v58, %v2193_v61  ;;  %3816 = vmatmul.msk.f32.vlgmr.msrb.gmra.mxu0 %vm758_vm7, %v2190_v27  ;;  %v2274_v21 = vpop.f32.mrf.mxu2 }
0x1771   :  { %v2280_v2 = vmul.f32 0.35355338, %v2274_v21  ;;  %3825 = vmatpush.xpose.msk.msra.mxu0 %vm228_vm11, %v2372_v63 }
0x1772   :  { %v2195_v35 = vadd.f32 %v4078_v58, %v2194_v0 }
0x1773   :  { %v2282_v20 = vadd.f32 %v2280_v2, %v4705_v6 }
0x1774   :  { %v2199_v5 = vsel %vm2198_vm3, %v4078_v58, %v2195_v35 }
0x1775   :  { %v2284_v7 = vsel %vm758_vm7, %v2282_v20, -inf  ;;  %v2204_v8 = vsel %vm2201_vm6, %v2203_v3, %v2199_v5 }
0x1776   :  { %2285 = vmax.xlane.f32.xlu0 %v2284_v7  ;;  %v2205_v9 = vmul.f32 %v4074_v53, %v2204_v8 }
0x1777   :  { %v2368_v50 = vpop.permute.xlu0 %2367 }
0x1778   :  { %3817 = vmatmul.msk.f32.gmra.mxu0 %vm758_vm7, %v2205_v9  ;;  %v2277_v49 = vpop.f32.mrf.mxu2 }
0x1779   :  { %v2281_v33 = vmul.f32 0.35355338, %v2277_v49 }
0x177b   :  { %v2283_v11 = vadd.f32 %v2281_v33, %v4709_v18 }
0x177c   :  { %v2494_v12 = vpop.permute.xlu1 %2493 }
0x177d   :  { %3832 = vmatmul.msk.f32.vlgmr.msra.gmra.mxu2 %vm228_vm11, %v2494_v12  ;;  %v2287_v40 = vsel %vm758_vm7, %v2283_v11, -inf }
0x177e   :  { %2288 = vmax.xlane.f32.xlu1 %v2287_v40 }
0x1780   :  { %3826 = vmatmul.msk.f32.vlgmr.msra.gmra.mxu0 %vm228_vm11, %v2368_v50 }
0x1785   :  { %3833 = vmatmul.msk.f32.gmra.mxu2 %vm228_vm11, %v2496_v14 }
0x1788   :  { %3827 = vmatmul.msk.f32.gmra.mxu0 %vm228_vm11, %v2370_v17 }
0x17e9   :  { %v2286_v25 = vpop.xlane.xlu0 %2285 }
0x17ea   :  { %v2290_v26 = vsub.f32 %v2282_v20, %v2286_v25 }
0x17ec   :  { %v2292_v31 = vmul.f32 1.442695, %v2290_v26 }
0x17ed   :  { %v4750_v34 = vpop.f32.mrf.mxu0 }
0x17ee   :  { %4079 = vpow2.f32 %v2292_v31 }
0x17f1   :  { %v2289_v42 = vpop.xlane.xlu1 %2288 }
0x17f2   :  { %v2291_v44 = vsub.f32 %v2283_v11, %v2289_v42 }
0x17f4   :  { %v4758_v30 = vpop.eup %4079  ;;  %v2294_v19 = vmul.f32 1.442695, %v2291_v44 }
0x17f5   :  { %v4752_v39 = vpop.f32.mrf.mxu0  ;;  %v2296_v48 = vsel %vm758_vm7, %v4758_v30, 0.0 }
0x17f6   :  { %4081 = vpow2.f32 %v2294_v19 }
0x17fc   :  { %v4766_v54 = vpop.eup %4081 }
0x17fd   :  { %v2400_v32 = vpop.f32.mrf.mxu0  ;;  %v2299_v56 = vsel %vm758_vm7, %v4766_v54, 0.0 }
0x17fe   :  { %v2406_v36 = vmul.f32 0.35355338, %v2400_v32 }
0x1800   :  { %v2526_v37 = vpop.f32.mrf.mxu2  ;;  %v2408_v38 = vadd.f32 %v2406_v36, %v4705_v6 }
0x1801   :  { %v2532_v43 = vmul.f32 0.35355338, %v2526_v37 }
0x1802   :  { %v2410_v4 = vsel %vm758_vm7, %v2408_v38, -inf }
0x1803   :  { %v2534_v53 = vadd.f32 %v2532_v43, %v4705_v6  ;;  %2411 = vmax.xlane.f32.xlu0 %v2410_v4 }
0x1805   :  { %v2403_v13 = vpop.f32.mrf.mxu0  ;;  %v2536_v45 = vsel %vm758_vm7, %v2534_v53, -inf }
0x1806   :  { %v2407_v41 = vmul.f32 0.35355338, %v2403_v13  ;;  %2537 = vmax.xlane.f32.xlu2 %v2536_v45 }
0x1808   :  { %v2529_v46 = vpop.f32.mrf.mxu2  ;;  %v2409_v29 = vadd.f32 %v2407_v41, %v4709_v18 }
0x1809   :  { %v2533_v15 = vmul.f32 0.35355338, %v2529_v46 }
0x180a   :  { %v2413_v57 = vsel %vm758_vm7, %v2409_v29, -inf }
0x180b   :  { %2297 = vadd.xlane.f32.xlu0 %v2296_v48  ;;  %v2535_v6 = vadd.f32 %v2533_v15, %v4709_v18 }
0x180d   :  { %v2539_v51 = vsel %vm758_vm7, %v2535_v6, -inf }
0x180e   :  { %2540 = vmax.xlane.f32.xlu1 %v2539_v51  ;;  %2414 = vmax.xlane.f32.xlu2 %v2413_v57 }
0x1816   :  { %2300 = vadd.xlane.f32.xlu1 %v2299_v56 }
0x181f   :  { %3896 = vrot.lane.b32.xlu0 %v4716_v52, %s4201_s6 }
0x1876   :  { %v2412_v16 = vpop.xlane.xlu0 %2411 }
0x1877   :  { %v2416_v23 = vsub.f32 %v2408_v38, %v2412_v16 }
0x1879   :  { %v2418_v55 = vmul.f32 1.442695, %v2416_v23  ;;  %v2538_v18 = vpop.xlane.xlu2 %2537 }
0x187a   :  { %v2542_v58 = vsub.f32 %v2534_v53, %v2538_v18 }
0x187b   :  { %4083 = vpow2.f32 %v2418_v55 }
0x187c   :  { %v2544_v28 = vmul.f32 1.442695, %v2542_v58 }
0x187e   :  { %4085 = vpow2.f32 %v2544_v28  ;;  %v2298_v24 = vpop.xlane.xlu0 %2297 }
0x187f   :  { %4087 = vrcp.f32 %v2298_v24  ;;  %v2313_v49 = vand.u32 2147483648, %v2298_v24  ;;  %vm2307_vm9 = vweird.f32 %v2298_v24  ;;  %v2311_v11 = vand.u32 2147483647, %v2298_v24 }
0x1881   :  { %v4772_v59 = vpop.eup %4083  ;;  %v2541_v60 = vpop.xlane.xlu1 %2540  ;;  %v2314_v17 = vor.u32 1.1754944e-38, %v2313_v49  ;;  %vm2312_vm10 = vcmp.eq.f32.partialorder %v2311_v11, 8.507059e+37 }
0x1882   :  { %v2415_v61 = vpop.xlane.xlu2 %2414  ;;  %v2543_v27 = vsub.f32 %v2535_v6, %v2541_v60  ;;  %v2422_v63 = vsel %vm758_vm7, %v4772_v59, 0.0 }
0x1883   :  { %v2417_v62 = vsub.f32 %v2409_v29, %v2415_v61  ;;  %2423 = vadd.xlane.f32.xlu1 %v2422_v63 }
0x1884   :  { %v4776_v0 = vpop.eup %4085  ;;  %v2546_v21 = vmul.f32 1.442695, %v2543_v27 }
0x1885   :  { %v2420_v1 = vmul.f32 1.442695, %v2417_v62  ;;  %v4088_v2 = vpop.eup %4087  ;;  %v2548_v35 = vsel %vm758_vm7, %v4776_v0, 0.0 }
0x1886   :  { %v2303_v3 = vmul.f32 %v4088_v2, %v2298_v24  ;;  %4089 = vpow2.f32 %v2546_v21  ;;  %2549 = vadd.xlane.f32.xlu2 %v2548_v35  ;;  %vm2308_vm14 = vweird.f32 %v4088_v2 }
0x1887   :  { %4091 = vpow2.f32 %v2420_v1  ;;  %vm2309_vm12 = vmor %vm2307_vm9, %vm2308_vm14 }
0x1888   :  { %v2304_v20 = vsub.f32 1.0, %v2303_v3 }
0x1889   :  { %v2301_v5 = vpop.xlane.xlu1 %2300 }
0x188a   :  { %v2305_v7 = vmul.f32 %v4088_v2, %v2304_v20  ;;  %4093 = vrcp.f32 %v2301_v5  ;;  %v2328_v37 = vand.u32 2147483648, %v2301_v5  ;;  %v2326_v4 = vand.u32 2147483647, %v2301_v5 }
0x188b   :  { %vm2322_vm15 = vweird.f32 %v2301_v5 }
0x188c   :  { %v4780_v8 = vpop.eup %4089  ;;  %v2306_v9 = vadd.f32 %v4088_v2, %v2305_v7  ;;  %v2329_v44 = vor.u32 1.1754944e-38, %v2328_v37  ;;  %vm2327_vm4 = vcmp.eq.f32.partialorder %v2326_v4, 8.507059e+37 }
0x188d   :  { %v4782_v33 = vpop.eup %4091  ;;  %v2551_v12 = vsel %vm758_vm7, %v4780_v8, 0.0 }
0x188e   :  { %2552 = vadd.xlane.f32.xlu2 %v2551_v12  ;;  %v2425_v14 = vsel %vm758_vm7, %v4782_v33, 0.0  ;;  %v2310_v40 = vsel %vm2309_vm12, %v4088_v2, %v2306_v9 }
0x188f   :  { %2426 = vadd.xlane.f32.xlu1 %v2425_v14  ;;  %v2315_v31 = vsel %vm2312_vm10, %v2314_v17, %v2310_v40 }
0x1890   :  { %v4094_v50 = vpop.eup %4093  ;;  %v2316_v43 = vmul.f32 %v4758_v30, %v2315_v31 }
0x1891   :  { %v2318_v25 = vmul.f32 %v4094_v50, %v2301_v5  ;;  %v3897_v26 = vpop.permute.xlu0 %3896  ;;  %vm2323_vm0 = vweird.f32 %v4094_v50 }
0x1892   :  { %v3898_v32 = vunpack.i.l.bf16 %v3897_v26  ;;  %v3899_v38 = vunpack.i.h.bf16 %v3897_v26  ;;  %vm2324_vm1 = vmor %vm2322_vm15, %vm2323_vm0 }
0x1893   :  { %v2319_v36 = vsub.f32 1.0, %v2318_v25 }
0x1894   :  { %2358 = vmatpush.msra.mxu3 %v3898_v32 }
0x1895   :  { %v2320_v42 = vmul.f32 %v4094_v50, %v2319_v36 }
0x1896   :  { %2359 = vmatpush.msra.mxu3 %v3899_v38 }
0x1897   :  { %3822 = vmatmul.msk.f32.vlgmr.msra.gmra.mxu3 %vm758_vm7, %v2316_v43  ;;  %v2321_v53 = vadd.f32 %v4094_v50, %v2320_v42 }
0x1899   :  { %v2325_v13 = vsel %vm2324_vm1, %v4094_v50, %v2321_v53 }
0x189a   :  { %v2330_v45 = vsel %vm2327_vm4, %v2329_v44, %v2325_v13 }
0x189b   :  { %v2331_v41 = vmul.f32 %v4766_v54, %v2330_v45 }
0x189f   :  { %3823 = vmatmul.msk.f32.gmra.mxu3 %vm758_vm7, %v2331_v41 }
0x18a6   :  { %3901 = vrot.lane.b32.xlu2 %v4716_v52, %s4203_s8 }
0x18a8   :  { %3906 = vrot.lane.b32.xlu1 %v4716_v52, %s4202_s7 }
0x18f6   :  { %v2424_v19 = vpop.xlane.xlu1 %2423 }
0x18f7   :  { %v2439_v14 = vand.u32 2147483648, %v2424_v19  ;;  %vm2433_vm15 = vweird.f32 %v2424_v19  ;;  %v2437_v40 = vand.u32 2147483647, %v2424_v19 }
0x18f9   :  { %v2550_v30 = vpop.xlane.xlu2 %2549  ;;  %v2440_v25 = vor.u32 1.1754944e-38, %v2439_v14  ;;  %vm2438_vm4 = vcmp.eq.f32.partialorder %v2437_v40, 8.507059e+37 }
0x18fa   :  { %4095 = vrcp.f32 %v2550_v30  ;;  %v2565_v6 = vand.u32 2147483648, %v2550_v30  ;;  %v2563_v56 = vand.u32 2147483647, %v2550_v30  ;;  %vm2559_vm5 = vweird.f32 %v2550_v30 }
0x18fb   :  { %4097 = vrcp.f32 %v2424_v19 }
0x18fc   :  { %v2566_v55 = vor.u32 1.1754944e-38, %v2565_v6  ;;  %vm2564_vm6 = vcmp.eq.f32.partialorder %v2563_v56, 8.507059e+37 }
0x1900   :  { %v4096_v46 = vpop.eup %4095 }
0x1901   :  { %v2555_v29 = vmul.f32 %v4096_v46, %v2550_v30  ;;  %v2553_v15 = vpop.xlane.xlu2 %2552  ;;  %v4098_v57 = vpop.eup %4097  ;;  %vm2560_vm13 = vweird.f32 %v4096_v46 }
0x1902   :  { %4099 = vrcp.f32 %v2553_v15  ;;  %v4796_v51 = vpop.xlane.xlu1 %2426  ;;  %v2429_v23 = vmul.f32 %v4098_v57, %v2424_v19  ;;  %vm2561_vm3 = vmor %vm2559_vm5, %vm2560_vm13  ;;  %v2580_v62 = vand.u32 2147483648, %v2553_v15  ;;  %v2578_v35 = vand.u32 2147483647, %v2553_v15 }
0x1903   :  { %v2556_v48 = vsub.f32 1.0, %v2555_v29  ;;  %4101 = vrcp.f32 %v4796_v51  ;;  %vm2574_vm9 = vweird.f32 %v2553_v15  ;;  %vm2434_vm0 = vweird.f32 %v4098_v57  ;;  %v2084_v29 = vld [vmem:[#allocation2 + $0x360] sm:$0xff] }
0x1904   :  { %v2430_v27 = vsub.f32 1.0, %v2429_v23  ;;  %v2581_v5 = vor.u32 1.1754944e-38, %v2580_v62  ;;  %vm2579_vm10 = vcmp.eq.f32.partialorder %v2578_v35, 8.507059e+37  ;;  %vm2435_vm1 = vmor %vm2433_vm15, %vm2434_vm0  ;;  %v2454_v38 = vand.u32 2147483648, %v4796_v51 }
0x1905   :  { %v2557_v54 = vmul.f32 %v4096_v46, %v2556_v48  ;;  %vm2448_vm5 = vweird.f32 %v4796_v51  ;;  %v2452_v43 = vand.u32 2147483647, %v4796_v51 }
0x1906   :  { %v2431_v20 = vmul.f32 %v4098_v57, %v2430_v27  ;;  %v2455_v53 = vor.u32 1.1754944e-38, %v2454_v38 }
0x1907   :  { %v2558_v16 = vadd.f32 %v4096_v46, %v2557_v54 }
0x1908   :  { %v4100_v52 = vpop.eup %4099  ;;  %v2432_v11 = vadd.f32 %v4098_v57, %v2431_v20 }
0x1909   :  { %v2562_v18 = vsel %vm2561_vm3, %v4096_v46, %v2558_v16  ;;  %v2570_v58 = vmul.f32 %v4100_v52, %v2553_v15  ;;  %v3902_v28 = vpop.permute.xlu2 %3901  ;;  %v4102_v21 = vpop.eup %4101  ;;  %vm2575_vm14 = vweird.f32 %v4100_v52  ;;  %v2085_v46 = vld [vmem:[#allocation2 + $0x368] sm:$0xff]  ;;  %v2083_v15 = vld [vmem:[#allocation2 + $0x358] sm:$0xff] }
0x190a   :  { %v2567_v24 = vsel %vm2564_vm6, %v2566_v55, %v2562_v18  ;;  %v3903_v60 = vunpack.i.l.bf16 %v3902_v28  ;;  %v3904_v63 = vunpack.i.h.bf16 %v3902_v28  ;;  %v2444_v7 = vmul.f32 %v4102_v21, %v4796_v51  ;;  %vm2576_vm12 = vmor %vm2574_vm9, %vm2575_vm14  ;;  %2668 = vmatpush.msrb.mxu0 %v2085_v46 }
0x190b   :  { %v2571_v61 = vsub.f32 1.0, %v2570_v58  ;;  %v2568_v2 = vmul.f32 %v4776_v0, %v2567_v24  ;;  %v2436_v50 = vsel %vm2435_vm1, %v4098_v57, %v2432_v11  ;;  %vm2449_vm13 = vweird.f32 %v4102_v21  ;;  %v2734_v11 = vld [vmem:[#allocation2 + $0x3a0] sm:$0xff] }
0x190c   :  { %2610 = vmatpush.msrb.mxu3 %v3903_v60  ;;  %v2445_v12 = vsub.f32 1.0, %v2444_v7  ;;  %v2441_v32 = vsel %vm2438_vm4, %v2440_v25, %v2436_v50  ;;  %vm2450_vm3 = vmor %vm2448_vm5, %vm2449_vm13  ;;  %vm2453_vm6 = vcmp.eq.f32.partialorder %v2452_v43, 8.507059e+37  ;;  %2669 = vmatpush.msrb.mxu0 %v2084_v29  ;;  %v2801_v50 = vld [vmem:[#allocation2 + $0x438] sm:$0xff]  ;;  %v2799_v25 = vld [vmem:[#allocation2 + $0x428] sm:$0xff] }
0x190d   :  { %v2572_v1 = vmul.f32 %v4100_v52, %v2571_v61  ;;  %v2442_v42 = vmul.f32 %v4772_v59, %v2441_v32  ;;  %2802 = vmatpush.msrb.mxu2 %v2801_v50  ;;  %v2798_v32 = vld [vmem:[#allocation2 + $0x420] sm:$0xff] }
0x190e   :  { %2611 = vmatpush.msrb.mxu3 %v3904_v63  ;;  %v2446_v17 = vmul.f32 %v4102_v21, %v2445_v12  ;;  %2670 = vmatpush.msrb.mxu0 %v2083_v15  ;;  %v2733_v12 = vld [vmem:[#allocation2 + $0x398] sm:$0xff] }
0x190f   :  { %3834 = vmatmul.msk.f32.vlgmr.msrb.gmra.mxu3 %vm758_vm7, %v2568_v2  ;;  %v2573_v3 = vadd.f32 %v4100_v52, %v2572_v1 }
0x1910   :  { %v2447_v37 = vadd.f32 %v4102_v21, %v2446_v17  ;;  %v2800_v17 = vld [vmem:[#allocation2 + $0x430] sm:$0xff] }
0x1911   :  { %v2577_v9 = vsel %vm2576_vm12, %v4100_v52, %v2573_v3  ;;  %2803 = vmatpush.msrb.mxu2 %v2800_v17 }
0x1912   :  { %v2582_v49 = vsel %vm2579_vm10, %v2581_v5, %v2577_v9  ;;  %v2451_v4 = vsel %vm2450_vm3, %v4102_v21, %v2447_v37  ;;  %v2736_v9 = vld [vmem:[#allocation2 + $0x3b0] sm:$0xff] }
0x1913   :  { %v2583_v0 = vmul.f32 %v4780_v8, %v2582_v49  ;;  %v2456_v13 = vsel %vm2453_vm6, %v2455_v53, %v2451_v4  ;;  %v2735_v49 = vld [vmem:[#allocation2 + $0x3a8] sm:$0xff]  ;;  %2804 = vmatpush.msrb.mxu2 %v2799_v25 }
0x1914   :  { %v2457_v45 = vmul.f32 %v4782_v33, %v2456_v13  ;;  %v2082_v33 = vld [vmem:[#allocation2 + $0x350] sm:$0xff]  ;;  %v3957_v13 = vld [vmem:[#allocation2 + $0x388] ss:$0 sm:$0xff] }
0x1915   :  { %2671 = vmatpush.msrb.mxu0 %v2082_v33  ;;  %2805 = vmatpush.msrb.mxu2 %v2798_v32 }
0x1917   :  { %3835 = vmatmul.msk.f32.gmra.mxu3 %vm758_vm7, %v2583_v0 }
0x191a   :  { %v3907_v26 = vpop.permute.xlu1 %3906  ;;  %v2361_v31 = vpop.f32.mrf.mxu3 }
0x191b   :  { %v3908_v36 = vunpack.i.l.bf16 %v3907_v26  ;;  %2621 = vrot.lane.b32.xlu0 %v2361_v31, %s4191_s18  ;;  %v3909_v8 = vunpack.i.h.bf16 %v3907_v26 }
0x191d   :  { %2484 = vmatpush.msra.mxu1 %v3908_v36 }
0x191f   :  { %2485 = vmatpush.msra.mxu1 %v3909_v8 }
0x1920   :  { %3828 = vmatmul.msk.f32.vlgmr.msra.gmra.mxu1 %vm758_vm7, %v2442_v42 }
0x1921   :  { %2757 = vmatpush.msrb.mxu1 %v2736_v9 }
0x1922   :  { %v2364_v44 = vpop.f32.mrf.mxu3 }
0x1923   :  { %2623 = vrot.lane.b32.xlu2 %v2364_v44, %s4191_s18  ;;  %2758 = vmatpush.msrb.mxu1 %v2735_v49 }
0x1925   :  { %2759 = vmatpush.msrb.mxu1 %v2734_v11 }
0x1927   :  { %2760 = vmatpush.msrb.mxu1 %v2733_v12 }
0x1928   :  { %3829 = vmatmul.msk.f32.gmra.mxu1 %vm758_vm7, %v2457_v45 }
0x197d   :  { %v2624_v16 = vpop.permute.xlu2 %2623 }
0x197e   :  { %v2644_v52 = vsel %vm228_vm11, %v4752_v39, %v2624_v16  ;;  %v2795_v16 = vld [vmem:[#allocation2 + $0x408] sm:$0xff] }
0x198d   :  { %v2622_v48 = vpop.permute.xlu0 %2621 }
0x198e   :  { %v2643_v51 = vsel %vm228_vm11, %v4750_v34, %v2622_v48  ;;  %v3956_v34 = vld [vmem:[#allocation2 + $0x370] ss:$0 sm:$0xff] }
0x1992   :  { %v2613_v41 = vpop.f32.mrf.mxu3 }
0x1993   :  { %2637 = vrot.lane.b32.xlu0 %v2613_v41, %s4204_s9 }
0x199a   :  { %v2616_v59 = vpop.f32.mrf.mxu3 }
0x199b   :  { %2639 = vrot.lane.b32.xlu1 %v2616_v59, %s4204_s9 }
0x199d   :  { %v2487_v30 = vpop.f32.mrf.mxu1 }
0x199e   :  { %2629 = vrot.lane.b32.xlu0 %v2487_v30, %s4205_s10  ;;  %v3958_v30 = vld [vmem:[#allocation2 + $0x390] ss:$0 sm:$0xff] }
0x19a5   :  { %v2490_v19 = vpop.f32.mrf.mxu1 }
0x19a6   :  { %2631 = vrot.lane.b32.xlu0 %v2490_v19, %s4205_s10 }
0x1a05   :  { %v2638_v6 = vpop.permute.xlu0 %2637 }
0x1a0d   :  { %v2640_v55 = vpop.permute.xlu1 %2639 }
0x1a10   :  { %v2630_v57 = vpop.permute.xlu0 %2629 }
0x1a11   :  { %v2645_v54 = vsel %vm758_vm7, %v2643_v51, %v2630_v57 }
0x1a12   :  { %v2647_v56 = vsel %vm761_vm8, %v2645_v54, %v2638_v6  ;;  %v2797_v54 = vld [vmem:[#allocation2 + $0x418] sm:$0xff] }
0x1a13   :  { %3836 = vmatmul.msk.f32.vlgmr.msrb.gmra.mxu0 %vm123_vm2, %v2647_v56  ;;  %2806 = vmatpush.msrb.mxu2 %v2797_v54  ;;  %v2796_v56 = vld [vmem:[#allocation2 + $0x410] sm:$0xff] }
0x1a15   :  { %2807 = vmatpush.msrb.mxu2 %v2796_v56 }
0x1a17   :  { %2808 = vmatpush.msrb.mxu2 %v2795_v16 }
0x1a18   :  { %v2632_v23 = vpop.permute.xlu0 %2631 }
0x1a19   :  { %v2646_v18 = vsel %vm758_vm7, %v2644_v52, %v2632_v23  ;;  %v2794_v52 = vld [vmem:[#allocation2 + $0x400] sm:$0xff]  ;;  %v2793_v23 = vld [vmem:[#allocation2 + $0x3f8] sm:$0xff] }
0x1a1a   :  { %v2648_v58 = vsel %vm761_vm8, %v2646_v18, %v2640_v55  ;;  %2809 = vmatpush.msrb.mxu2 %v2794_v52  ;;  %v2792_v55 = vld [vmem:[#allocation2 + $0x3f0] sm:$0xff]  ;;  %v2791_v18 = vld [vmem:[#allocation2 + $0x3e8] sm:$0xff] }
0x1a1b   :  { %3837 = vmatmul.msk.f32.gmra.mxu0 %vm123_vm2, %v2648_v58  ;;  %v2790_v58 = vld [vmem:[#allocation2 + $0x3e0] sm:$0xff] }
0x1a1c   :  { %2810 = vmatpush.msrb.mxu2 %v2793_v23 }
0x1a1e   :  { %2811 = vmatpush.msrb.mxu2 %v2792_v55 }
0x1a20   :  { %2812 = vmatpush.msrb.mxu2 %v2791_v18 }
0x1a22   :  { %2813 = vmatpush.msrb.mxu2 %v2790_v58 }
0x1a90   :  { %v2673_v28 = vpop.f32.mrf.mxu0 }
0x1a91   :  { %v2674_v24 = vadd.f32 %v3956_v34, %v2673_v28  ;;  %v2788_v28 = vld [vmem:[#allocation2 + $0x3d0] sm:$0xff] }
0x1a93   :  { %v4828_v60 = vadd.f32 %v2674_v24, %v4671_v22  ;;  %v2787_v24 = vld [vmem:[#allocation2 + $0x3c8] sm:$0xff] }
0x1a95   :  { %v2683_v61 = vsel %vm123_vm2, %v4828_v60, 0.0 }
0x1a96   :  { %2684 = vadd.xlane.f32.xlu2 %v2683_v61  ;;  %v2786_v61 = vld [vmem:[#allocation2 + $0x3c0] sm:$0xff] }
0x1a98   :  { %v2676_v27 = vpop.f32.mrf.mxu0 }
0x1a99   :  { %v2677_v39 = vadd.f32 %v3956_v34, %v2676_v27  ;;  %v2789_v34 = vld [vmem:[#allocation2 + $0x3d8] sm:$0xff] }
0x1a9a   :  { %2814 = vmatpush.msrb.mxu2 %v2789_v34  ;;  %v3959_v27 = vld [vmem:[#allocation2 + $0x3b8] ss:$0 sm:$0xff] }
0x1a9b   :  { %v4833_v62 = vadd.f32 %v2677_v39, %v4673_v10 }
0x1a9c   :  { %2815 = vmatpush.msrb.mxu2 %v2788_v28  ;;  %v3961_v28 = vld [vmem:[#allocation2 + $0x498] ss:$0 sm:$0xff] }
0x1a9d   :  { %v2686_v63 = vsel %vm123_vm2, %v4833_v62, 0.0 }
0x1a9e   :  { %2687 = vadd.xlane.f32.xlu0 %v2686_v63  ;;  %2816 = vmatpush.msrb.mxu2 %v2787_v24 }
0x1aa0   :  { %2817 = vmatpush.msrb.mxu2 %v2786_v61 }
0x1b09   :  { %v2685_v21 = vpop.xlane.xlu2 %2684 }
0x1b0a   :  { %v2689_v1 = vmul.f32 %v2685_v21, %v4253_v47 }
0x1b0c   :  { %v2691_v2 = vsub.f32 %v4828_v60, %v2689_v1 }
0x1b0e   :  { %v2693_v22 = vmul.f32 %v2691_v2, %v2691_v2 }
0x1b10   :  { %v2695_v35 = vsel %vm123_vm2, %v2693_v22, 0.0 }
0x1b11   :  { %2696 = vadd.xlane.f32.xlu1 %v2695_v35  ;;  %v2688_v3 = vpop.xlane.xlu0 %2687 }
0x1b12   :  { %v2690_v20 = vmul.f32 %v2688_v3, %v4253_v47 }
0x1b14   :  { %v2692_v5 = vsub.f32 %v4833_v62, %v2690_v20 }
0x1b16   :  { %v2694_v10 = vmul.f32 %v2692_v5, %v2692_v5 }
0x1b18   :  { %v2698_v7 = vsel %vm123_vm2, %v2694_v10, 0.0 }
0x1b19   :  { %2699 = vadd.xlane.f32.xlu2 %v2698_v7 }
0x1b84   :  { %v2697_v14 = vpop.xlane.xlu1 %2696 }
0x1b85   :  { %v2701_v0 = vmul.f32 %v2697_v14, %v4253_v47 }
0x1b87   :  { %v2703_v40 = vadd.f32 1e-05, %v2701_v0 }
0x1b89   :  { %4103 = vrsqrt.f32 %v2703_v40  ;;  %vm2711_vm9 = vweird.f32 %v2703_v40 }
0x1b8c   :  { %v2700_v26 = vpop.xlane.xlu2 %2699 }
0x1b8d   :  { %v2702_v31 = vmul.f32 %v2700_v26, %v4253_v47  ;;  %v3960_v26 = vld [vmem:[#allocation2 + $0x440] ss:$0 sm:$0xff] }
0x1b8f   :  { %v4104_v36 = vpop.eup %4103  ;;  %v2704_v37 = vadd.f32 1e-05, %v2702_v31 }
0x1b90   :  { %v2706_v38 = vmul.f32 %v4104_v36, %v2703_v40  ;;  %vm2712_vm14 = vweird.f32 %v4104_v36 }
0x1b91   :  { %4105 = vrsqrt.f32 %v2704_v37  ;;  %vm2713_vm12 = vmor %vm2711_vm9, %vm2712_vm14  ;;  %vm2721_vm0 = vweird.f32 %v2704_v37 }
0x1b92   :  { %v2707_v8 = vmul.f32 %v4104_v36, %v2706_v38 }
0x1b94   :  { %v2708_v42 = vmul.f32 0.5, %v2707_v8 }
0x1b96   :  { %v2709_v43 = vsub.f32 1.5, %v2708_v42 }
0x1b97   :  { %v4106_v4 = vpop.eup %4105 }
0x1b98   :  { %v2710_v53 = vmul.f32 %v4104_v36, %v2709_v43  ;;  %v2716_v44 = vmul.f32 %v4106_v4, %v2704_v37  ;;  %vm2722_vm10 = vweird.f32 %v4106_v4 }
0x1b99   :  { %vm2723_vm15 = vmor %vm2721_vm0, %vm2722_vm10 }
0x1b9a   :  { %v2714_v45 = vsel %vm2713_vm12, %v4104_v36, %v2710_v53  ;;  %v2717_v41 = vmul.f32 %v4106_v4, %v2716_v44 }
0x1b9b   :  { %v2725_v59 = vmul.f32 %v2714_v45, %v2691_v2 }
0x1b9c   :  { %v2718_v19 = vmul.f32 0.5, %v2717_v41 }
0x1b9d   :  { %v2728_v46 = vmul.f32 %v3957_v13, %v2725_v59 }
0x1b9e   :  { %v2719_v29 = vsub.f32 1.5, %v2718_v19  ;;  %v2886_v19 = vld [vmem:[#allocation2 + $0x460] sm:$0xff] }
0x1b9f   :  { %v2731_v15 = vadd.f32 %v3958_v30, %v2728_v46  ;;  %2912 = vmatpush.msra.mxu3 %v2886_v19  ;;  %v2885_v46 = vld [vmem:[#allocation2 + $0x458] sm:$0xff] }
0x1ba0   :  { %v2720_v33 = vmul.f32 %v4106_v4, %v2719_v29  ;;  %v2884_v29 = vld [vmem:[#allocation2 + $0x450] sm:$0xff] }
0x1ba1   :  { %3838 = vmatmul.msk.f32.vlgmr.msrb.gmra.mxu1 %vm123_vm2, %v2731_v15  ;;  %2913 = vmatpush.msra.mxu3 %v2885_v46  ;;  %v2883_v15 = vld [vmem:[#allocation2 + $0x448] sm:$0xff] }
0x1ba2   :  { %v2724_v48 = vsel %vm2723_vm15, %v4106_v4, %v2720_v33 }
0x1ba3   :  { %v2726_v6 = vmul.f32 %v2724_v48, %v2692_v5  ;;  %2914 = vmatpush.msra.mxu3 %v2884_v29 }
0x1ba5   :  { %v2729_v51 = vmul.f32 %v3957_v13, %v2726_v6  ;;  %2915 = vmatpush.msra.mxu3 %v2883_v15 }
0x1ba7   :  { %v2732_v57 = vadd.f32 %v3958_v30, %v2729_v51 }
0x1ba9   :  { %3839 = vmatmul.msk.f32.gmra.mxu1 %vm123_vm2, %v2732_v57 }
0x1c1e   :  { %v2762_v39 = vpop.f32.mrf.mxu1 }
0x1c1f   :  { %v2763_v63 = vadd.f32 %v3959_v27, %v2762_v39  ;;  %v3962_v39 = vld [vmem:[#allocation2 + $0x4a0] ss:$0 sm:$0xff] }
0x1c21   :  { %v2770_v21 = vmul.f32 0.044715, %v2763_v63  ;;  %v2768_v12 = vmul.f32 0.5, %v2763_v63 }
0x1c23   :  { %v2772_v1 = vmul.f32 %v2770_v21, %v2763_v63 }
0x1c25   :  { %v2774_v2 = vmul.f32 %v2772_v1, %v2763_v63 }
0x1c26   :  { %v2765_v22 = vpop.f32.mrf.mxu1 }
0x1c27   :  { %v2766_v35 = vadd.f32 %v3959_v27, %v2765_v22  ;;  %v2776_v3 = vadd.f32 %v2774_v2, %v2763_v63 }
0x1c29   :  { %v2778_v20 = vmul.f32 0.7978846, %v2776_v3  ;;  %v2771_v5 = vmul.f32 0.044715, %v2766_v35  ;;  %v2769_v50 = vmul.f32 0.5, %v2766_v35 }
0x1c2b   :  { %4107 = vtanh.f32 %v2778_v20  ;;  %v2773_v10 = vmul.f32 %v2771_v5, %v2766_v35 }
0x1c2d   :  { %v2775_v7 = vmul.f32 %v2773_v10, %v2766_v35  ;;  %v3963_v10 = vld [vmem:[#allocation2 + $0x468] ss:$0 sm:$0xff] }
0x1c2f   :  { %v2777_v9 = vadd.f32 %v2775_v7, %v2766_v35 }
0x1c31   :  { %v4108_v49 = vpop.eup %4107  ;;  %v2779_v11 = vmul.f32 0.7978846, %v2777_v9 }
0x1c32   :  { %v2782_v14 = vadd.f32 1.0, %v4108_v49 }
0x1c33   :  { %4109 = vtanh.f32 %v2779_v11 }
0x1c34   :  { %v2784_v0 = vmul.f32 %v2782_v14, %v2768_v12 }
0x1c36   :  { %2818 = vmatmul.f32.vlgmr.msrb.gmra.mxu2 %v2784_v0 }
0x1c39   :  { %v4110_v40 = vpop.eup %4109 }
0x1c3a   :  { %v2783_v17 = vadd.f32 1.0, %v4110_v40 }
0x1c3c   :  { %v2785_v25 = vmul.f32 %v2783_v17, %v2769_v50 }
0x1c3e   :  { %2821 = vmatmul.f32.gmra.mxu2 %v2785_v25 }
0x1cb9   :  { %v2819_v31 = vpop.f32.mrf.mxu2 }
0x1cba   :  { %v2825_v32 = vadd.f32 %v2819_v31, %v4828_v60 }
0x1cbc   :  { %v4848_v36 = vadd.f32 %v3960_v26, %v2825_v32 }
0x1cbe   :  { %v2833_v37 = vsel %vm123_vm2, %v4848_v36, 0.0 }
0x1cbf   :  { %2834 = vadd.xlane.f32.xlu2 %v2833_v37 }
0x1cc1   :  { %v2822_v38 = vpop.f32.mrf.mxu2 }
0x1cc2   :  { %v2826_v8 = vadd.f32 %v2822_v38, %v4833_v62 }
0x1cc4   :  { %v4853_v42 = vadd.f32 %v3960_v26, %v2826_v8 }
0x1cc6   :  { %v2836_v43 = vsel %vm123_vm2, %v4853_v42, 0.0 }
0x1cc7   :  { %2837 = vadd.xlane.f32.xlu0 %v2836_v43 }
0x1d32   :  { %v2835_v4 = vpop.xlane.xlu2 %2834 }
0x1d33   :  { %v2839_v53 = vmul.f32 %v2835_v4, %v4253_v47  ;;  %v4909_v4 = vld [vmem:[#allocation2 + $0x628] sm:$0xff] }
0x1d35   :  { %v2841_v60 = vsub.f32 %v4848_v36, %v2839_v53 }
0x1d37   :  { %v2843_v44 = vmul.f32 %v2841_v60, %v2841_v60 }
0x1d39   :  { %v2845_v13 = vsel %vm123_vm2, %v2843_v44, 0.0 }
0x1d3a   :  { %2846 = vadd.xlane.f32.xlu1 %v2845_v13  ;;  %v2838_v45 = vpop.xlane.xlu0 %2837 }
0x1d3b   :  { %v2840_v41 = vmul.f32 %v2838_v45, %v4253_v47  ;;  %v4913_v45 = vld [vmem:[#allocation2 + $0x630] sm:$0xff] }
0x1d3d   :  { %v2842_v62 = vsub.f32 %v4853_v42, %v2840_v41 }
0x1d3f   :  { %v2844_v59 = vmul.f32 %v2842_v62, %v2842_v62 }
0x1d41   :  { %v2848_v30 = vsel %vm123_vm2, %v2844_v59, 0.0 }
0x1d42   :  { %2849 = vadd.xlane.f32.xlu2 %v2848_v30 }
0x1dad   :  { %v2847_v33 = vpop.xlane.xlu1 %2846 }
0x1dae   :  { %v2851_v48 = vmul.f32 %v2847_v33, %v4253_v47 }
0x1db0   :  { %v2853_v6 = vadd.f32 1e-05, %v2851_v48 }
0x1db2   :  { %4111 = vrsqrt.f32 %v2853_v6  ;;  %vm2861_vm4 = vweird.f32 %v2853_v6 }
0x1db5   :  { %v2850_v51 = vpop.xlane.xlu2 %2849 }
0x1db6   :  { %v2852_v57 = vmul.f32 %v2850_v51, %v4253_v47 }
0x1db8   :  { %v4112_v54 = vpop.eup %4111  ;;  %v2854_v56 = vadd.f32 1e-05, %v2852_v57 }
0x1db9   :  { %v2856_v16 = vmul.f32 %v4112_v54, %v2853_v6  ;;  %vm2862_vm1 = vweird.f32 %v4112_v54 }
0x1dba   :  { %4113 = vrsqrt.f32 %v2854_v56  ;;  %vm2863_vm13 = vmor %vm2861_vm4, %vm2862_vm1  ;;  %vm2871_vm3 = vweird.f32 %v2854_v56 }
0x1dbb   :  { %v2857_v52 = vmul.f32 %v4112_v54, %v2856_v16 }
0x1dbd   :  { %v2858_v23 = vmul.f32 0.5, %v2857_v52 }
0x1dbf   :  { %v2859_v55 = vsub.f32 1.5, %v2858_v23 }
0x1dc0   :  { %v4114_v18 = vpop.eup %4113 }
0x1dc1   :  { %v2860_v58 = vmul.f32 %v4112_v54, %v2859_v55  ;;  %v2866_v34 = vmul.f32 %v4114_v18, %v2854_v56  ;;  %vm2872_vm5 = vweird.f32 %v4114_v18 }
0x1dc2   :  { %vm2873_vm6 = vmor %vm2871_vm3, %vm2872_vm5 }
0x1dc3   :  { %v2864_v24 = vsel %vm2863_vm13, %v4112_v54, %v2860_v58  ;;  %v2867_v61 = vmul.f32 %v4114_v18, %v2866_v34 }
0x1dc4   :  { %v2875_v27 = vmul.f32 %v2864_v24, %v2841_v60 }
0x1dc5   :  { %v2868_v63 = vmul.f32 0.5, %v2867_v61 }
0x1dc6   :  { %v2878_v21 = vmul.f32 %v3961_v28, %v2875_v27 }
0x1dc7   :  { %v2869_v1 = vsub.f32 1.5, %v2868_v63 }
0x1dc8   :  { %v2881_v2 = vadd.f32 %v3962_v39, %v2878_v21 }
0x1dc9   :  { %v2870_v22 = vmul.f32 %v4114_v18, %v2869_v1 }
0x1dca   :  { %3840 = vmatmul.msk.f32.vlgmr.msra.gmra.mxu3 %vm123_vm2, %v2881_v2 }
0x1dcb   :  { %v2874_v35 = vsel %vm2873_vm6, %v4114_v18, %v2870_v22 }
0x1dcc   :  { %v2876_v3 = vmul.f32 %v2874_v35, %v2842_v62 }
0x1dce   :  { %v2879_v20 = vmul.f32 %v3961_v28, %v2876_v3 }
0x1dd0   :  { %v2882_v5 = vadd.f32 %v3962_v39, %v2879_v20 }
0x1dd2   :  { %3841 = vmatmul.msk.f32.gmra.mxu3 %vm123_vm2, %v2882_v5 }
0x1e4d   :  { %v2917_v7 = vpop.f32.mrf.mxu3 }
0x1e4e   :  { %v4867_v9 = vadd.f32 %v3963_v10, %v2917_v7 }
0x1e50   :  { %2925 = vrot.lane.b32.xlu1 %v4867_v9, %s4193_s0 }
0x1e55   :  { %v2920_v49 = vpop.f32.mrf.mxu3 }
0x1e56   :  { %v4871_v11 = vadd.f32 %v3963_v10, %v2920_v49 }
0x1e58   :  { %3051 = vrot.lane.b32.xlu1 %v4867_v9, %s4195_s27  ;;  %2927 = vrot.lane.b32.xlu0 %v4871_v11, %s4193_s0  ;;  %v4879_v12 = vpack.i.bf16 %v4867_v9, %v4871_v11 }
0x1e5a   :  { %3911 = vrot.lane.b32.xlu2 %v4879_v12, %s4194_s26 }
0x1e60   :  { %3047 = vrot.lane.b32.xlu1 %v4867_v9, %s4198_s30 }
0x1e62   :  { %3179 = vrot.lane.b32.xlu2 %v4871_v11, %s4196_s28 }
0x1e68   :  { %3053 = vrot.lane.b32.xlu1 %v4871_v11, %s4195_s27 }
0x1e70   :  { %3049 = vrot.lane.b32.xlu1 %v4871_v11, %s4198_s30 }
0x1e78   :  { %3305 = vrot.lane.b32.xlu1 %v4871_v11, %s4199_s4 }
0x1e80   :  { %3173 = vrot.lane.b32.xlu1 %v4867_v9, %s4197_s29 }
0x1e88   :  { %3175 = vrot.lane.b32.xlu1 %v4871_v11, %s4197_s29 }
0x1eb4   :  { %v3912_v14 = vpop.permute.xlu2 %3911 }
0x1eb5   :  { %v3913_v0 = vunpack.i.l.bf16 %v3912_v14  ;;  %v3914_v40 = vunpack.i.h.bf16 %v3912_v14 }
0x1eb7   :  { %3038 = vmatpush.msra.mxu1 %v3913_v0 }
0x1eb9   :  { %3039 = vmatpush.msra.mxu1 %v3914_v40 }
0x1ebc   :  { %v3180_v50 = vpop.permute.xlu2 %3179 }
0x1ebd   :  { %3854 = vmatpush.xpose.msk.msrb.mxu1 %vm228_vm11, %v3180_v50 }
0x1ec2   :  { %v2926_v17 = vpop.permute.xlu1 %2925 }
0x1eca   :  { %v3052_v25 = vpop.permute.xlu1 %3051  ;;  %v2928_v26 = vpop.permute.xlu0 %2927 }
0x1ecb   :  { %3842 = vmatpush.xpose.msk.msra.mxu0 %vm228_vm11, %v2928_v26 }
0x1ecf   :  { %3843 = vmatpush.xpose.msk.msra.mxu0 %vm228_vm11, %v2926_v17 }
0x1ed2   :  { %v3048_v31 = vpop.permute.xlu1 %3047  ;;  %3844 = vmatmul.msk.f32.vlgmr.msra.gmra.mxu0 %vm228_vm11, %v4867_v9 }
0x1eda   :  { %v3054_v32 = vpop.permute.xlu1 %3053  ;;  %3845 = vmatmul.msk.f32.gmra.mxu0 %vm228_vm11, %v4871_v11 }
0x1edb   :  { %3848 = vmatpush.xpose.msk.msrb.mxu3 %vm228_vm11, %v3054_v32 }
0x1edf   :  { %3849 = vmatpush.xpose.msk.msrb.mxu3 %vm228_vm11, %v3052_v25 }
0x1ee2   :  { %3850 = vmatmul.msk.f32.vlgmr.msrb.gmra.mxu3 %vm228_vm11, %v3048_v31  ;;  %v3050_v37 = vpop.permute.xlu1 %3049 }
0x1eea   :  { %3851 = vmatmul.msk.f32.gmra.mxu3 %vm228_vm11, %v3050_v37  ;;  %v3306_v38 = vpop.permute.xlu1 %3305 }
0x1eeb   :  { %3860 = vmatpush.xpose.msk.msra.mxu3 %vm228_vm11, %v3306_v38 }
0x1ef2   :  { %v3174_v24 = vpop.permute.xlu1 %3173 }
0x1efa   :  { %v3176_v22 = vpop.permute.xlu1 %3175 }
0x1f4f   :  { %v2954_v8 = vpop.f32.mrf.mxu0 }
0x1f50   :  { %v2960_v43 = vmul.f32 0.35355338, %v2954_v8 }
0x1f52   :  { %v2962_v53 = vadd.f32 %v4909_v4, %v2960_v43 }
0x1f54   :  { %v2964_v60 = vsel %vm758_vm7, %v2962_v53, -inf }
0x1f55   :  { %2965 = vmax.xlane.f32.xlu2 %v2964_v60 }
0x1f57   :  { %v2957_v44 = vpop.f32.mrf.mxu0 }
0x1f58   :  { %v2961_v13 = vmul.f32 0.35355338, %v2957_v44 }
0x1f5a   :  { %v2963_v41 = vadd.f32 %v4913_v45, %v2961_v13 }
0x1f5c   :  { %v2967_v62 = vsel %vm758_vm7, %v2963_v41, -inf }
0x1f5d   :  { %2968 = vmax.xlane.f32.xlu2 %v2967_v62 }
0x1f65   :  { %v3080_v59 = vpop.f32.mrf.mxu3 }
0x1f66   :  { %v3086_v30 = vmul.f32 0.35355338, %v3080_v59 }
0x1f68   :  { %v4918_v19 = vadd.f32 %v4909_v4, %v3086_v30 }
0x1f6a   :  { %v3090_v46 = vsel %vm758_vm7, %v4918_v19, -inf }
0x1f6b   :  { %3091 = vmax.xlane.f32.xlu1 %v3090_v46 }
0x1f6d   :  { %v3083_v55 = vpop.f32.mrf.mxu3 }
0x1f6e   :  { %v3087_v18 = vmul.f32 0.35355338, %v3083_v55 }
0x1f70   :  { %v4935_v58 = vadd.f32 %v4913_v45, %v3087_v18 }
0x1f72   :  { %v3093_v34 = vsel %vm758_vm7, %v4935_v58, -inf }
0x1f75   :  { %3303 = vrot.lane.b32.xlu2 %v4867_v9, %s4199_s4 }
0x1f7d   :  { %3299 = vrot.lane.b32.xlu2 %v4867_v9, %s4200_s5 }
0x1fc8   :  { %v2966_v29 = vpop.xlane.xlu2 %2965 }
0x1fc9   :  { %v2970_v15 = vsub.f32 %v2962_v53, %v2966_v29 }
0x1fcb   :  { %v2972_v33 = vmul.f32 1.442695, %v2970_v15 }
0x1fcd   :  { %4115 = vpow2.f32 %v2972_v33 }
0x1fd0   :  { %v2969_v48 = vpop.xlane.xlu2 %2968 }
0x1fd1   :  { %v2971_v6 = vsub.f32 %v2963_v41, %v2969_v48 }
0x1fd3   :  { %v4116_v51 = vpop.eup %4115  ;;  %v2974_v57 = vmul.f32 1.442695, %v2971_v6 }
0x1fd4   :  { %v2976_v54 = vsel %vm758_vm7, %v4116_v51, 0.0 }
0x1fd5   :  { %4117 = vpow2.f32 %v2974_v57  ;;  %2977 = vadd.xlane.f32.xlu0 %v2976_v54 }
0x1fd8   :  { %v3304_v56 = vpop.permute.xlu2 %3303 }
0x1fd9   :  { %3861 = vmatpush.xpose.msk.msra.mxu3 %vm228_vm11, %v3304_v56 }
0x1fdb   :  { %v4118_v16 = vpop.eup %4117 }
0x1fdc   :  { %v2979_v52 = vsel %vm758_vm7, %v4118_v16, 0.0 }
0x1fdd   :  { %2980 = vadd.xlane.f32.xlu2 %v2979_v52 }
0x1fde   :  { %v3092_v17 = vpop.xlane.xlu1 %3091 }
0x1fdf   :  { %v3096_v31 = vsub.f32 %v4918_v19, %v3092_v17 }
0x1fe0   :  { %v3300_v23 = vpop.permute.xlu2 %3299 }
0x1fe1   :  { %3862 = vmatmul.msk.f32.vlgmr.msra.gmra.mxu3 %vm228_vm11, %v3300_v23  ;;  %v3098_v8 = vmul.f32 1.442695, %v3096_v31 }
0x1fe9   :  { %3177 = vrot.lane.b32.xlu0 %v4867_v9, %s4196_s28 }
0x1ff5   :  { %3301 = vrot.lane.b32.xlu2 %v4871_v11, %s4200_s5 }
0x2013   :  { %3094 = vmax.xlane.f32.xlu0 %v3093_v34 }
0x2048   :  { %v2978_v28 = vpop.xlane.xlu0 %2977 }
0x2049   :  { %4119 = vrcp.f32 %v2978_v28  ;;  %v2993_v21 = vand.u32 2147483648, %v2978_v28  ;;  %v2991_v2 = vand.u32 2147483647, %v2978_v28  ;;  %vm2987_vm9 = vweird.f32 %v2978_v28 }
0x204b   :  { %v2994_v20 = vor.u32 1.1754944e-38, %v2993_v21  ;;  %vm2992_vm10 = vcmp.eq.f32.partialorder %v2991_v2, 8.507059e+37 }
0x204f   :  { %v4120_v61 = vpop.eup %4119 }
0x2050   :  { %v2983_v27 = vmul.f32 %v4120_v61, %v2978_v28  ;;  %v2981_v39 = vpop.xlane.xlu2 %2980  ;;  %vm2988_vm14 = vweird.f32 %v4120_v61 }
0x2051   :  { %4121 = vrcp.f32 %v2981_v39  ;;  %vm2989_vm12 = vmor %vm2987_vm9, %vm2988_vm14  ;;  %v3008_v14 = vand.u32 2147483648, %v2981_v39  ;;  %v3006_v50 = vand.u32 2147483647, %v2981_v39  ;;  %vm3002_vm15 = vweird.f32 %v2981_v39 }
0x2052   :  { %v2984_v63 = vsub.f32 1.0, %v2983_v27  ;;  %4123 = vpow2.f32 %v3098_v8 }
0x2053   :  { %v3009_v26 = vor.u32 1.1754944e-38, %v3008_v14  ;;  %vm3007_vm4 = vcmp.eq.f32.partialorder %v3006_v50, 8.507059e+37 }
0x2054   :  { %v2985_v1 = vmul.f32 %v4120_v61, %v2984_v63 }
0x2056   :  { %v2986_v35 = vadd.f32 %v4120_v61, %v2985_v1 }
0x2057   :  { %v4122_v3 = vpop.eup %4121 }
0x2058   :  { %v2990_v5 = vsel %vm2989_vm12, %v4120_v61, %v2986_v35  ;;  %v2998_v10 = vmul.f32 %v4122_v3, %v2981_v39  ;;  %v3302_v7 = vpop.permute.xlu2 %3301  ;;  %vm3003_vm0 = vweird.f32 %v4122_v3  ;;  %v4947_v13 = vpop.eup %4123 }
0x2059   :  { %v2995_v9 = vsel %vm2992_vm10, %v2994_v20, %v2990_v5  ;;  %3863 = vmatmul.msk.f32.gmra.mxu3 %vm228_vm11, %v3302_v7  ;;  %vm3004_vm1 = vmor %vm3002_vm15, %vm3003_vm0  ;;  %v3102_v41 = vsel %vm758_vm7, %v4947_v13, 0.0 }
0x205a   :  { %v2999_v49 = vsub.f32 1.0, %v2998_v10  ;;  %v2996_v11 = vmul.f32 %v4116_v51, %v2995_v9 }
0x205b   :  { %v3178_v0 = vpop.permute.xlu0 %3177 }
0x205c   :  { %v3000_v40 = vmul.f32 %v4122_v3, %v2999_v49  ;;  %3846 = vmatmul.msk.f32.vlgmr.msra.gmra.mxu1 %vm758_vm7, %v2996_v11 }
0x205d   :  { %3855 = vmatpush.xpose.msk.msrb.mxu1 %vm228_vm11, %v3178_v0 }
0x205e   :  { %v3001_v25 = vadd.f32 %v4122_v3, %v3000_v40 }
0x2060   :  { %v3005_v32 = vsel %vm3004_vm1, %v4122_v3, %v3001_v25 }
0x2061   :  { %v3010_v37 = vsel %vm3007_vm4, %v3009_v26, %v3005_v32 }
0x2062   :  { %v3011_v38 = vmul.f32 %v4118_v16, %v3010_v37 }
0x2064   :  { %3847 = vmatmul.msk.f32.gmra.mxu1 %vm758_vm7, %v3011_v38  ;;  %v3332_v43 = vpop.f32.mrf.mxu3 }
0x2065   :  { %v3338_v53 = vmul.f32 0.35355338, %v3332_v43 }
0x2067   :  { %v3340_v60 = vadd.f32 %v4909_v4, %v3338_v53 }
0x2069   :  { %v3342_v44 = vsel %vm758_vm7, %v3340_v60, -inf }
0x206a   :  { %3343 = vmax.xlane.f32.xlu1 %v3342_v44 }
0x206c   :  { %3856 = vmatmul.msk.f32.vlgmr.msrb.gmra.mxu1 %vm228_vm11, %v3174_v24 }
0x2072   :  { %3103 = vadd.xlane.f32.xlu1 %v3102_v41 }
0x2074   :  { %3857 = vmatmul.msk.f32.gmra.mxu1 %vm228_vm11, %v3176_v22 }
0x2086   :  { %v3095_v48 = vpop.xlane.xlu0 %3094 }
0x2087   :  { %v3097_v54 = vsub.f32 %v4935_v58, %v3095_v48 }
0x2089   :  { %v3100_v52 = vmul.f32 1.442695, %v3097_v54 }
0x20d9   :  { %v4952_v62 = vpop.f32.mrf.mxu1 }
0x20dc   :  { %v3335_v51 = vpop.f32.mrf.mxu3 }
0x20dd   :  { %v3344_v59 = vpop.xlane.xlu1 %3343  ;;  %v3339_v56 = vmul.f32 0.35355338, %v3335_v51 }
0x20de   :  { %v3348_v30 = vsub.f32 %v3340_v60, %v3344_v59 }
0x20df   :  { %v3341_v55 = vadd.f32 %v4913_v45, %v3339_v56 }
0x20e0   :  { %v3350_v19 = vmul.f32 1.442695, %v3348_v30 }
0x20e1   :  { %v4954_v46 = vpop.f32.mrf.mxu1  ;;  %v3345_v24 = vsel %vm758_vm7, %v3341_v55, -inf }
0x20e2   :  { %4125 = vpow2.f32 %v3350_v19 }
0x20e3   :  { %4127 = vpow2.f32 %v3100_v52 }
0x20e8   :  { %v4956_v29 = vpop.eup %4125 }
0x20e9   :  { %v3206_v15 = vpop.f32.mrf.mxu1  ;;  %v3354_v33 = vsel %vm758_vm7, %v4956_v29, 0.0 }
0x20ea   :  { %v3212_v6 = vmul.f32 0.35355338, %v3206_v15  ;;  %3355 = vadd.xlane.f32.xlu1 %v3354_v33 }
0x20ec   :  { %v3214_v57 = vadd.f32 %v4909_v4, %v3212_v6  ;;  %v4967_v4 = vpop.eup %4127 }
0x20ed   :  { %v3105_v58 = vsel %vm758_vm7, %v4967_v4, 0.0 }
0x20ee   :  { %v3216_v16 = vsel %vm758_vm7, %v3214_v57, -inf }
0x20ef   :  { %3217 = vmax.xlane.f32.xlu2 %v3216_v16 }
0x20f1   :  { %v3209_v23 = vpop.f32.mrf.mxu1 }
0x20f2   :  { %v3213_v18 = vmul.f32 0.35355338, %v3209_v23 }
0x20f4   :  { %v3215_v34 = vadd.f32 %v4913_v45, %v3213_v18  ;;  %v3104_v45 = vpop.xlane.xlu1 %3103 }
0x20f5   :  { %v3119_v31 = vand.u32 2147483648, %v3104_v45  ;;  %vm3113_vm5 = vweird.f32 %v3104_v45  ;;  %v3117_v32 = vand.u32 2147483647, %v3104_v45 }
0x20f6   :  { %v3219_v28 = vsel %vm758_vm7, %v3215_v34, -inf }
0x20f7   :  { %3220 = vmax.xlane.f32.xlu0 %v3219_v28  ;;  %3346 = vmax.xlane.f32.xlu2 %v3345_v24  ;;  %v3120_v8 = vor.u32 1.1754944e-38, %v3119_v31  ;;  %vm3118_vm6 = vcmp.eq.f32.partialorder %v3117_v32, 8.507059e+37 }
0x20ff   :  { %3106 = vadd.xlane.f32.xlu0 %v3105_v58 }
0x2113   :  { %3916 = vrot.lane.b32.xlu0 %v4879_v12, %s4201_s6 }
0x215d   :  { %v3356_v51 = vpop.xlane.xlu1 %3355 }
0x2162   :  { %v3218_v61 = vpop.xlane.xlu2 %3217 }
0x2163   :  { %v3222_v27 = vsub.f32 %v3214_v57, %v3218_v61 }
0x2165   :  { %v3224_v39 = vmul.f32 1.442695, %v3222_v27 }
0x2167   :  { %4129 = vpow2.f32 %v3224_v39 }
0x2168   :  { %4131 = vrcp.f32 %v3104_v45 }
0x216a   :  { %v3221_v63 = vpop.xlane.xlu0 %3220  ;;  %v3347_v21 = vpop.xlane.xlu2 %3346 }
0x216b   :  { %v3223_v1 = vsub.f32 %v3215_v34, %v3221_v63  ;;  %v3349_v2 = vsub.f32 %v3341_v55, %v3347_v21 }
0x216d   :  { %v4973_v22 = vpop.eup %4129  ;;  %v3226_v35 = vmul.f32 1.442695, %v3223_v1  ;;  %v3352_v3 = vmul.f32 1.442695, %v3349_v2 }
0x216e   :  { %v3228_v20 = vsel %vm758_vm7, %v4973_v22, 0.0  ;;  %v4132_v5 = vpop.eup %4131 }
0x216f   :  { %4133 = vpow2.f32 %v3226_v35  ;;  %3229 = vadd.xlane.f32.xlu2 %v3228_v20  ;;  %v3109_v7 = vmul.f32 %v4132_v5, %v3104_v45  ;;  %vm3114_vm13 = vweird.f32 %v4132_v5 }
0x2170   :  { %4135 = vpow2.f32 %v3352_v3  ;;  %vm3115_vm3 = vmor %vm3113_vm5, %vm3114_vm13 }
0x2171   :  { %v3110_v14 = vsub.f32 1.0, %v3109_v7 }
0x2172   :  { %v3107_v10 = vpop.xlane.xlu0 %3106 }
0x2173   :  { %4137 = vrcp.f32 %v3107_v10  ;;  %v3111_v50 = vmul.f32 %v4132_v5, %v3110_v14  ;;  %v3134_v41 = vand.u32 2147483648, %v3107_v10  ;;  %vm3128_vm9 = vweird.f32 %v3107_v10 }
0x2174   :  { %v3132_v19 = vand.u32 2147483647, %v3107_v10 }
0x2175   :  { %v4977_v9 = vpop.eup %4133  ;;  %v3112_v25 = vadd.f32 %v4132_v5, %v3111_v50  ;;  %v3135_v33 = vor.u32 1.1754944e-38, %v3134_v41 }
0x2176   :  { %v4979_v49 = vpop.eup %4135  ;;  %v3231_v11 = vsel %vm758_vm7, %v4977_v9, 0.0  ;;  %vm3133_vm10 = vcmp.eq.f32.partialorder %v3132_v19, 8.507059e+37 }
0x2177   :  { %3232 = vadd.xlane.f32.xlu2 %v3231_v11  ;;  %v3357_v0 = vsel %vm758_vm7, %v4979_v49, 0.0  ;;  %v3116_v37 = vsel %vm3115_vm3, %v4132_v5, %v3112_v25  ;;  %v3371_v25 = vand.u32 2147483648, %v3356_v51 }
0x2178   :  { %3358 = vadd.xlane.f32.xlu1 %v3357_v0  ;;  %v3121_v53 = vsel %vm3118_vm6, %v3120_v8, %v3116_v37 }
0x2179   :  { %v4138_v40 = vpop.eup %4137  ;;  %v3122_v30 = vmul.f32 %v4947_v13, %v3121_v53  ;;  %v3372_v37 = vor.u32 1.1754944e-38, %v3371_v25 }
0x217a   :  { %v3124_v17 = vmul.f32 %v4138_v40, %v3107_v10  ;;  %vm3129_vm14 = vweird.f32 %v4138_v40 }
0x217b   :  { %vm3130_vm12 = vmor %vm3128_vm9, %vm3129_vm14  ;;  %vm3365_vm9 = vweird.f32 %v3356_v51 }
0x217c   :  { %v3125_v26 = vsub.f32 1.0, %v3124_v17 }
0x217e   :  { %v3126_v38 = vmul.f32 %v4138_v40, %v3125_v26  ;;  %v3369_v26 = vand.u32 2147483647, %v3356_v51 }
0x2180   :  { %v3127_v44 = vadd.f32 %v4138_v40, %v3126_v38 }
0x2182   :  { %v3131_v15 = vsel %vm3130_vm12, %v4138_v40, %v3127_v44 }
0x2183   :  { %v3136_v48 = vsel %vm3133_vm10, %v3135_v33, %v3131_v15  ;;  %vm3370_vm10 = vcmp.eq.f32.partialorder %v3369_v26, 8.507059e+37 }
0x2184   :  { %v3137_v6 = vmul.f32 %v4967_v4, %v3136_v48 }
0x2185   :  { %v3917_v43 = vpop.permute.xlu0 %3916 }
0x2186   :  { %v3918_v60 = vunpack.i.l.bf16 %v3917_v43  ;;  %v3919_v59 = vunpack.i.h.bf16 %v3917_v43 }
0x2188   :  { %3164 = vmatpush.msrb.mxu0 %v3918_v60 }
0x218a   :  { %3165 = vmatpush.msrb.mxu0 %v3919_v59 }
0x218b   :  { %3852 = vmatmul.msk.f32.vlgmr.msrb.gmra.mxu0 %vm758_vm7, %v3122_v30 }
0x218f   :  { %3921 = vrot.lane.b32.xlu2 %v4879_v12, %s4202_s7 }
0x2191   :  { %3926 = vrot.lane.b32.xlu1 %v4879_v12, %s4203_s8 }
0x2193   :  { %3853 = vmatmul.msk.f32.gmra.mxu0 %vm758_vm7, %v3137_v6 }
0x21e2   :  { %v3230_v13 = vpop.xlane.xlu2 %3229 }
0x21e3   :  { %4139 = vrcp.f32 %v3230_v13  ;;  %v3245_v18 = vand.u32 2147483648, %v3230_v13  ;;  %v3243_v12 = vand.u32 2147483647, %v3230_v13  ;;  %vm3239_vm15 = vweird.f32 %v3230_v13 }
0x21e4   :  { %4141 = vrcp.f32 %v3356_v51 }
0x21e5   :  { %v3246_v58 = vor.u32 1.1754944e-38, %v3245_v18  ;;  %vm3244_vm4 = vcmp.eq.f32.partialorder %v3243_v12, 8.507059e+37 }
0x21e9   :  { %v4140_v57 = vpop.eup %4139 }
0x21ea   :  { %v3235_v54 = vmul.f32 %v4140_v57, %v3230_v13  ;;  %v3233_v56 = vpop.xlane.xlu2 %3232  ;;  %v4142_v23 = vpop.eup %4141  ;;  %vm3240_vm0 = vweird.f32 %v4140_v57 }
0x21eb   :  { %4143 = vrcp.f32 %v3233_v56  ;;  %v4993_v52 = vpop.xlane.xlu1 %3358  ;;  %v3361_v24 = vmul.f32 %v4142_v23, %v3356_v51  ;;  %vm3241_vm1 = vmor %vm3239_vm15, %vm3240_vm0  ;;  %v3260_v35 = vand.u32 2147483648, %v3233_v56  ;;  %v3258_v20 = vand.u32 2147483647, %v3233_v56 }
0x21ec   :  { %v3236_v16 = vsub.f32 1.0, %v3235_v54  ;;  %4145 = vrcp.f32 %v4993_v52  ;;  %vm3254_vm5 = vweird.f32 %v3233_v56  ;;  %vm3366_vm14 = vweird.f32 %v4142_v23  ;;  %v2890_v54 = vld [vmem:[#allocation2 + $0x480] sm:$0xff] }
0x21ed   :  { %v3362_v21 = vsub.f32 1.0, %v3361_v24  ;;  %v3261_v14 = vor.u32 1.1754944e-38, %v3260_v35  ;;  %vm3259_vm6 = vcmp.eq.f32.partialorder %v3258_v20, 8.507059e+37  ;;  %vm3367_vm12 = vmor %vm3365_vm9, %vm3366_vm14  ;;  %v3386_v60 = vand.u32 2147483648, %v4993_v52 }
0x21ee   :  { %v3237_v55 = vmul.f32 %v4140_v57, %v3236_v16  ;;  %vm3380_vm15 = vweird.f32 %v4993_v52 }
0x21ef   :  { %v3363_v7 = vmul.f32 %v4142_v23, %v3362_v21  ;;  %v3387_v19 = vor.u32 1.1754944e-38, %v3386_v60 }
0x21f0   :  { %v3238_v34 = vadd.f32 %v4140_v57, %v3237_v55 }
0x21f1   :  { %v4144_v28 = vpop.eup %4143  ;;  %v3364_v50 = vadd.f32 %v4142_v23, %v3363_v7 }
0x21f2   :  { %v3242_v4 = vsel %vm3241_vm1, %v4140_v57, %v3238_v34  ;;  %v3250_v61 = vmul.f32 %v4144_v28, %v3233_v56  ;;  %v3922_v27 = vpop.permute.xlu2 %3921  ;;  %v4146_v1 = vpop.eup %4145  ;;  %vm3255_vm13 = vweird.f32 %v4144_v28  ;;  %v2891_v57 = vld [vmem:[#allocation2 + $0x488] sm:$0xff]  ;;  %v2888_v56 = vld [vmem:[#allocation2 + $0x470] sm:$0xff] }
0x21f3   :  { %v3247_v39 = vsel %vm3244_vm4, %v3246_v58, %v3242_v4  ;;  %v3923_v63 = vunpack.i.l.bf16 %v3922_v27  ;;  %v3924_v3 = vunpack.i.h.bf16 %v3922_v27  ;;  %v3376_v11 = vmul.f32 %v4146_v1, %v4993_v52  ;;  %vm3256_vm3 = vmor %vm3254_vm5, %vm3255_vm13  ;;  %3474 = vmatpush.msra.mxu1 %v2891_v57 }
0x21f4   :  { %v3251_v45 = vsub.f32 1.0, %v3250_v61  ;;  %v3248_v5 = vmul.f32 %v4973_v22, %v3247_v39  ;;  %v3368_v31 = vsel %vm3367_vm12, %v4142_v23, %v3364_v50  ;;  %vm3381_vm0 = vweird.f32 %v4146_v1  ;;  %v3540_v50 = vld [vmem:[#allocation2 + $0x4c0] sm:$0xff] }
0x21f5   :  { %3290 = vmatpush.msra.mxu2 %v3923_v63  ;;  %v3377_v17 = vsub.f32 1.0, %v3376_v11  ;;  %v3373_v8 = vsel %vm3370_vm10, %v3372_v37, %v3368_v31  ;;  %vm3382_vm1 = vmor %vm3380_vm15, %vm3381_vm0  ;;  %3475 = vmatpush.msra.mxu1 %v2890_v54  ;;  %v3607_v31 = vld [vmem:[#allocation2 + $0x558] sm:$0xff]  ;;  %v3605_v37 = vld [vmem:[#allocation2 + $0x548] sm:$0xff] }
0x21f6   :  { %v3252_v2 = vmul.f32 %v4144_v28, %v3251_v45  ;;  %v3374_v41 = vmul.f32 %v4956_v29, %v3373_v8  ;;  %3608 = vmatpush.msrb.mxu3 %v3607_v31 }
0x21f7   :  { %3291 = vmatpush.msra.mxu2 %v3924_v3  ;;  %v3378_v32 = vmul.f32 %v4146_v1, %v3377_v17  ;;  %v3539_v17 = vld [vmem:[#allocation2 + $0x4b8] sm:$0xff] }
0x21f8   :  { %v3253_v10 = vadd.f32 %v4144_v28, %v3252_v2  ;;  %3858 = vmatmul.msk.f32.vlgmr.msra.gmra.mxu2 %vm758_vm7, %v3248_v5 }
0x21f9   :  { %v3379_v53 = vadd.f32 %v4146_v1, %v3378_v32  ;;  %v3606_v32 = vld [vmem:[#allocation2 + $0x550] sm:$0xff] }
0x21fa   :  { %v3257_v0 = vsel %vm3256_vm3, %v4144_v28, %v3253_v10  ;;  %3609 = vmatpush.msrb.mxu3 %v3606_v32 }
0x21fb   :  { %v3262_v40 = vsel %vm3259_vm6, %v3261_v14, %v3257_v0  ;;  %v3383_v30 = vsel %vm3382_vm1, %v4146_v1, %v3379_v53  ;;  %v3542_v0 = vld [vmem:[#allocation2 + $0x4d0] sm:$0xff] }
0x21fc   :  { %v3263_v22 = vmul.f32 %v4977_v9, %v3262_v40  ;;  %v3384_v9 = vand.u32 2147483647, %v4993_v52  ;;  %3563 = vmatpush.msrb.mxu2 %v3542_v0  ;;  %v3541_v40 = vld [vmem:[#allocation2 + $0x4c8] sm:$0xff]  ;;  %3610 = vmatpush.msrb.mxu3 %v3605_v37 }
0x21fe   :  { %vm3385_vm4 = vcmp.eq.f32.partialorder %v3384_v9, 8.507059e+37  ;;  %3564 = vmatpush.msrb.mxu2 %v3541_v40 }
0x21ff   :  { %v3388_v15 = vsel %vm3385_vm4, %v3387_v19, %v3383_v30 }
0x2200   :  { %3859 = vmatmul.msk.f32.gmra.mxu2 %vm758_vm7, %v3263_v22  ;;  %v3389_v33 = vmul.f32 %v4979_v49, %v3388_v15  ;;  %v2889_v49 = vld [vmem:[#allocation2 + $0x478] sm:$0xff] }
0x2201   :  { %3476 = vmatpush.msra.mxu1 %v2889_v49  ;;  %3565 = vmatpush.msrb.mxu2 %v3540_v50 }
0x2203   :  { %v3927_v38 = vpop.permute.xlu1 %3926  ;;  %3477 = vmatpush.msra.mxu1 %v2888_v56  ;;  %3566 = vmatpush.msrb.mxu2 %v3539_v17 }
0x2204   :  { %v3928_v43 = vunpack.i.l.bf16 %v3927_v38  ;;  %v3929_v44 = vunpack.i.h.bf16 %v3927_v38 }
0x2206   :  { %3416 = vmatpush.msra.mxu0 %v3928_v43  ;;  %v3604_v43 = vld [vmem:[#allocation2 + $0x540] sm:$0xff] }
0x2207   :  { %3611 = vmatpush.msrb.mxu3 %v3604_v43 }
0x2208   :  { %3417 = vmatpush.msra.mxu0 %v3929_v44  ;;  %v3167_v59 = vpop.f32.mrf.mxu0 }
0x2209   :  { %3864 = vmatmul.msk.f32.vlgmr.msra.gmra.mxu0 %vm758_vm7, %v3374_v41  ;;  %3427 = vrot.lane.b32.xlu0 %v3167_v59, %s4191_s18 }
0x2210   :  { %v3170_v48 = vpop.f32.mrf.mxu0 }
0x2211   :  { %3865 = vmatmul.msk.f32.gmra.mxu0 %vm758_vm7, %v3389_v33  ;;  %3429 = vrot.lane.b32.xlu2 %v3170_v48, %s4191_s18  ;;  %v3965_v33 = vld [vmem:[#allocation2 + $0x4a8] ss:$0 sm:$0xff] }
0x226b   :  { %v3430_v34 = vpop.permute.xlu2 %3429 }
0x226c   :  { %v3450_v24 = vsel %vm228_vm11, %v4954_v46, %v3430_v34  ;;  %v3601_v34 = vld [vmem:[#allocation2 + $0x528] sm:$0xff] }
0x227b   :  { %v3293_v6 = vpop.f32.mrf.mxu2  ;;  %v3428_v16 = vpop.permute.xlu0 %3427 }
0x227c   :  { %3435 = vrot.lane.b32.xlu0 %v3293_v6, %s4205_s10  ;;  %v3449_v23 = vsel %vm228_vm11, %v4952_v62, %v3428_v16  ;;  %v3964_v62 = vld [vmem:[#allocation2 + $0x490] ss:$0 sm:$0xff] }
0x2283   :  { %v3296_v29 = vpop.f32.mrf.mxu2 }
0x2284   :  { %3437 = vrot.lane.b32.xlu1 %v3296_v29, %s4205_s10  ;;  %v3966_v29 = vld [vmem:[#allocation2 + $0x4b0] ss:$0 sm:$0xff] }
0x2286   :  { %v3419_v13 = vpop.f32.mrf.mxu0 }
0x2287   :  { %3443 = vrot.lane.b32.xlu0 %v3419_v13, %s4204_s9 }
0x228e   :  { %v3422_v51 = vpop.f32.mrf.mxu0 }
0x228f   :  { %3445 = vrot.lane.b32.xlu0 %v3422_v51, %s4204_s9 }
0x22ee   :  { %v3436_v52 = vpop.permute.xlu0 %3435 }
0x22ef   :  { %v3451_v55 = vsel %vm758_vm7, %v3449_v23, %v3436_v52 }
0x22f6   :  { %v3438_v28 = vpop.permute.xlu1 %3437 }
0x22f7   :  { %v3452_v4 = vsel %vm758_vm7, %v3450_v24, %v3438_v28  ;;  %v3600_v28 = vld [vmem:[#allocation2 + $0x520] sm:$0xff]  ;;  %v3599_v24 = vld [vmem:[#allocation2 + $0x518] sm:$0xff] }
0x22f9   :  { %v3444_v18 = vpop.permute.xlu0 %3443 }
0x22fa   :  { %v3453_v12 = vsel %vm761_vm8, %v3451_v55, %v3444_v18  ;;  %v3603_v18 = vld [vmem:[#allocation2 + $0x538] sm:$0xff] }
0x22fb   :  { %3866 = vmatmul.msk.f32.vlgmr.msra.gmra.mxu1 %vm123_vm2, %v3453_v12  ;;  %3612 = vmatpush.msrb.mxu3 %v3603_v18  ;;  %v3602_v12 = vld [vmem:[#allocation2 + $0x530] sm:$0xff] }
0x22fd   :  { %3613 = vmatpush.msrb.mxu3 %v3602_v12 }
0x22ff   :  { %3614 = vmatpush.msrb.mxu3 %v3601_v34 }
0x2301   :  { %v3446_v58 = vpop.permute.xlu0 %3445  ;;  %3615 = vmatpush.msrb.mxu3 %v3600_v28 }
0x2302   :  { %v3454_v61 = vsel %vm761_vm8, %v3452_v4, %v3446_v58  ;;  %v3598_v4 = vld [vmem:[#allocation2 + $0x510] sm:$0xff]  ;;  %v3597_v58 = vld [vmem:[#allocation2 + $0x508] sm:$0xff] }
0x2303   :  { %3867 = vmatmul.msk.f32.gmra.mxu1 %vm123_vm2, %v3454_v61  ;;  %3616 = vmatpush.msrb.mxu3 %v3599_v24  ;;  %v3596_v61 = vld [vmem:[#allocation2 + $0x500] sm:$0xff] }
0x2305   :  { %3617 = vmatpush.msrb.mxu3 %v3598_v4 }
0x2307   :  { %3618 = vmatpush.msrb.mxu3 %v3597_v58 }
0x2309   :  { %3619 = vmatpush.msrb.mxu3 %v3596_v61 }
0x2378   :  { %v3479_v27 = vpop.f32.mrf.mxu1 }
0x2379   :  { %v3480_v39 = vadd.f32 %v3964_v62, %v3479_v27  ;;  %v3594_v27 = vld [vmem:[#allocation2 + $0x4f0] sm:$0xff] }
0x237b   :  { %v5025_v45 = vadd.f32 %v3480_v39, %v4848_v36  ;;  %v3593_v39 = vld [vmem:[#allocation2 + $0x4e8] sm:$0xff] }
0x237d   :  { %v3489_v63 = vsel %vm123_vm2, %v5025_v45, 0.0 }
0x237e   :  { %3490 = vadd.xlane.f32.xlu2 %v3489_v63  ;;  %v3592_v63 = vld [vmem:[#allocation2 + $0x4e0] sm:$0xff] }
0x2380   :  { %v3482_v21 = vpop.f32.mrf.mxu1 }
0x2381   :  { %v3483_v1 = vadd.f32 %v3964_v62, %v3482_v21  ;;  %v3595_v62 = vld [vmem:[#allocation2 + $0x4f8] sm:$0xff] }
0x2382   :  { %3620 = vmatpush.msrb.mxu3 %v3595_v62  ;;  %v3967_v21 = vld [vmem:[#allocation2 + $0x4d8] ss:$0 sm:$0xff] }
0x2383   :  { %v5030_v46 = vadd.f32 %v3483_v1, %v4853_v42 }
0x2384   :  { %3621 = vmatpush.msrb.mxu3 %v3594_v27  ;;  %v3969_v27 = vld [vmem:[#allocation2 + $0x608] ss:$0 sm:$0xff] }
0x2385   :  { %v3492_v2 = vsel %vm123_vm2, %v5030_v46, 0.0 }
0x2386   :  { %3493 = vadd.xlane.f32.xlu1 %v3492_v2  ;;  %3622 = vmatpush.msrb.mxu3 %v3593_v39 }
0x2388   :  { %3623 = vmatpush.msrb.mxu3 %v3592_v63 }
0x23f1   :  { %v3491_v35 = vpop.xlane.xlu2 %3490 }
0x23f2   :  { %v3495_v3 = vmul.f32 %v3491_v35, %v4253_v47 }
0x23f4   :  { %v3497_v20 = vsub.f32 %v5025_v45, %v3495_v3 }
0x23f6   :  { %v3499_v36 = vmul.f32 %v3497_v20, %v3497_v20 }
0x23f8   :  { %v3501_v5 = vsel %vm123_vm2, %v3499_v36, 0.0 }
0x23f9   :  { %3502 = vadd.xlane.f32.xlu0 %v3501_v5  ;;  %v3494_v10 = vpop.xlane.xlu1 %3493 }
0x23fa   :  { %v3496_v7 = vmul.f32 %v3494_v10, %v4253_v47 }
0x23fc   :  { %v3498_v11 = vsub.f32 %v5030_v46, %v3496_v7 }
0x23fe   :  { %v3500_v42 = vmul.f32 %v3498_v11, %v3498_v11 }
0x2400   :  { %v3504_v14 = vsel %vm123_vm2, %v3500_v42, 0.0 }
0x2401   :  { %3505 = vadd.xlane.f32.xlu2 %v3504_v14 }
0x246c   :  { %v3503_v25 = vpop.xlane.xlu0 %3502 }
0x246d   :  { %v3507_v26 = vmul.f32 %v3503_v25, %v4253_v47 }
0x246f   :  { %v3509_v22 = vadd.f32 1e-05, %v3507_v26 }
0x2471   :  { %4147 = vrsqrt.f32 %v3509_v22  ;;  %vm3517_vm7 = vweird.f32 %v3509_v22 }
0x2474   :  { %v3506_v38 = vpop.xlane.xlu2 %3505 }
0x2475   :  { %v3508_v8 = vmul.f32 %v3506_v38, %v4253_v47  ;;  %v3968_v38 = vld [vmem:[#allocation2 + $0x560] ss:$0 sm:$0xff] }
0x2477   :  { %v4148_v53 = vpop.eup %4147  ;;  %v3510_v60 = vadd.f32 1e-05, %v3508_v8 }
0x2478   :  { %v3512_v44 = vmul.f32 %v4148_v53, %v3509_v22  ;;  %vm3518_vm11 = vweird.f32 %v4148_v53 }
0x2479   :  { %4149 = vrsqrt.f32 %v3510_v60  ;;  %vm3519_vm8 = vmor %vm3517_vm7, %vm3518_vm11  ;;  %vm3527_vm5 = vweird.f32 %v3510_v60 }
0x247a   :  { %v3513_v9 = vmul.f32 %v4148_v53, %v3512_v44 }
0x247c   :  { %v3514_v41 = vmul.f32 0.5, %v3513_v9 }
0x247e   :  { %v3515_v59 = vsub.f32 1.5, %v3514_v41 }
0x247f   :  { %v4150_v30 = vpop.eup %4149 }
0x2480   :  { %v3516_v19 = vmul.f32 %v4148_v53, %v3515_v59  ;;  %v3522_v15 = vmul.f32 %v4150_v30, %v3510_v60  ;;  %vm3528_vm13 = vweird.f32 %v4150_v30 }
0x2481   :  { %vm3529_vm3 = vmor %vm3527_vm5, %vm3528_vm13 }
0x2482   :  { %v3520_v48 = vsel %vm3519_vm8, %v4148_v53, %v3516_v19  ;;  %v3523_v6 = vmul.f32 %v4150_v30, %v3522_v15 }
0x2483   :  { %v3531_v13 = vmul.f32 %v3520_v48, %v3497_v20 }
0x2484   :  { %v3524_v51 = vmul.f32 0.5, %v3523_v6 }
0x2485   :  { %v3534_v57 = vmul.f32 %v3965_v33, %v3531_v13 }
0x2486   :  { %v3525_v54 = vsub.f32 1.5, %v3524_v51 }
0x2487   :  { %v3537_v49 = vadd.f32 %v3966_v29, %v3534_v57  ;;  %v3691_v57 = vld [vmem:[#allocation2 + $0x310] sm:$0xff] }
0x2488   :  { %v3526_v56 = vmul.f32 %v4150_v30, %v3525_v54  ;;  %v3690_v54 = vld [vmem:[#allocation2 + $0x308] sm:$0xff] }
0x2489   :  { %3868 = vmatmul.msk.f32.vlgmr.msrb.gmra.mxu2 %vm123_vm2, %v3537_v49  ;;  %v3689_v49 = vld [vmem:[#allocation2 + $0x300] sm:$0xff] }
0x248a   :  { %v3530_v16 = vsel %vm3529_vm3, %v4150_v30, %v3526_v56 }
0x248b   :  { %v3532_v52 = vmul.f32 %v3530_v16, %v3498_v11 }
0x248d   :  { %v3535_v23 = vmul.f32 %v3965_v33, %v3532_v52 }
0x248f   :  { %v3538_v55 = vadd.f32 %v3966_v29, %v3535_v23 }
0x2491   :  { %3869 = vmatmul.msk.f32.gmra.mxu2 %vm123_vm2, %v3538_v55 }
0x250c   :  { %v3568_v1 = vpop.f32.mrf.mxu2 }
0x250d   :  { %v3569_v2 = vadd.f32 %v3967_v21, %v3568_v1 }
0x250f   :  { %v3576_v35 = vmul.f32 0.044715, %v3569_v2  ;;  %v3574_v17 = vmul.f32 0.5, %v3569_v2 }
0x2511   :  { %v3578_v3 = vmul.f32 %v3576_v35, %v3569_v2 }
0x2513   :  { %v3580_v20 = vmul.f32 %v3578_v3, %v3569_v2 }
0x2514   :  { %v3571_v36 = vpop.f32.mrf.mxu2 }
0x2515   :  { %v3582_v5 = vadd.f32 %v3580_v20, %v3569_v2  ;;  %v3572_v10 = vadd.f32 %v3967_v21, %v3571_v36  ;;  %v3970_v21 = vld [vmem:[#allocation2 + $0x610] ss:$0 sm:$0xff] }
0x2517   :  { %v3584_v7 = vmul.f32 0.7978846, %v3582_v5  ;;  %v3577_v11 = vmul.f32 0.044715, %v3572_v10  ;;  %v3575_v31 = vmul.f32 0.5, %v3572_v10 }
0x2519   :  { %4151 = vtanh.f32 %v3584_v7  ;;  %v3579_v42 = vmul.f32 %v3577_v11, %v3572_v10 }
0x251b   :  { %v3581_v14 = vmul.f32 %v3579_v42, %v3572_v10 }
0x251d   :  { %v3583_v0 = vadd.f32 %v3581_v14, %v3572_v10 }
0x251f   :  { %v4152_v40 = vpop.eup %4151  ;;  %v3585_v50 = vmul.f32 0.7978846, %v3583_v0 }
0x2520   :  { %v3588_v25 = vadd.f32 1.0, %v4152_v40 }
0x2521   :  { %4153 = vtanh.f32 %v3585_v50 }
0x2522   :  { %v3590_v26 = vmul.f32 %v3588_v25, %v3574_v17 }
0x2524   :  { %3624 = vmatmul.f32.vlgmr.msrb.gmra.mxu3 %v3590_v26 }
0x2527   :  { %v4154_v22 = vpop.eup %4153 }
0x2528   :  { %v3589_v32 = vadd.f32 1.0, %v4154_v22 }
0x252a   :  { %v3591_v37 = vmul.f32 %v3589_v32, %v3575_v31 }
0x252c   :  { %3627 = vmatmul.f32.gmra.mxu3 %v3591_v37 }
0x25a7   :  { %v3625_v8 = vpop.f32.mrf.mxu3 }
0x25a8   :  { %v3631_v43 = vadd.f32 %v3625_v8, %v5025_v45 }
0x25aa   :  { %v3635_v53 = vadd.f32 %v3968_v38, %v3631_v43 }
0x25ac   :  { %v3639_v60 = vsel %vm123_vm2, %v3635_v53, 0.0 }
0x25ad   :  { %3640 = vadd.xlane.f32.xlu1 %v3639_v60 }
0x25af   :  { %v3628_v44 = vpop.f32.mrf.mxu3 }
0x25b0   :  { %v3632_v9 = vadd.f32 %v3628_v44, %v5030_v46  ;;  %v3692_v46 = vld [vmem:[#allocation2 + $0x318] sm:$0xff] }
0x25b1   :  { %3711 = vmatpush.msrb.mxu0 %v3692_v46 }
0x25b2   :  { %v3636_v41 = vadd.f32 %v3968_v38, %v3632_v9 }
0x25b3   :  { %3712 = vmatpush.msrb.mxu0 %v3691_v57 }
0x25b4   :  { %v3642_v59 = vsel %vm123_vm2, %v3636_v41, 0.0 }
0x25b5   :  { %3643 = vadd.xlane.f32.xlu2 %v3642_v59  ;;  %3713 = vmatpush.msrb.mxu0 %v3690_v54 }
0x25b7   :  { %3714 = vmatpush.msrb.mxu0 %v3689_v49 }
0x2620   :  { %v3641_v30 = vpop.xlane.xlu1 %3640 }
0x2621   :  { %v3645_v19 = vmul.f32 %v3641_v30, %v4253_v47 }
0x2623   :  { %v3647_v15 = vsub.f32 %v3635_v53, %v3645_v19 }
0x2625   :  { %v3649_v33 = vmul.f32 %v3647_v15, %v3647_v15 }
0x2627   :  { %v3651_v48 = vsel %vm123_vm2, %v3649_v33, 0.0 }
0x2628   :  { %3652 = vadd.xlane.f32.xlu0 %v3651_v48  ;;  %v3644_v45 = vpop.xlane.xlu2 %3643 }
0x2629   :  { %v3646_v6 = vmul.f32 %v3644_v45, %v4253_v47 }
0x262b   :  { %v3648_v29 = vsub.f32 %v3636_v41, %v3646_v6 }
0x262d   :  { %v3650_v13 = vmul.f32 %v3648_v29, %v3648_v29 }
0x262f   :  { %v3654_v51 = vsel %vm123_vm2, %v3650_v13, 0.0 }
0x2630   :  { %3655 = vadd.xlane.f32.xlu1 %v3654_v51 }
0x269b   :  { %v3653_v56 = vpop.xlane.xlu0 %3652 }
0x269c   :  { %v3657_v16 = vmul.f32 %v3653_v56, %v4253_v47 }
0x269e   :  { %v3659_v52 = vadd.f32 1e-05, %v3657_v16 }
0x26a0   :  { %4155 = vrsqrt.f32 %v3659_v52  ;;  %vm3667_vm14 = vweird.f32 %v3659_v52 }
0x26a3   :  { %v3656_v23 = vpop.xlane.xlu1 %3655 }
0x26a4   :  { %v3658_v55 = vmul.f32 %v3656_v23, %v4253_v47 }
0x26a6   :  { %v4156_v18 = vpop.eup %4155  ;;  %v3660_v12 = vadd.f32 1e-05, %v3658_v55 }
0x26a7   :  { %v3662_v34 = vmul.f32 %v4156_v18, %v3659_v52  ;;  %vm3668_vm6 = vweird.f32 %v4156_v18 }
0x26a8   :  { %4157 = vrsqrt.f32 %v3660_v12  ;;  %vm3669_vm9 = vmor %vm3667_vm14, %vm3668_vm6  ;;  %vm3677_vm10 = vweird.f32 %v3660_v12 }
0x26a9   :  { %v3663_v28 = vmul.f32 %v4156_v18, %v3662_v34 }
0x26ab   :  { %v3664_v24 = vmul.f32 0.5, %v3663_v28 }
0x26ad   :  { %v3665_v4 = vsub.f32 1.5, %v3664_v24 }
0x26ae   :  { %v4158_v58 = vpop.eup %4157 }
0x26af   :  { %v3666_v61 = vmul.f32 %v4156_v18, %v3665_v4  ;;  %v3672_v62 = vmul.f32 %v4158_v58, %v3660_v12  ;;  %vm3678_vm12 = vweird.f32 %v4158_v58 }
0x26b0   :  { %vm3679_vm0 = vmor %vm3677_vm10, %vm3678_vm12 }
0x26b1   :  { %v3670_v39 = vsel %vm3669_vm9, %v4156_v18, %v3666_v61  ;;  %v3673_v63 = vmul.f32 %v4158_v58, %v3672_v62 }
0x26b2   :  { %v3681_v1 = vmul.f32 %v3670_v39, %v3647_v15 }
0x26b3   :  { %v3674_v2 = vmul.f32 0.5, %v3673_v63 }
0x26b4   :  { %v3684_v47 = vmul.f32 %v3969_v27, %v3681_v1 }
0x26b5   :  { %v3675_v35 = vsub.f32 1.5, %v3674_v2 }
0x26b6   :  { %v3687_v3 = vadd.f32 %v3970_v21, %v3684_v47 }
0x26b7   :  { %v3676_v20 = vmul.f32 %v4158_v58, %v3675_v35 }
0x26b8   :  { %3870 = vmatmul.msk.f32.vlgmr.msrb.gmra.mxu0 %vm123_vm2, %v3687_v3 }
0x26b9   :  { %v3680_v36 = vsel %vm3679_vm0, %v4158_v58, %v3676_v20 }
0x26ba   :  { %v3682_v5 = vmul.f32 %v3680_v36, %v3648_v29 }
0x26bc   :  { %v3685_v10 = vmul.f32 %v3969_v27, %v3682_v5 }
0x26be   :  { %v3688_v7 = vadd.f32 %v3970_v21, %v3685_v10 }
0x26c0   :  { %3871 = vmatmul.msk.f32.gmra.mxu0 %vm123_vm2, %v3688_v7 }
0x2735   :  { %v3716_v11 = vpop.f32.mrf.mxu0 }
0x2736   :  { %3722 = vst [vmem:[%s5065_s3] sm:$0xff] %v3716_v11 }
0x273d   :  { %v3719_v42 = vpop.f32.mrf.mxu0 }
0x273e   :  { %3723 = vst [vmem:[%s5065_s3 + $0x8] sm:$0xff] %v3719_v42 }
0x273f   :  { %3728 = vsyncpa [#allocation3], 1 }

</bundles_post_ra>
